<compile_context>
chip_gen: v5e
topology: v5e:2x2
jax: 0.10.0
libtpu: 0.0.40
codegen_flags: <defaults>
</compile_context>

<pallas_src>
import functools

import jax
import jax.numpy as jnp
from jax.experimental import pallas as pl
from jax.experimental.pallas import tpu as pltpu


# --------------------------------------------------------------------------
# host-side helpers (1-D pooling / bilinear operators; reference also uses kron)
# --------------------------------------------------------------------------
def _avgpool_matrix(out_size, k, dtype=jnp.float32):
    """P[i, h] = 1/k for h in [i*k, (i+1)*k), else 0.  Shape (out_size, out_size*k)."""
    in_size = out_size * k
    blocks = jnp.arange(in_size) // k
    return (jnp.arange(out_size)[:, None] == blocks[None, :]).astype(dtype) / float(k)


def _bilinear_matrix(out_size, in_size, dtype=jnp.float32):
    """Interpolation matrix M[out, in] for align_corners=True bilinear resize."""
    if in_size == 1:
        return jnp.ones((out_size, 1), dtype)
    assert out_size > 1, "align_corners=True resize to >1 from 1 handled above"
    src = jnp.arange(out_size, dtype=jnp.float32) * ((in_size - 1) / (out_size - 1))
    lo = jnp.clip(jnp.floor(src).astype(jnp.int32), 0, in_size - 2)
    frac = src - lo.astype(jnp.float32)
    idx = jnp.arange(out_size)
    m = jnp.zeros((out_size, in_size), dtype)
    m = m.at[idx, lo].set(1.0 - frac)
    m = m.at[idx, lo + 1].add(frac)
    return m


# --------------------------------------------------------------------------
# Pallas kernel: one batch image per grid step (lane-dense NHWC)
# --------------------------------------------------------------------------
def _ppm_kernel(sizes, *refs):
    f32, bf16 = jnp.float32, jnp.bfloat16
    n_br = len(sizes)
    x_ref, wc_ref, wbx_ref, wbb_ref, shift_ref = refs[:5]
    op_refs = refs[5:5 + 3 * n_br]            # per branch: (pw_b, uw_b, uh)
    out_ref = refs[5 + 3 * n_br]

    _, H, W, Cin = x_ref.shape
    Cout = out_ref.shape[-1]
    Cq = wc_ref.shape[-1]
    HW = H * W

    x_f32 = x_ref[0]                          # (H, W, Cin) f32
    x2_bf = x_f32.reshape(HW, Cin).astype(bf16)

    # convB passthrough term (BN scale folded into wbx host-side): N = Cout = 128
    acc = jnp.dot(x2_bf, wbx_ref[...], preferred_element_type=f32)     # (HW, Cout)
    acc = acc.reshape(H, W, Cout)

    wbb = wbb_ref[...]                        # (4*Cq, Cout) bf16, per-branch blocks

    for bi, k in enumerate(sizes):
        hk, wk = H // k, W // k
        pw_ref, uw_ref, uh_ref = op_refs[3 * bi:3 * bi + 3]

        # ---- separable AvgPool2d(k) ----
        # H direction: matrix-free sum of the k rows in each block (f32 VPU adds)
        x5 = x_f32.reshape(hk, k, W, Cin)
        xh = x5[:, 0]
        for r in range(1, k):
            xh = xh + x5[:, r]                                          # (hk, W, Cin)
        # W direction: tiny batched bf16 MXU matmul; 1/k^2 folded into pw
        pooled = jnp.einsum("abj,ajc->abc", pw_ref[...], xh.astype(bf16),
                            preferred_element_type=f32)                 # (hk, wk, Cin)

        # ---- shared 1x1 conv (no bias) + ReLU, same op order as PyTorch ----
        pooled2 = pooled.reshape(hk * wk, Cin).astype(bf16)
        proj = jnp.maximum(
            jnp.dot(pooled2, wc_ref[...], preferred_element_type=f32), 0.0)   # (hw_k, Cq)

        # ---- fold this branch's convB block (kills the channel concat) ----
        t = jnp.dot(proj.astype(bf16), wbb[bi * Cq:(bi + 1) * Cq, :],
                    preferred_element_type=f32)                         # (hw_k, Cout)
        t3 = t.reshape(hk, wk, Cout).astype(bf16)

        # ---- separable bilinear upsample (align_corners=True) ----
        # W direction: batched bf16 MXU matmul -> (hk, W, Cout)
        s = jnp.einsum("ajb,abc->ajc", uw_ref[...], t3,
                       preferred_element_type=f32)
        # H direction: rank-1 accumulation on the VPU (hk small terms)
        uh = uh_ref[...]                                                # (H, hk) f32
        for a in range(hk):
            acc = acc + uh[:, a:a + 1][:, :, None] * s[a][None, :, :]

    # BN shift + final ReLU (scale already folded into the weights)
    out = jnp.maximum(acc + shift_ref[...], 0.0)
    out_ref[0] = out.astype(out_ref.dtype)


# --------------------------------------------------------------------------
# NHWC entry point (no transposes) and NCHW wrapper (PyTorch-compatible)
# --------------------------------------------------------------------------
def ppm_forward_nhwc(x_nhwc, params, sizes=(16, 8, 4, 2)):
    N, H, W, Cin = x_nhwc.shape
    assert Cin % 4 == 0
    Cq = Cin // 4
    Cout = params["convB_weight"].shape[0]
    assert params["convB_weight"].shape[1] == 2 * Cin
    for k in sizes:
        assert H % k == 0 and W % k == 0, "spatial dims must be divisible by pool sizes"

    x = x_nhwc.astype(jnp.float32)

    # shared 1x1 conv weight: torch (Cq, Cin, 1, 1) -> (Cin, Cq), bf16 MXU feed
    wc = jnp.transpose(params["conv_weight"][:, :, 0, 0]).astype(jnp.bfloat16)

    # convB 1x1 (no bias) + eval-mode BN scale folded into the weight (exact);
    # split into per-branch blocks (Cq, Cout) and the x-passthrough (Cin, Cout).
    eps = 1e-5
    bn_scale = params["bn_gamma"] / jnp.sqrt(params["bn_var"] + eps)
    bn_shift = (params["bn_beta"] - params["bn_mean"] * bn_scale)
    bn_shift = bn_shift.reshape(1, 1, Cout).astype(jnp.float32)
    wb = jnp.transpose(params["convB_weight"][:, :, 0, 0]) * bn_scale[None, :]   # (2Cin, Cout)
    wbb = wb[: 4 * Cq].astype(jnp.bfloat16)     # 4 stacked branch blocks, in `sizes` order
    wbx = wb[4 * Cq:].astype(jnp.bfloat16)      # passthrough block (Cin, Cout)

    # per-branch separable operators (tiny; batched operands pre-broadcast host-side)
    ops = []
    for k in sizes:
        hk, wk = H // k, W // k
        pw = (_avgpool_matrix(wk, k) / k).astype(jnp.bfloat16)     # (wk, W), carries 1/k^2
        uw = _bilinear_matrix(W, wk).astype(jnp.bfloat16)          # (W, wk)
        uh = _bilinear_matrix(H, hk).astype(jnp.float32)           # (H, hk)
        ops.append(jnp.broadcast_to(pw[None], (hk, wk, W)))
        ops.append(jnp.broadcast_to(uw[None], (hk, W, wk)))
        ops.append(uh)

    inputs = [x, wc, wbx, wbb, bn_shift] + ops

    def _const_map(ndim):
        return lambda n: (0,) * ndim

    in_specs = [pl.BlockSpec((1, H, W, Cin), lambda n: (n, 0, 0, 0))]
    for arr in inputs[1:]:
        in_specs.append(pl.BlockSpec(arr.shape, _const_map(arr.ndim)))

    # VMEM budget from actual block sizes (double-buffered x/out + invariants)
    xblock = H * W * Cin * 4
    oblock = H * W * Cout * 4
    const_bytes = sum(int(a.size) * a.dtype.itemsize for a in inputs[1:])
    vmem_limit = min(128 << 20,
                     max(32 << 20, 4 * (xblock + oblock) + 2 * const_bytes + (8 << 20)))

    # advisory cost estimate for the XLA scheduler
    hw = H * W
    flops = 2 * hw * Cin * Cout                      # x @ Wb_x
    for k in sizes:
        hk, wk = H // k, W // k
        flops += (k - 1) * hk * W * Cin              # H-pool adds
        flops += 2 * hk * wk * W * Cin               # W-pool matmul
        flops += 2 * hk * wk * Cin * Cq              # shared 1x1 conv
        flops += 2 * hk * wk * Cq * Cout             # per-branch Wb fold
        flops += 2 * hk * W * wk * Cout              # W-expand matmul
        flops += 2 * hk * H * W * Cout               # H-expand rank-1 accumulation
    cost = pl.CostEstimate(
        flops=int(N * flops),
        transcendentals=0,
        bytes_accessed=int(N * (xblock + oblock) + const_bytes),
    )

    out_nhwc = pl.pallas_call(
        functools.partial(_ppm_kernel, tuple(sizes)),
        out_shape=jax.ShapeDtypeStruct((N, H, W, Cout), jnp.float32),
        grid_spec=pltpu.PrefetchScalarGridSpec(
            num_scalar_prefetch=0,
            grid=(N,),
            in_specs=in_specs,
            out_specs=pl.BlockSpec((1, H, W, Cout), lambda n: (n, 0, 0, 0)),
        ),
        compiler_params=pltpu.CompilerParams(
            dimension_semantics=("parallel",),
            vmem_limit_bytes=int(vmem_limit),
        ),
        cost_estimate=cost,
    )(*inputs)
    return out_nhwc


def ppm_forward(x_nchw, params, sizes=(16, 8, 4, 2)):
    # NOTE: if the surrounding network can stay NHWC, call ppm_forward_nhwc
    # directly -- these two transposes are a full extra HBM round trip each.
    x_nhwc = jnp.transpose(x_nchw, (0, 2, 3, 1))
    out_nhwc = ppm_forward_nhwc(x_nhwc, params, sizes)
    return jnp.transpose(out_nhwc, (0, 3, 1, 2))


# --------------------------------------------------------------------------
# pure-JAX reference (mirrors PyTorch op order; uses dense Kronecker operators,
# i.e. an independent construction from the kernel's separable decomposition)
# --------------------------------------------------------------------------
def ppm_reference(x_nchw, params, sizes=(16, 8, 4, 2)):
    N, Cin, H, W = x_nchw.shape
    Cout = params["convB_weight"].shape[0]
    x = jnp.transpose(x_nchw, (0, 2, 3, 1)).astype(jnp.float32)
    xf = x.reshape(N, H * W, Cin)
    wc = jnp.transpose(params["conv_weight"][:, :, 0, 0])
    wb = jnp.transpose(params["convB_weight"][:, :, 0, 0])
    eps = 1e-5
    scale = params["bn_gamma"] / jnp.sqrt(params["bn_var"] + eps)
    shift = params["bn_beta"] - params["bn_mean"] * scale

    branches = []
    for k in sizes:
        hk, wk = H // k, W // k
        P = jnp.kron(_avgpool_matrix(hk, k), _avgpool_matrix(wk, k))
        U = jnp.kron(_bilinear_matrix(H, hk), _bilinear_matrix(W, wk))
        pooled = jnp.einsum("ps,nsc->npc", P, xf)
        proj = jnp.maximum(jnp.einsum("npc,cq->npq", pooled, wc), 0.0)
        branches.append(jnp.einsum("sp,npq->nsq", U, proj))
    branches.append(xf)
    cat = jnp.concatenate(branches, axis=-1)
    res = jnp.einsum("nsc,co->nso", cat, wb) * scale + shift
    out = jnp.maximum(res, 0.0).reshape(N, H, W, Cout)
    return jnp.transpose(out, (0, 3, 1, 2))


# --------------------------------------------------------------------------
# parameters
# --------------------------------------------------------------------------
def init_params(key, in_channels=128, out_channels=128):
    inter = in_channels // 4
    ks = jax.random.split(key, 6)
    p = {}
    p["conv_weight"] = 0.1 * jax.random.normal(
        ks[0], (inter, in_channels, 1, 1), jnp.float32)
    p["convB_weight"] = 0.05 * jax.random.normal(
        ks[1], (out_channels, 2 * in_channels, 1, 1), jnp.float32)
    p["bn_gamma"] = 1.0 + 0.1 * jax.random.normal(ks[2], (out_channels,), jnp.float32)
    p["bn_beta"] = 0.1 * jax.random.normal(ks[3], (out_channels,), jnp.float32)
    p["bn_mean"] = 0.1 * jax.random.normal(ks[4], (out_channels,), jnp.float32)
    p["bn_var"] = 0.5 + jnp.abs(jax.random.normal(ks[5], (out_channels,), jnp.float32))
    return p


if __name__ == "__main__":
    key = jax.random.PRNGKey(0)
    kx, kp = jax.random.split(key)

    N, Cin, H, W = 2, 128, 16, 16     # in_channels divisible by 4; H, W by 16
    Cout = 128
    x = jax.random.normal(kx, (N, Cin, H, W), jnp.float32)
    params = init_params(kp, Cin, Cout)

    out = ppm_forward(x, params)
    out = jax.block_until_ready(out)

    assert out.shape == (N, Cout, H, W)
    assert bool(jnp.all(jnp.isfinite(out)))
    assert bool(jnp.all(out >= 0.0))          # final ReLU

    # bf16 MXU feeds with f32 accumulation -> loose tolerance vs f32 reference
    ref = ppm_reference(x, params)
    assert bool(jnp.allclose(out, ref, rtol=1e-1, atol=2e-1))

    print("KERNEL_OK")
</pallas_src>

<mosaic_0001>
module attributes {stable_mosaic.version = 11 : i64} {
  func.func @_ppm_kernel(%arg0: i32, %arg1: memref<1x16x16x128xf32, #tpu.memory_space<vmem>>, %arg2: memref<128x32xbf16, #tpu.memory_space<vmem>>, %arg3: memref<128x128xbf16, #tpu.memory_space<vmem>>, %arg4: memref<128x128xbf16, #tpu.memory_space<vmem>>, %arg5: memref<1x1x128xf32, #tpu.memory_space<vmem>>, %arg6: memref<1x1x16xbf16, #tpu.memory_space<vmem>>, %arg7: memref<1x16x1xbf16, #tpu.memory_space<vmem>>, %arg8: memref<16x1xf32, #tpu.memory_space<vmem>>, %arg9: memref<2x2x16xbf16, #tpu.memory_space<vmem>>, %arg10: memref<2x16x2xbf16, #tpu.memory_space<vmem>>, %arg11: memref<16x2xf32, #tpu.memory_space<vmem>>, %arg12: memref<4x4x16xbf16, #tpu.memory_space<vmem>>, %arg13: memref<4x16x4xbf16, #tpu.memory_space<vmem>>, %arg14: memref<16x4xf32, #tpu.memory_space<vmem>>, %arg15: memref<8x8x16xbf16, #tpu.memory_space<vmem>>, %arg16: memref<8x16x8xbf16, #tpu.memory_space<vmem>>, %arg17: memref<16x8xf32, #tpu.memory_space<vmem>>, %arg18: memref<1x16x16x128xf32, #tpu.memory_space<vmem>>) attributes {dimension_semantics = [#tpu.dimension_semantics<parallel>], iteration_bounds = array<i64: 2>, scalar_prefetch = 0 : i64, scratch_operands = 0 : i64, tpu.core_type = #tpu.core_type<tc>, window_params = [{transform_indices = @transform_0, window_bounds = array<i64: 1, 16, 16, 128>}, {pipeline_mode = #tpu.pipeline_mode<synchronous>, transform_indices = @transform_1, window_bounds = array<i64: 128, 32>}, {pipeline_mode = #tpu.pipeline_mode<synchronous>, transform_indices = @transform_2, window_bounds = array<i64: 128, 128>}, {pipeline_mode = #tpu.pipeline_mode<synchronous>, transform_indices = @transform_3, window_bounds = array<i64: 128, 128>}, {pipeline_mode = #tpu.pipeline_mode<synchronous>, transform_indices = @transform_4, window_bounds = array<i64: 1, 1, 128>}, {pipeline_mode = #tpu.pipeline_mode<synchronous>, transform_indices = @transform_5, window_bounds = array<i64: 1, 1, 16>}, {pipeline_mode = #tpu.pipeline_mode<synchronous>, transform_indices = @transform_6, window_bounds = array<i64: 1, 16, 1>}, {pipeline_mode = #tpu.pipeline_mode<synchronous>, transform_indices = @transform_7, window_bounds = array<i64: 16, 1>}, {pipeline_mode = #tpu.pipeline_mode<synchronous>, transform_indices = @transform_8, window_bounds = array<i64: 2, 2, 16>}, {pipeline_mode = #tpu.pipeline_mode<synchronous>, transform_indices = @transform_9, window_bounds = array<i64: 2, 16, 2>}, {pipeline_mode = #tpu.pipeline_mode<synchronous>, transform_indices = @transform_10, window_bounds = array<i64: 16, 2>}, {pipeline_mode = #tpu.pipeline_mode<synchronous>, transform_indices = @transform_11, window_bounds = array<i64: 4, 4, 16>}, {pipeline_mode = #tpu.pipeline_mode<synchronous>, transform_indices = @transform_12, window_bounds = array<i64: 4, 16, 4>}, {pipeline_mode = #tpu.pipeline_mode<synchronous>, transform_indices = @transform_13, window_bounds = array<i64: 16, 4>}, {pipeline_mode = #tpu.pipeline_mode<synchronous>, transform_indices = @transform_14, window_bounds = array<i64: 8, 8, 16>}, {pipeline_mode = #tpu.pipeline_mode<synchronous>, transform_indices = @transform_15, window_bounds = array<i64: 8, 16, 8>}, {pipeline_mode = #tpu.pipeline_mode<synchronous>, transform_indices = @transform_16, window_bounds = array<i64: 16, 8>}, {transform_indices = @transform_17, window_bounds = array<i64: 1, 16, 16, 128>}]} {
    %c0 = arith.constant 0 : index
    %c0_0 = arith.constant 0 : index
    %c0_1 = arith.constant 0 : index
    %c0_2 = arith.constant 0 : index
    %0 = vector.load %arg1[%c0, %c0_0, %c0_1, %c0_2] : memref<1x16x16x128xf32, #tpu.memory_space<vmem>>, vector<1x16x16x128xf32>
    %1 = vector.shape_cast %0 : vector<1x16x16x128xf32> to vector<16x16x128xf32>
    %2 = vector.shape_cast %1 : vector<16x16x128xf32> to vector<256x128xf32>
    %3 = arith.truncf %2 : vector<256x128xf32> to vector<256x128xbf16>
    %c0_3 = arith.constant 0 : index
    %c0_4 = arith.constant 0 : index
    %4 = vector.load %arg3[%c0_3, %c0_4] : memref<128x128xbf16, #tpu.memory_space<vmem>>, vector<128x128xbf16>
    %cst = arith.constant dense<0.000000e+00> : vector<256x128xf32>
    %5 = tpu.matmul %3, %4, %cst {dimension_numbers = #tpu.dot_dimension_numbers<[1], [0], [0], [1], [0, 0, 1, 1], [], []>} : vector<256x128xbf16>, vector<128x128xbf16>, vector<256x128xf32> -> vector<256x128xf32>
    %6 = vector.shape_cast %5 : vector<256x128xf32> to vector<16x16x128xf32>
    %c0_5 = arith.constant 0 : index
    %c0_6 = arith.constant 0 : index
    %7 = vector.load %arg4[%c0_5, %c0_6] : memref<128x128xbf16, #tpu.memory_space<vmem>>, vector<128x128xbf16>
    %8 = vector.shape_cast %1 : vector<16x16x128xf32> to vector<1x16x16x128xf32>
    %9 = vector.extract_strided_slice %8 {offsets = [0, 0, 0, 0], sizes = [1, 1, 16, 128], strides = [1, 1, 1, 1]} : vector<1x16x16x128xf32> to vector<1x1x16x128xf32>
    %10 = vector.shape_cast %9 : vector<1x1x16x128xf32> to vector<1x16x128xf32>
    %11 = vector.extract_strided_slice %8 {offsets = [0, 1, 0, 0], sizes = [1, 1, 16, 128], strides = [1, 1, 1, 1]} : vector<1x16x16x128xf32> to vector<1x1x16x128xf32>
    %12 = vector.shape_cast %11 : vector<1x1x16x128xf32> to vector<1x16x128xf32>
    %13 = arith.addf %10, %12 : vector<1x16x128xf32>
    %14 = vector.extract_strided_slice %8 {offsets = [0, 2, 0, 0], sizes = [1, 1, 16, 128], strides = [1, 1, 1, 1]} : vector<1x16x16x128xf32> to vector<1x1x16x128xf32>
    %15 = vector.shape_cast %14 : vector<1x1x16x128xf32> to vector<1x16x128xf32>
    %16 = arith.addf %13, %15 : vector<1x16x128xf32>
    %17 = vector.extract_strided_slice %8 {offsets = [0, 3, 0, 0], sizes = [1, 1, 16, 128], strides = [1, 1, 1, 1]} : vector<1x16x16x128xf32> to vector<1x1x16x128xf32>
    %18 = vector.shape_cast %17 : vector<1x1x16x128xf32> to vector<1x16x128xf32>
    %19 = arith.addf %16, %18 : vector<1x16x128xf32>
    %20 = vector.extract_strided_slice %8 {offsets = [0, 4, 0, 0], sizes = [1, 1, 16, 128], strides = [1, 1, 1, 1]} : vector<1x16x16x128xf32> to vector<1x1x16x128xf32>
    %21 = vector.shape_cast %20 : vector<1x1x16x128xf32> to vector<1x16x128xf32>
    %22 = arith.addf %19, %21 : vector<1x16x128xf32>
    %23 = vector.extract_strided_slice %8 {offsets = [0, 5, 0, 0], sizes = [1, 1, 16, 128], strides = [1, 1, 1, 1]} : vector<1x16x16x128xf32> to vector<1x1x16x128xf32>
    %24 = vector.shape_cast %23 : vector<1x1x16x128xf32> to vector<1x16x128xf32>
    %25 = arith.addf %22, %24 : vector<1x16x128xf32>
    %26 = vector.extract_strided_slice %8 {offsets = [0, 6, 0, 0], sizes = [1, 1, 16, 128], strides = [1, 1, 1, 1]} : vector<1x16x16x128xf32> to vector<1x1x16x128xf32>
    %27 = vector.shape_cast %26 : vector<1x1x16x128xf32> to vector<1x16x128xf32>
    %28 = arith.addf %25, %27 : vector<1x16x128xf32>
    %29 = vector.extract_strided_slice %8 {offsets = [0, 7, 0, 0], sizes = [1, 1, 16, 128], strides = [1, 1, 1, 1]} : vector<1x16x16x128xf32> to vector<1x1x16x128xf32>
    %30 = vector.shape_cast %29 : vector<1x1x16x128xf32> to vector<1x16x128xf32>
    %31 = arith.addf %28, %30 : vector<1x16x128xf32>
    %32 = vector.extract_strided_slice %8 {offsets = [0, 8, 0, 0], sizes = [1, 1, 16, 128], strides = [1, 1, 1, 1]} : vector<1x16x16x128xf32> to vector<1x1x16x128xf32>
    %33 = vector.shape_cast %32 : vector<1x1x16x128xf32> to vector<1x16x128xf32>
    %34 = arith.addf %31, %33 : vector<1x16x128xf32>
    %35 = vector.extract_strided_slice %8 {offsets = [0, 9, 0, 0], sizes = [1, 1, 16, 128], strides = [1, 1, 1, 1]} : vector<1x16x16x128xf32> to vector<1x1x16x128xf32>
    %36 = vector.shape_cast %35 : vector<1x1x16x128xf32> to vector<1x16x128xf32>
    %37 = arith.addf %34, %36 : vector<1x16x128xf32>
    %38 = vector.extract_strided_slice %8 {offsets = [0, 10, 0, 0], sizes = [1, 1, 16, 128], strides = [1, 1, 1, 1]} : vector<1x16x16x128xf32> to vector<1x1x16x128xf32>
    %39 = vector.shape_cast %38 : vector<1x1x16x128xf32> to vector<1x16x128xf32>
    %40 = arith.addf %37, %39 : vector<1x16x128xf32>
    %41 = vector.extract_strided_slice %8 {offsets = [0, 11, 0, 0], sizes = [1, 1, 16, 128], strides = [1, 1, 1, 1]} : vector<1x16x16x128xf32> to vector<1x1x16x128xf32>
    %42 = vector.shape_cast %41 : vector<1x1x16x128xf32> to vector<1x16x128xf32>
    %43 = arith.addf %40, %42 : vector<1x16x128xf32>
    %44 = vector.extract_strided_slice %8 {offsets = [0, 12, 0, 0], sizes = [1, 1, 16, 128], strides = [1, 1, 1, 1]} : vector<1x16x16x128xf32> to vector<1x1x16x128xf32>
    %45 = vector.shape_cast %44 : vector<1x1x16x128xf32> to vector<1x16x128xf32>
    %46 = arith.addf %43, %45 : vector<1x16x128xf32>
    %47 = vector.extract_strided_slice %8 {offsets = [0, 13, 0, 0], sizes = [1, 1, 16, 128], strides = [1, 1, 1, 1]} : vector<1x16x16x128xf32> to vector<1x1x16x128xf32>
    %48 = vector.shape_cast %47 : vector<1x1x16x128xf32> to vector<1x16x128xf32>
    %49 = arith.addf %46, %48 : vector<1x16x128xf32>
    %50 = vector.extract_strided_slice %8 {offsets = [0, 14, 0, 0], sizes = [1, 1, 16, 128], strides = [1, 1, 1, 1]} : vector<1x16x16x128xf32> to vector<1x1x16x128xf32>
    %51 = vector.shape_cast %50 : vector<1x1x16x128xf32> to vector<1x16x128xf32>
    %52 = arith.addf %49, %51 : vector<1x16x128xf32>
    %53 = vector.extract_strided_slice %8 {offsets = [0, 15, 0, 0], sizes = [1, 1, 16, 128], strides = [1, 1, 1, 1]} : vector<1x16x16x128xf32> to vector<1x1x16x128xf32>
    %54 = vector.shape_cast %53 : vector<1x1x16x128xf32> to vector<1x16x128xf32>
    %55 = arith.addf %52, %54 : vector<1x16x128xf32>
    %c0_7 = arith.constant 0 : index
    %c0_8 = arith.constant 0 : index
    %c0_9 = arith.constant 0 : index
    %56 = vector.load %arg6[%c0_7, %c0_8, %c0_9] : memref<1x1x16xbf16, #tpu.memory_space<vmem>>, vector<1x1x16xbf16>
    %57 = arith.truncf %55 : vector<1x16x128xf32> to vector<1x16x128xbf16>
    "tpu.trace_start"() <{level = 10 : i32, message = "abj,ajc->abc"}> : () -> ()
    %cst_10 = arith.constant dense<0.000000e+00> : vector<1x1x128xf32>
    %58 = tpu.matmul %56, %57, %cst_10 {dimension_numbers = #tpu.dot_dimension_numbers<[2], [1], [1], [2], [0, 0, 0, 1, 1, 2], [0], [0]>} : vector<1x1x16xbf16>, vector<1x16x128xbf16>, vector<1x1x128xf32> -> vector<1x1x128xf32>
    "tpu.trace_stop"() : () -> ()
    %59 = vector.shape_cast %58 : vector<1x1x128xf32> to vector<1x128xf32>
    %60 = arith.truncf %59 : vector<1x128xf32> to vector<1x128xbf16>
    %c0_11 = arith.constant 0 : index
    %c0_12 = arith.constant 0 : index
    %61 = vector.load %arg2[%c0_11, %c0_12] : memref<128x32xbf16, #tpu.memory_space<vmem>>, vector<128x32xbf16>
    %cst_13 = arith.constant dense<0.000000e+00> : vector<1x32xf32>
    %62 = tpu.matmul %60, %61, %cst_13 {dimension_numbers = #tpu.dot_dimension_numbers<[1], [0], [0], [1], [0, 0, 1, 1], [], []>} : vector<1x128xbf16>, vector<128x32xbf16>, vector<1x32xf32> -> vector<1x32xf32>
    %cst_14 = arith.constant 0.000000e+00 : f32
    %63 = vector.broadcast %cst_14 : f32 to vector<1x32xf32>
    %64 = arith.maximumf %62, %63 : vector<1x32xf32>
    %65 = arith.truncf %64 : vector<1x32xf32> to vector<1x32xbf16>
    %66 = vector.extract_strided_slice %7 {offsets = [0, 0], sizes = [32, 128], strides = [1, 1]} : vector<128x128xbf16> to vector<32x128xbf16>
    %cst_15 = arith.constant dense<0.000000e+00> : vector<1x128xf32>
    %67 = tpu.matmul %65, %66, %cst_15 {dimension_numbers = #tpu.dot_dimension_numbers<[1], [0], [0], [1], [0, 0, 1, 1], [], []>} : vector<1x32xbf16>, vector<32x128xbf16>, vector<1x128xf32> -> vector<1x128xf32>
    %68 = vector.shape_cast %67 : vector<1x128xf32> to vector<1x1x128xf32>
    %69 = arith.truncf %68 : vector<1x1x128xf32> to vector<1x1x128xbf16>
    %c0_16 = arith.constant 0 : index
    %c0_17 = arith.constant 0 : index
    %c0_18 = arith.constant 0 : index
    %70 = vector.load %arg7[%c0_16, %c0_17, %c0_18] : memref<1x16x1xbf16, #tpu.memory_space<vmem>>, vector<1x16x1xbf16>
    "tpu.trace_start"() <{level = 10 : i32, message = "ajb,abc->ajc"}> : () -> ()
    %cst_19 = arith.constant dense<0.000000e+00> : vector<1x16x128xf32>
    %71 = tpu.matmul %70, %69, %cst_19 {dimension_numbers = #tpu.dot_dimension_numbers<[2], [1], [1], [2], [0, 0, 0, 1, 1, 2], [0], [0]>} : vector<1x16x1xbf16>, vector<1x1x128xbf16>, vector<1x16x128xf32> -> vector<1x16x128xf32>
    "tpu.trace_stop"() : () -> ()
    %c0_20 = arith.constant 0 : index
    %c0_21 = arith.constant 0 : index
    %72 = vector.load %arg8[%c0_20, %c0_21] : memref<16x1xf32, #tpu.memory_space<vmem>>, vector<16x1xf32>
    %73 = vector.shape_cast %72 : vector<16x1xf32> to vector<16x1x1xf32>
    %74 = vector.shape_cast %71 : vector<1x16x128xf32> to vector<16x128xf32>
    %75 = vector.shape_cast %74 : vector<16x128xf32> to vector<1x16x128xf32>
    %76 = vector.broadcast %73 : vector<16x1x1xf32> to vector<16x16x128xf32>
    %77 = vector.broadcast %75 : vector<1x16x128xf32> to vector<16x16x128xf32>
    %78 = arith.mulf %76, %77 : vector<16x16x128xf32>
    %79 = arith.addf %6, %78 : vector<16x16x128xf32>
    %80 = vector.shape_cast %1 : vector<16x16x128xf32> to vector<2x8x16x128xf32>
    %81 = vector.extract_strided_slice %80 {offsets = [0, 0, 0, 0], sizes = [2, 1, 16, 128], strides = [1, 1, 1, 1]} : vector<2x8x16x128xf32> to vector<2x1x16x128xf32>
    %82 = vector.shape_cast %81 : vector<2x1x16x128xf32> to vector<2x16x128xf32>
    %83 = vector.extract_strided_slice %80 {offsets = [0, 1, 0, 0], sizes = [2, 1, 16, 128], strides = [1, 1, 1, 1]} : vector<2x8x16x128xf32> to vector<2x1x16x128xf32>
    %84 = vector.shape_cast %83 : vector<2x1x16x128xf32> to vector<2x16x128xf32>
    %85 = arith.addf %82, %84 : vector<2x16x128xf32>
    %86 = vector.extract_strided_slice %80 {offsets = [0, 2, 0, 0], sizes = [2, 1, 16, 128], strides = [1, 1, 1, 1]} : vector<2x8x16x128xf32> to vector<2x1x16x128xf32>
    %87 = vector.shape_cast %86 : vector<2x1x16x128xf32> to vector<2x16x128xf32>
    %88 = arith.addf %85, %87 : vector<2x16x128xf32>
    %89 = vector.extract_strided_slice %80 {offsets = [0, 3, 0, 0], sizes = [2, 1, 16, 128], strides = [1, 1, 1, 1]} : vector<2x8x16x128xf32> to vector<2x1x16x128xf32>
    %90 = vector.shape_cast %89 : vector<2x1x16x128xf32> to vector<2x16x128xf32>
    %91 = arith.addf %88, %90 : vector<2x16x128xf32>
    %92 = vector.extract_strided_slice %80 {offsets = [0, 4, 0, 0], sizes = [2, 1, 16, 128], strides = [1, 1, 1, 1]} : vector<2x8x16x128xf32> to vector<2x1x16x128xf32>
    %93 = vector.shape_cast %92 : vector<2x1x16x128xf32> to vector<2x16x128xf32>
    %94 = arith.addf %91, %93 : vector<2x16x128xf32>
    %95 = vector.extract_strided_slice %80 {offsets = [0, 5, 0, 0], sizes = [2, 1, 16, 128], strides = [1, 1, 1, 1]} : vector<2x8x16x128xf32> to vector<2x1x16x128xf32>
    %96 = vector.shape_cast %95 : vector<2x1x16x128xf32> to vector<2x16x128xf32>
    %97 = arith.addf %94, %96 : vector<2x16x128xf32>
    %98 = vector.extract_strided_slice %80 {offsets = [0, 6, 0, 0], sizes = [2, 1, 16, 128], strides = [1, 1, 1, 1]} : vector<2x8x16x128xf32> to vector<2x1x16x128xf32>
    %99 = vector.shape_cast %98 : vector<2x1x16x128xf32> to vector<2x16x128xf32>
    %100 = arith.addf %97, %99 : vector<2x16x128xf32>
    %101 = vector.extract_strided_slice %80 {offsets = [0, 7, 0, 0], sizes = [2, 1, 16, 128], strides = [1, 1, 1, 1]} : vector<2x8x16x128xf32> to vector<2x1x16x128xf32>
    %102 = vector.shape_cast %101 : vector<2x1x16x128xf32> to vector<2x16x128xf32>
    %103 = arith.addf %100, %102 : vector<2x16x128xf32>
    %c0_22 = arith.constant 0 : index
    %c0_23 = arith.constant 0 : index
    %c0_24 = arith.constant 0 : index
    %104 = vector.load %arg9[%c0_22, %c0_23, %c0_24] : memref<2x2x16xbf16, #tpu.memory_space<vmem>>, vector<2x2x16xbf16>
    %105 = arith.truncf %103 : vector<2x16x128xf32> to vector<2x16x128xbf16>
    "tpu.trace_start"() <{level = 10 : i32, message = "abj,ajc->abc"}> : () -> ()
    %cst_25 = arith.constant dense<0.000000e+00> : vector<2x2x128xf32>
    %106 = tpu.matmul %104, %105, %cst_25 {dimension_numbers = #tpu.dot_dimension_numbers<[2], [1], [1], [2], [0, 0, 0, 1, 1, 2], [0], [0]>} : vector<2x2x16xbf16>, vector<2x16x128xbf16>, vector<2x2x128xf32> -> vector<2x2x128xf32>
    "tpu.trace_stop"() : () -> ()
    %107 = vector.shape_cast %106 : vector<2x2x128xf32> to vector<4x128xf32>
    %108 = arith.truncf %107 : vector<4x128xf32> to vector<4x128xbf16>
    %c0_26 = arith.constant 0 : index
    %c0_27 = arith.constant 0 : index
    %109 = vector.load %arg2[%c0_26, %c0_27] : memref<128x32xbf16, #tpu.memory_space<vmem>>, vector<128x32xbf16>
    %cst_28 = arith.constant dense<0.000000e+00> : vector<4x32xf32>
    %110 = tpu.matmul %108, %109, %cst_28 {dimension_numbers = #tpu.dot_dimension_numbers<[1], [0], [0], [1], [0, 0, 1, 1], [], []>} : vector<4x128xbf16>, vector<128x32xbf16>, vector<4x32xf32> -> vector<4x32xf32>
    %cst_29 = arith.constant 0.000000e+00 : f32
    %111 = vector.broadcast %cst_29 : f32 to vector<4x32xf32>
    %112 = arith.maximumf %110, %111 : vector<4x32xf32>
    %113 = arith.truncf %112 : vector<4x32xf32> to vector<4x32xbf16>
    %114 = vector.extract_strided_slice %7 {offsets = [32, 0], sizes = [32, 128], strides = [1, 1]} : vector<128x128xbf16> to vector<32x128xbf16>
    %cst_30 = arith.constant dense<0.000000e+00> : vector<4x128xf32>
    %115 = tpu.matmul %113, %114, %cst_30 {dimension_numbers = #tpu.dot_dimension_numbers<[1], [0], [0], [1], [0, 0, 1, 1], [], []>} : vector<4x32xbf16>, vector<32x128xbf16>, vector<4x128xf32> -> vector<4x128xf32>
    %116 = vector.shape_cast %115 : vector<4x128xf32> to vector<2x2x128xf32>
    %117 = arith.truncf %116 : vector<2x2x128xf32> to vector<2x2x128xbf16>
    %c0_31 = arith.constant 0 : index
    %c0_32 = arith.constant 0 : index
    %c0_33 = arith.constant 0 : index
    %118 = vector.load %arg10[%c0_31, %c0_32, %c0_33] : memref<2x16x2xbf16, #tpu.memory_space<vmem>>, vector<2x16x2xbf16>
    "tpu.trace_start"() <{level = 10 : i32, message = "ajb,abc->ajc"}> : () -> ()
    %cst_34 = arith.constant dense<0.000000e+00> : vector<2x16x128xf32>
    %119 = tpu.matmul %118, %117, %cst_34 {dimension_numbers = #tpu.dot_dimension_numbers<[2], [1], [1], [2], [0, 0, 0, 1, 1, 2], [0], [0]>} : vector<2x16x2xbf16>, vector<2x2x128xbf16>, vector<2x16x128xf32> -> vector<2x16x128xf32>
    "tpu.trace_stop"() : () -> ()
    %c0_35 = arith.constant 0 : index
    %c0_36 = arith.constant 0 : index
    %120 = vector.load %arg11[%c0_35, %c0_36] : memref<16x2xf32, #tpu.memory_space<vmem>>, vector<16x2xf32>
    %121 = vector.extract_strided_slice %120 {offsets = [0, 0], sizes = [16, 1], strides = [1, 1]} : vector<16x2xf32> to vector<16x1xf32>
    %122 = vector.shape_cast %121 : vector<16x1xf32> to vector<16x1x1xf32>
    %123 = vector.extract_strided_slice %119 {offsets = [0, 0, 0], sizes = [1, 16, 128], strides = [1, 1, 1]} : vector<2x16x128xf32> to vector<1x16x128xf32>
    %124 = vector.shape_cast %123 : vector<1x16x128xf32> to vector<16x128xf32>
    %125 = vector.shape_cast %124 : vector<16x128xf32> to vector<1x16x128xf32>
    %126 = vector.broadcast %122 : vector<16x1x1xf32> to vector<16x16x128xf32>
    %127 = vector.broadcast %125 : vector<1x16x128xf32> to vector<16x16x128xf32>
    %128 = arith.mulf %126, %127 : vector<16x16x128xf32>
    %129 = arith.addf %79, %128 : vector<16x16x128xf32>
    %130 = vector.extract_strided_slice %120 {offsets = [0, 1], sizes = [16, 1], strides = [1, 1]} : vector<16x2xf32> to vector<16x1xf32>
    %131 = vector.shape_cast %130 : vector<16x1xf32> to vector<16x1x1xf32>
    %132 = vector.extract_strided_slice %119 {offsets = [1, 0, 0], sizes = [1, 16, 128], strides = [1, 1, 1]} : vector<2x16x128xf32> to vector<1x16x128xf32>
    %133 = vector.shape_cast %132 : vector<1x16x128xf32> to vector<16x128xf32>
    %134 = vector.shape_cast %133 : vector<16x128xf32> to vector<1x16x128xf32>
    %135 = vector.broadcast %131 : vector<16x1x1xf32> to vector<16x16x128xf32>
    %136 = vector.broadcast %134 : vector<1x16x128xf32> to vector<16x16x128xf32>
    %137 = arith.mulf %135, %136 : vector<16x16x128xf32>
    %138 = arith.addf %129, %137 : vector<16x16x128xf32>
    %139 = vector.shape_cast %1 : vector<16x16x128xf32> to vector<4x4x16x128xf32>
    %140 = vector.extract_strided_slice %139 {offsets = [0, 0, 0, 0], sizes = [4, 1, 16, 128], strides = [1, 1, 1, 1]} : vector<4x4x16x128xf32> to vector<4x1x16x128xf32>
    %141 = vector.shape_cast %140 : vector<4x1x16x128xf32> to vector<4x16x128xf32>
    %142 = vector.extract_strided_slice %139 {offsets = [0, 1, 0, 0], sizes = [4, 1, 16, 128], strides = [1, 1, 1, 1]} : vector<4x4x16x128xf32> to vector<4x1x16x128xf32>
    %143 = vector.shape_cast %142 : vector<4x1x16x128xf32> to vector<4x16x128xf32>
    %144 = arith.addf %141, %143 : vector<4x16x128xf32>
    %145 = vector.extract_strided_slice %139 {offsets = [0, 2, 0, 0], sizes = [4, 1, 16, 128], strides = [1, 1, 1, 1]} : vector<4x4x16x128xf32> to vector<4x1x16x128xf32>
    %146 = vector.shape_cast %145 : vector<4x1x16x128xf32> to vector<4x16x128xf32>
    %147 = arith.addf %144, %146 : vector<4x16x128xf32>
    %148 = vector.extract_strided_slice %139 {offsets = [0, 3, 0, 0], sizes = [4, 1, 16, 128], strides = [1, 1, 1, 1]} : vector<4x4x16x128xf32> to vector<4x1x16x128xf32>
    %149 = vector.shape_cast %148 : vector<4x1x16x128xf32> to vector<4x16x128xf32>
    %150 = arith.addf %147, %149 : vector<4x16x128xf32>
    %c0_37 = arith.constant 0 : index
    %c0_38 = arith.constant 0 : index
    %c0_39 = arith.constant 0 : index
    %151 = vector.load %arg12[%c0_37, %c0_38, %c0_39] : memref<4x4x16xbf16, #tpu.memory_space<vmem>>, vector<4x4x16xbf16>
    %152 = arith.truncf %150 : vector<4x16x128xf32> to vector<4x16x128xbf16>
    "tpu.trace_start"() <{level = 10 : i32, message = "abj,ajc->abc"}> : () -> ()
    %cst_40 = arith.constant dense<0.000000e+00> : vector<4x4x128xf32>
    %153 = tpu.matmul %151, %152, %cst_40 {dimension_numbers = #tpu.dot_dimension_numbers<[2], [1], [1], [2], [0, 0, 0, 1, 1, 2], [0], [0]>} : vector<4x4x16xbf16>, vector<4x16x128xbf16>, vector<4x4x128xf32> -> vector<4x4x128xf32>
    "tpu.trace_stop"() : () -> ()
    %154 = vector.shape_cast %153 : vector<4x4x128xf32> to vector<16x128xf32>
    %155 = arith.truncf %154 : vector<16x128xf32> to vector<16x128xbf16>
    %c0_41 = arith.constant 0 : index
    %c0_42 = arith.constant 0 : index
    %156 = vector.load %arg2[%c0_41, %c0_42] : memref<128x32xbf16, #tpu.memory_space<vmem>>, vector<128x32xbf16>
    %cst_43 = arith.constant dense<0.000000e+00> : vector<16x32xf32>
    %157 = tpu.matmul %155, %156, %cst_43 {dimension_numbers = #tpu.dot_dimension_numbers<[1], [0], [0], [1], [0, 0, 1, 1], [], []>} : vector<16x128xbf16>, vector<128x32xbf16>, vector<16x32xf32> -> vector<16x32xf32>
    %cst_44 = arith.constant 0.000000e+00 : f32
    %158 = vector.broadcast %cst_44 : f32 to vector<16x32xf32>
    %159 = arith.maximumf %157, %158 : vector<16x32xf32>
    %160 = arith.truncf %159 : vector<16x32xf32> to vector<16x32xbf16>
    %161 = vector.extract_strided_slice %7 {offsets = [64, 0], sizes = [32, 128], strides = [1, 1]} : vector<128x128xbf16> to vector<32x128xbf16>
    %cst_45 = arith.constant dense<0.000000e+00> : vector<16x128xf32>
    %162 = tpu.matmul %160, %161, %cst_45 {dimension_numbers = #tpu.dot_dimension_numbers<[1], [0], [0], [1], [0, 0, 1, 1], [], []>} : vector<16x32xbf16>, vector<32x128xbf16>, vector<16x128xf32> -> vector<16x128xf32>
    %163 = vector.shape_cast %162 : vector<16x128xf32> to vector<4x4x128xf32>
    %164 = arith.truncf %163 : vector<4x4x128xf32> to vector<4x4x128xbf16>
    %c0_46 = arith.constant 0 : index
    %c0_47 = arith.constant 0 : index
    %c0_48 = arith.constant 0 : index
    %165 = vector.load %arg13[%c0_46, %c0_47, %c0_48] : memref<4x16x4xbf16, #tpu.memory_space<vmem>>, vector<4x16x4xbf16>
    "tpu.trace_start"() <{level = 10 : i32, message = "ajb,abc->ajc"}> : () -> ()
    %cst_49 = arith.constant dense<0.000000e+00> : vector<4x16x128xf32>
    %166 = tpu.matmul %165, %164, %cst_49 {dimension_numbers = #tpu.dot_dimension_numbers<[2], [1], [1], [2], [0, 0, 0, 1, 1, 2], [0], [0]>} : vector<4x16x4xbf16>, vector<4x4x128xbf16>, vector<4x16x128xf32> -> vector<4x16x128xf32>
    "tpu.trace_stop"() : () -> ()
    %c0_50 = arith.constant 0 : index
    %c0_51 = arith.constant 0 : index
    %167 = vector.load %arg14[%c0_50, %c0_51] : memref<16x4xf32, #tpu.memory_space<vmem>>, vector<16x4xf32>
    %168 = vector.extract_strided_slice %167 {offsets = [0, 0], sizes = [16, 1], strides = [1, 1]} : vector<16x4xf32> to vector<16x1xf32>
    %169 = vector.shape_cast %168 : vector<16x1xf32> to vector<16x1x1xf32>
    %170 = vector.extract_strided_slice %166 {offsets = [0, 0, 0], sizes = [1, 16, 128], strides = [1, 1, 1]} : vector<4x16x128xf32> to vector<1x16x128xf32>
    %171 = vector.shape_cast %170 : vector<1x16x128xf32> to vector<16x128xf32>
    %172 = vector.shape_cast %171 : vector<16x128xf32> to vector<1x16x128xf32>
    %173 = vector.broadcast %169 : vector<16x1x1xf32> to vector<16x16x128xf32>
    %174 = vector.broadcast %172 : vector<1x16x128xf32> to vector<16x16x128xf32>
    %175 = arith.mulf %173, %174 : vector<16x16x128xf32>
    %176 = arith.addf %138, %175 : vector<16x16x128xf32>
    %177 = vector.extract_strided_slice %167 {offsets = [0, 1], sizes = [16, 1], strides = [1, 1]} : vector<16x4xf32> to vector<16x1xf32>
    %178 = vector.shape_cast %177 : vector<16x1xf32> to vector<16x1x1xf32>
    %179 = vector.extract_strided_slice %166 {offsets = [1, 0, 0], sizes = [1, 16, 128], strides = [1, 1, 1]} : vector<4x16x128xf32> to vector<1x16x128xf32>
    %180 = vector.shape_cast %179 : vector<1x16x128xf32> to vector<16x128xf32>
    %181 = vector.shape_cast %180 : vector<16x128xf32> to vector<1x16x128xf32>
    %182 = vector.broadcast %178 : vector<16x1x1xf32> to vector<16x16x128xf32>
    %183 = vector.broadcast %181 : vector<1x16x128xf32> to vector<16x16x128xf32>
    %184 = arith.mulf %182, %183 : vector<16x16x128xf32>
    %185 = arith.addf %176, %184 : vector<16x16x128xf32>
    %186 = vector.extract_strided_slice %167 {offsets = [0, 2], sizes = [16, 1], strides = [1, 1]} : vector<16x4xf32> to vector<16x1xf32>
    %187 = vector.shape_cast %186 : vector<16x1xf32> to vector<16x1x1xf32>
    %188 = vector.extract_strided_slice %166 {offsets = [2, 0, 0], sizes = [1, 16, 128], strides = [1, 1, 1]} : vector<4x16x128xf32> to vector<1x16x128xf32>
    %189 = vector.shape_cast %188 : vector<1x16x128xf32> to vector<16x128xf32>
    %190 = vector.shape_cast %189 : vector<16x128xf32> to vector<1x16x128xf32>
    %191 = vector.broadcast %187 : vector<16x1x1xf32> to vector<16x16x128xf32>
    %192 = vector.broadcast %190 : vector<1x16x128xf32> to vector<16x16x128xf32>
    %193 = arith.mulf %191, %192 : vector<16x16x128xf32>
    %194 = arith.addf %185, %193 : vector<16x16x128xf32>
    %195 = vector.extract_strided_slice %167 {offsets = [0, 3], sizes = [16, 1], strides = [1, 1]} : vector<16x4xf32> to vector<16x1xf32>
    %196 = vector.shape_cast %195 : vector<16x1xf32> to vector<16x1x1xf32>
    %197 = vector.extract_strided_slice %166 {offsets = [3, 0, 0], sizes = [1, 16, 128], strides = [1, 1, 1]} : vector<4x16x128xf32> to vector<1x16x128xf32>
    %198 = vector.shape_cast %197 : vector<1x16x128xf32> to vector<16x128xf32>
    %199 = vector.shape_cast %198 : vector<16x128xf32> to vector<1x16x128xf32>
    %200 = vector.broadcast %196 : vector<16x1x1xf32> to vector<16x16x128xf32>
    %201 = vector.broadcast %199 : vector<1x16x128xf32> to vector<16x16x128xf32>
    %202 = arith.mulf %200, %201 : vector<16x16x128xf32>
    %203 = arith.addf %194, %202 : vector<16x16x128xf32>
    %204 = vector.shape_cast %1 : vector<16x16x128xf32> to vector<8x2x16x128xf32>
    %205 = vector.extract_strided_slice %204 {offsets = [0, 0, 0, 0], sizes = [8, 1, 16, 128], strides = [1, 1, 1, 1]} : vector<8x2x16x128xf32> to vector<8x1x16x128xf32>
    %206 = vector.shape_cast %205 : vector<8x1x16x128xf32> to vector<8x16x128xf32>
    %207 = vector.extract_strided_slice %204 {offsets = [0, 1, 0, 0], sizes = [8, 1, 16, 128], strides = [1, 1, 1, 1]} : vector<8x2x16x128xf32> to vector<8x1x16x128xf32>
    %208 = vector.shape_cast %207 : vector<8x1x16x128xf32> to vector<8x16x128xf32>
    %209 = arith.addf %206, %208 : vector<8x16x128xf32>
    %c0_52 = arith.constant 0 : index
    %c0_53 = arith.constant 0 : index
    %c0_54 = arith.constant 0 : index
    %210 = vector.load %arg15[%c0_52, %c0_53, %c0_54] : memref<8x8x16xbf16, #tpu.memory_space<vmem>>, vector<8x8x16xbf16>
    %211 = arith.truncf %209 : vector<8x16x128xf32> to vector<8x16x128xbf16>
    "tpu.trace_start"() <{level = 10 : i32, message = "abj,ajc->abc"}> : () -> ()
    %cst_55 = arith.constant dense<0.000000e+00> : vector<8x8x128xf32>
    %212 = tpu.matmul %210, %211, %cst_55 {dimension_numbers = #tpu.dot_dimension_numbers<[2], [1], [1], [2], [0, 0, 0, 1, 1, 2], [0], [0]>} : vector<8x8x16xbf16>, vector<8x16x128xbf16>, vector<8x8x128xf32> -> vector<8x8x128xf32>
    "tpu.trace_stop"() : () -> ()
    %213 = vector.shape_cast %212 : vector<8x8x128xf32> to vector<64x128xf32>
    %214 = arith.truncf %213 : vector<64x128xf32> to vector<64x128xbf16>
    %c0_56 = arith.constant 0 : index
    %c0_57 = arith.constant 0 : index
    %215 = vector.load %arg2[%c0_56, %c0_57] : memref<128x32xbf16, #tpu.memory_space<vmem>>, vector<128x32xbf16>
    %cst_58 = arith.constant dense<0.000000e+00> : vector<64x32xf32>
    %216 = tpu.matmul %214, %215, %cst_58 {dimension_numbers = #tpu.dot_dimension_numbers<[1], [0], [0], [1], [0, 0, 1, 1], [], []>} : vector<64x128xbf16>, vector<128x32xbf16>, vector<64x32xf32> -> vector<64x32xf32>
    %cst_59 = arith.constant 0.000000e+00 : f32
    %217 = vector.broadcast %cst_59 : f32 to vector<64x32xf32>
    %218 = arith.maximumf %216, %217 : vector<64x32xf32>
    %219 = arith.truncf %218 : vector<64x32xf32> to vector<64x32xbf16>
    %220 = vector.extract_strided_slice %7 {offsets = [96, 0], sizes = [32, 128], strides = [1, 1]} : vector<128x128xbf16> to vector<32x128xbf16>
    %cst_60 = arith.constant dense<0.000000e+00> : vector<64x128xf32>
    %221 = tpu.matmul %219, %220, %cst_60 {dimension_numbers = #tpu.dot_dimension_numbers<[1], [0], [0], [1], [0, 0, 1, 1], [], []>} : vector<64x32xbf16>, vector<32x128xbf16>, vector<64x128xf32> -> vector<64x128xf32>
    %222 = vector.shape_cast %221 : vector<64x128xf32> to vector<8x8x128xf32>
    %223 = arith.truncf %222 : vector<8x8x128xf32> to vector<8x8x128xbf16>
    %c0_61 = arith.constant 0 : index
    %c0_62 = arith.constant 0 : index
    %c0_63 = arith.constant 0 : index
    %224 = vector.load %arg16[%c0_61, %c0_62, %c0_63] : memref<8x16x8xbf16, #tpu.memory_space<vmem>>, vector<8x16x8xbf16>
    "tpu.trace_start"() <{level = 10 : i32, message = "ajb,abc->ajc"}> : () -> ()
    %cst_64 = arith.constant dense<0.000000e+00> : vector<8x16x128xf32>
    %225 = tpu.matmul %224, %223, %cst_64 {dimension_numbers = #tpu.dot_dimension_numbers<[2], [1], [1], [2], [0, 0, 0, 1, 1, 2], [0], [0]>} : vector<8x16x8xbf16>, vector<8x8x128xbf16>, vector<8x16x128xf32> -> vector<8x16x128xf32>
    "tpu.trace_stop"() : () -> ()
    %c0_65 = arith.constant 0 : index
    %c0_66 = arith.constant 0 : index
    %226 = vector.load %arg17[%c0_65, %c0_66] : memref<16x8xf32, #tpu.memory_space<vmem>>, vector<16x8xf32>
    %227 = vector.extract_strided_slice %226 {offsets = [0, 0], sizes = [16, 1], strides = [1, 1]} : vector<16x8xf32> to vector<16x1xf32>
    %228 = vector.shape_cast %227 : vector<16x1xf32> to vector<16x1x1xf32>
    %229 = vector.extract_strided_slice %225 {offsets = [0, 0, 0], sizes = [1, 16, 128], strides = [1, 1, 1]} : vector<8x16x128xf32> to vector<1x16x128xf32>
    %230 = vector.shape_cast %229 : vector<1x16x128xf32> to vector<16x128xf32>
    %231 = vector.shape_cast %230 : vector<16x128xf32> to vector<1x16x128xf32>
    %232 = vector.broadcast %228 : vector<16x1x1xf32> to vector<16x16x128xf32>
    %233 = vector.broadcast %231 : vector<1x16x128xf32> to vector<16x16x128xf32>
    %234 = arith.mulf %232, %233 : vector<16x16x128xf32>
    %235 = arith.addf %203, %234 : vector<16x16x128xf32>
    %236 = vector.extract_strided_slice %226 {offsets = [0, 1], sizes = [16, 1], strides = [1, 1]} : vector<16x8xf32> to vector<16x1xf32>
    %237 = vector.shape_cast %236 : vector<16x1xf32> to vector<16x1x1xf32>
    %238 = vector.extract_strided_slice %225 {offsets = [1, 0, 0], sizes = [1, 16, 128], strides = [1, 1, 1]} : vector<8x16x128xf32> to vector<1x16x128xf32>
    %239 = vector.shape_cast %238 : vector<1x16x128xf32> to vector<16x128xf32>
    %240 = vector.shape_cast %239 : vector<16x128xf32> to vector<1x16x128xf32>
    %241 = vector.broadcast %237 : vector<16x1x1xf32> to vector<16x16x128xf32>
    %242 = vector.broadcast %240 : vector<1x16x128xf32> to vector<16x16x128xf32>
    %243 = arith.mulf %241, %242 : vector<16x16x128xf32>
    %244 = arith.addf %235, %243 : vector<16x16x128xf32>
    %245 = vector.extract_strided_slice %226 {offsets = [0, 2], sizes = [16, 1], strides = [1, 1]} : vector<16x8xf32> to vector<16x1xf32>
    %246 = vector.shape_cast %245 : vector<16x1xf32> to vector<16x1x1xf32>
    %247 = vector.extract_strided_slice %225 {offsets = [2, 0, 0], sizes = [1, 16, 128], strides = [1, 1, 1]} : vector<8x16x128xf32> to vector<1x16x128xf32>
    %248 = vector.shape_cast %247 : vector<1x16x128xf32> to vector<16x128xf32>
    %249 = vector.shape_cast %248 : vector<16x128xf32> to vector<1x16x128xf32>
    %250 = vector.broadcast %246 : vector<16x1x1xf32> to vector<16x16x128xf32>
    %251 = vector.broadcast %249 : vector<1x16x128xf32> to vector<16x16x128xf32>
    %252 = arith.mulf %250, %251 : vector<16x16x128xf32>
    %253 = arith.addf %244, %252 : vector<16x16x128xf32>
    %254 = vector.extract_strided_slice %226 {offsets = [0, 3], sizes = [16, 1], strides = [1, 1]} : vector<16x8xf32> to vector<16x1xf32>
    %255 = vector.shape_cast %254 : vector<16x1xf32> to vector<16x1x1xf32>
    %256 = vector.extract_strided_slice %225 {offsets = [3, 0, 0], sizes = [1, 16, 128], strides = [1, 1, 1]} : vector<8x16x128xf32> to vector<1x16x128xf32>
    %257 = vector.shape_cast %256 : vector<1x16x128xf32> to vector<16x128xf32>
    %258 = vector.shape_cast %257 : vector<16x128xf32> to vector<1x16x128xf32>
    %259 = vector.broadcast %255 : vector<16x1x1xf32> to vector<16x16x128xf32>
    %260 = vector.broadcast %258 : vector<1x16x128xf32> to vector<16x16x128xf32>
    %261 = arith.mulf %259, %260 : vector<16x16x128xf32>
    %262 = arith.addf %253, %261 : vector<16x16x128xf32>
    %263 = vector.extract_strided_slice %226 {offsets = [0, 4], sizes = [16, 1], strides = [1, 1]} : vector<16x8xf32> to vector<16x1xf32>
    %264 = vector.shape_cast %263 : vector<16x1xf32> to vector<16x1x1xf32>
    %265 = vector.extract_strided_slice %225 {offsets = [4, 0, 0], sizes = [1, 16, 128], strides = [1, 1, 1]} : vector<8x16x128xf32> to vector<1x16x128xf32>
    %266 = vector.shape_cast %265 : vector<1x16x128xf32> to vector<16x128xf32>
    %267 = vector.shape_cast %266 : vector<16x128xf32> to vector<1x16x128xf32>
    %268 = vector.broadcast %264 : vector<16x1x1xf32> to vector<16x16x128xf32>
    %269 = vector.broadcast %267 : vector<1x16x128xf32> to vector<16x16x128xf32>
    %270 = arith.mulf %268, %269 : vector<16x16x128xf32>
    %271 = arith.addf %262, %270 : vector<16x16x128xf32>
    %272 = vector.extract_strided_slice %226 {offsets = [0, 5], sizes = [16, 1], strides = [1, 1]} : vector<16x8xf32> to vector<16x1xf32>
    %273 = vector.shape_cast %272 : vector<16x1xf32> to vector<16x1x1xf32>
    %274 = vector.extract_strided_slice %225 {offsets = [5, 0, 0], sizes = [1, 16, 128], strides = [1, 1, 1]} : vector<8x16x128xf32> to vector<1x16x128xf32>
    %275 = vector.shape_cast %274 : vector<1x16x128xf32> to vector<16x128xf32>
    %276 = vector.shape_cast %275 : vector<16x128xf32> to vector<1x16x128xf32>
    %277 = vector.broadcast %273 : vector<16x1x1xf32> to vector<16x16x128xf32>
    %278 = vector.broadcast %276 : vector<1x16x128xf32> to vector<16x16x128xf32>
    %279 = arith.mulf %277, %278 : vector<16x16x128xf32>
    %280 = arith.addf %271, %279 : vector<16x16x128xf32>
    %281 = vector.extract_strided_slice %226 {offsets = [0, 6], sizes = [16, 1], strides = [1, 1]} : vector<16x8xf32> to vector<16x1xf32>
    %282 = vector.shape_cast %281 : vector<16x1xf32> to vector<16x1x1xf32>
    %283 = vector.extract_strided_slice %225 {offsets = [6, 0, 0], sizes = [1, 16, 128], strides = [1, 1, 1]} : vector<8x16x128xf32> to vector<1x16x128xf32>
    %284 = vector.shape_cast %283 : vector<1x16x128xf32> to vector<16x128xf32>
    %285 = vector.shape_cast %284 : vector<16x128xf32> to vector<1x16x128xf32>
    %286 = vector.broadcast %282 : vector<16x1x1xf32> to vector<16x16x128xf32>
    %287 = vector.broadcast %285 : vector<1x16x128xf32> to vector<16x16x128xf32>
    %288 = arith.mulf %286, %287 : vector<16x16x128xf32>
    %289 = arith.addf %280, %288 : vector<16x16x128xf32>
    %290 = vector.extract_strided_slice %226 {offsets = [0, 7], sizes = [16, 1], strides = [1, 1]} : vector<16x8xf32> to vector<16x1xf32>
    %291 = vector.shape_cast %290 : vector<16x1xf32> to vector<16x1x1xf32>
    %292 = vector.extract_strided_slice %225 {offsets = [7, 0, 0], sizes = [1, 16, 128], strides = [1, 1, 1]} : vector<8x16x128xf32> to vector<1x16x128xf32>
    %293 = vector.shape_cast %292 : vector<1x16x128xf32> to vector<16x128xf32>
    %294 = vector.shape_cast %293 : vector<16x128xf32> to vector<1x16x128xf32>
    %295 = vector.broadcast %291 : vector<16x1x1xf32> to vector<16x16x128xf32>
    %296 = vector.broadcast %294 : vector<1x16x128xf32> to vector<16x16x128xf32>
    %297 = arith.mulf %295, %296 : vector<16x16x128xf32>
    %298 = arith.addf %289, %297 : vector<16x16x128xf32>
    %c0_67 = arith.constant 0 : index
    %c0_68 = arith.constant 0 : index
    %c0_69 = arith.constant 0 : index
    %299 = vector.load %arg5[%c0_67, %c0_68, %c0_69] : memref<1x1x128xf32, #tpu.memory_space<vmem>>, vector<1x1x128xf32>
    %300 = vector.broadcast %299 : vector<1x1x128xf32> to vector<16x16x128xf32>
    %301 = arith.addf %298, %300 : vector<16x16x128xf32>
    %cst_70 = arith.constant 0.000000e+00 : f32
    %302 = vector.broadcast %cst_70 : f32 to vector<16x16x128xf32>
    %303 = arith.maximumf %301, %302 : vector<16x16x128xf32>
    %c0_71 = arith.constant 0 : index
    %c0_72 = arith.constant 0 : index
    %c0_73 = arith.constant 0 : index
    %c0_74 = arith.constant 0 : index
    %304 = vector.load %arg18[%c0_71, %c0_72, %c0_73, %c0_74] : memref<1x16x16x128xf32, #tpu.memory_space<vmem>>, vector<1x16x16x128xf32>
    %305 = vector.shape_cast %304 : vector<1x16x16x128xf32> to vector<16x16x128xf32>
    %306 = vector.shape_cast %303 : vector<16x16x128xf32> to vector<1x16x16x128xf32>
    tpu.vector_store %arg18[%c0_71, %c0_72, %c0_73, %c0_74], %306 {strides = array<i32>} : memref<1x16x16x128xf32, #tpu.memory_space<vmem>>, vector<1x16x16x128xf32>,
    return
  }
  func.func @transform_0(%arg0: i32) -> (i32, i32, i32, i32) {
    %c0_i32 = arith.constant 0 : i32
    %c0_i32_0 = arith.constant 0 : i32
    %c0_i32_1 = arith.constant 0 : i32
    %c0_i32_2 = arith.constant 0 : i32
    return %arg0, %c0_i32, %c0_i32_0, %c0_i32_1 : i32, i32, i32, i32
  }
  func.func @transform_1(%arg0: i32) -> (i32, i32) {
    %c0_i32 = arith.constant 0 : i32
    %c0_i32_0 = arith.constant 0 : i32
    %c0_i32_1 = arith.constant 0 : i32
    return %c0_i32, %c0_i32_0 : i32, i32
  }
  func.func @transform_2(%arg0: i32) -> (i32, i32) {
    %c0_i32 = arith.constant 0 : i32
    %c0_i32_0 = arith.constant 0 : i32
    %c0_i32_1 = arith.constant 0 : i32
    return %c0_i32, %c0_i32_0 : i32, i32
  }
  func.func @transform_3(%arg0: i32) -> (i32, i32) {
    %c0_i32 = arith.constant 0 : i32
    %c0_i32_0 = arith.constant 0 : i32
    %c0_i32_1 = arith.constant 0 : i32
    return %c0_i32, %c0_i32_0 : i32, i32
  }
  func.func @transform_4(%arg0: i32) -> (i32, i32, i32) {
    %c0_i32 = arith.constant 0 : i32
    %c0_i32_0 = arith.constant 0 : i32
    %c0_i32_1 = arith.constant 0 : i32
    %c0_i32_2 = arith.constant 0 : i32
    return %c0_i32, %c0_i32_0, %c0_i32_1 : i32, i32, i32
  }
  func.func @transform_5(%arg0: i32) -> (i32, i32, i32) {
    %c0_i32 = arith.constant 0 : i32
    %c0_i32_0 = arith.constant 0 : i32
    %c0_i32_1 = arith.constant 0 : i32
    %c0_i32_2 = arith.constant 0 : i32
    return %c0_i32, %c0_i32_0, %c0_i32_1 : i32, i32, i32
  }
  func.func @transform_6(%arg0: i32) -> (i32, i32, i32) {
    %c0_i32 = arith.constant 0 : i32
    %c0_i32_0 = arith.constant 0 : i32
    %c0_i32_1 = arith.constant 0 : i32
    %c0_i32_2 = arith.constant 0 : i32
    return %c0_i32, %c0_i32_0, %c0_i32_1 : i32, i32, i32
  }
  func.func @transform_7(%arg0: i32) -> (i32, i32) {
    %c0_i32 = arith.constant 0 : i32
    %c0_i32_0 = arith.constant 0 : i32
    %c0_i32_1 = arith.constant 0 : i32
    return %c0_i32, %c0_i32_0 : i32, i32
  }
  func.func @transform_8(%arg0: i32) -> (i32, i32, i32) {
    %c0_i32 = arith.constant 0 : i32
    %c0_i32_0 = arith.constant 0 : i32
    %c0_i32_1 = arith.constant 0 : i32
    %c0_i32_2 = arith.constant 0 : i32
    return %c0_i32, %c0_i32_0, %c0_i32_1 : i32, i32, i32
  }
  func.func @transform_9(%arg0: i32) -> (i32, i32, i32) {
    %c0_i32 = arith.constant 0 : i32
    %c0_i32_0 = arith.constant 0 : i32
    %c0_i32_1 = arith.constant 0 : i32
    %c0_i32_2 = arith.constant 0 : i32
    return %c0_i32, %c0_i32_0, %c0_i32_1 : i32, i32, i32
  }
  func.func @transform_10(%arg0: i32) -> (i32, i32) {
    %c0_i32 = arith.constant 0 : i32
    %c0_i32_0 = arith.constant 0 : i32
    %c0_i32_1 = arith.constant 0 : i32
    return %c0_i32, %c0_i32_0 : i32, i32
  }
  func.func @transform_11(%arg0: i32) -> (i32, i32, i32) {
    %c0_i32 = arith.constant 0 : i32
    %c0_i32_0 = arith.constant 0 : i32
    %c0_i32_1 = arith.constant 0 : i32
    %c0_i32_2 = arith.constant 0 : i32
    return %c0_i32, %c0_i32_0, %c0_i32_1 : i32, i32, i32
  }
  func.func @transform_12(%arg0: i32) -> (i32, i32, i32) {
    %c0_i32 = arith.constant 0 : i32
    %c0_i32_0 = arith.constant 0 : i32
    %c0_i32_1 = arith.constant 0 : i32
    %c0_i32_2 = arith.constant 0 : i32
    return %c0_i32, %c0_i32_0, %c0_i32_1 : i32, i32, i32
  }
  func.func @transform_13(%arg0: i32) -> (i32, i32) {
    %c0_i32 = arith.constant 0 : i32
    %c0_i32_0 = arith.constant 0 : i32
    %c0_i32_1 = arith.constant 0 : i32
    return %c0_i32, %c0_i32_0 : i32, i32
  }
  func.func @transform_14(%arg0: i32) -> (i32, i32, i32) {
    %c0_i32 = arith.constant 0 : i32
    %c0_i32_0 = arith.constant 0 : i32
    %c0_i32_1 = arith.constant 0 : i32
    %c0_i32_2 = arith.constant 0 : i32
    return %c0_i32, %c0_i32_0, %c0_i32_1 : i32, i32, i32
  }
  func.func @transform_15(%arg0: i32) -> (i32, i32, i32) {
    %c0_i32 = arith.constant 0 : i32
    %c0_i32_0 = arith.constant 0 : i32
    %c0_i32_1 = arith.constant 0 : i32
    %c0_i32_2 = arith.constant 0 : i32
    return %c0_i32, %c0_i32_0, %c0_i32_1 : i32, i32, i32
  }
  func.func @transform_16(%arg0: i32) -> (i32, i32) {
    %c0_i32 = arith.constant 0 : i32
    %c0_i32_0 = arith.constant 0 : i32
    %c0_i32_1 = arith.constant 0 : i32
    return %c0_i32, %c0_i32_0 : i32, i32
  }
  func.func @transform_17(%arg0: i32) -> (i32, i32, i32, i32) {
    %c0_i32 = arith.constant 0 : i32
    %c0_i32_0 = arith.constant 0 : i32
    %c0_i32_1 = arith.constant 0 : i32
    %c0_i32_2 = arith.constant 0 : i32
    return %arg0, %c0_i32, %c0_i32_0, %c0_i32_1 : i32, i32, i32, i32
  }
}

</mosaic_0001>

<bundles_post_ra>
// kernel: tpu_custom_call.1
= control target key start
LH: loop header
LB: loop body
LE: loop exit
PB: predicated region body
PF: predicated region fallthrough
CT: control target
= control target key end

     0   :  { %s8347_s0 = inlined_call_operand.hbm [shape: f32[2,16,16,128], index: 0, kind: input, shape index: {}]   ;;  %s8348_s1 = inlined_call_operand.vmem [shape: bf16[128,32], index: 1, kind: input, shape index: {}]   ;;  %s8349_s2 = inlined_call_operand.vmem [shape: bf16[128,128], index: 2, kind: input, shape index: {}]   ;;  %s8350_s3 = inlined_call_operand.vmem [shape: bf16[128,128], index: 3, kind: input, shape index: {}]   ;;  %s8351_s4 = inlined_call_operand.vmem [shape: f32[1,1,128], index: 4, kind: input, shape index: {}]   ;;  %s8352_s5 = inlined_call_operand.vmem [shape: bf16[1,1,16], index: 5, kind: input, shape index: {}]   ;;  %s8353_s6 = inlined_call_operand.vmem [shape: bf16[1,16,1], index: 6, kind: input, shape index: {}]   ;;  %s8354_s7 = inlined_call_operand.vmem [shape: f32[16,1], index: 7, kind: input, shape index: {}]   ;;  %s8355_s8 = inlined_call_operand.vmem [shape: bf16[2,2,16], index: 8, kind: input, shape index: {}]   ;;  %s8356_s9 = inlined_call_operand.vmem [shape: bf16[2,16,2], index: 9, kind: input, shape index: {}]   ;;  %s8357_s10 = inlined_call_operand.vmem [shape: f32[16,2], index: 10, kind: input, shape index: {}]   ;;  %s8358_s11 = inlined_call_operand.vmem [shape: bf16[4,4,16], index: 11, kind: input, shape index: {}]   ;;  %s8359_s12 = inlined_call_operand.vmem [shape: bf16[4,16,4], index: 12, kind: input, shape index: {}]   ;;  %s8360_s13 = inlined_call_operand.vmem [shape: f32[16,4], index: 13, kind: input, shape index: {}]   ;;  %s8361_s14 = inlined_call_operand.vmem [shape: bf16[8,8,16], index: 14, kind: input, shape index: {}]   ;;  %s8362_s15 = inlined_call_operand.vmem [shape: bf16[8,16,8], index: 15, kind: input, shape index: {}]   ;;  %s8363_s16 = inlined_call_operand.vmem [shape: f32[16,8], index: 16, kind: input, shape index: {}]   ;;  %s8364_s17 = inlined_call_operand.hbm [shape: f32[2,16,16,128], index: 17, kind: output, shape index: {}]  }
   0x1   :  { %8664 = sst [smem:[#allocation144_spill]] %s8347_s0 }
   0x2   :  { %8665 = sst [smem:[#allocation145_spill]] %s8348_s1 }
   0x3   :  { %8666 = sst [smem:[#allocation146_spill]] %s8349_s2 }
   0x4   :  { %8667 = sst [smem:[#allocation147_spill]] %s8350_s3 }
   0x5   :  { %8668 = sst [smem:[#allocation148_spill]] %s8351_s4 }
   0x6   :  { %8669 = sst [smem:[#allocation149_spill]] %s8352_s5 }
   0x7   :  { %8670 = sst [smem:[#allocation150_spill]] %s8353_s6 }
   0x8   :  { %8671 = sst [smem:[#allocation151_spill]] %s8361_s14 }
   0x9   :  { %8672 = sst [smem:[#allocation152_spill]] %s8362_s15 }
   0xa   :  { %8673 = sst [smem:[#allocation153_spill]] %s8364_s17 }
   0xb   :  { %22 = vsyncpa [#allocation3], 0 }
   0xc   :  { %24 = vsyncpa [#allocation3 + $0x1], 0 }
   0xd   :  { %25 = vsyncpa [#allocation4], 0 }
   0xe   :  { %27 = vsyncpa [#allocation4 + $0x1], 0  ;;  %s5102_s24 = smov 0   ;;  %s5104_s25 = smov 0  }
   0xf   :  { %s5106_s26 = smov 0   ;;  %s5108_s27 = smov 0  }
  0x10 LB: > { %8674 = sst [smem:[#allocation8_spill]] %s4986_s24  ;;  %s5123_s28 = sadd.s32 4294967295, %s4998_s27   ;;  %s4998_s27 = sphi %s5108_s27, %s9531_s27   ;;  %s4994_s26 = sphi %s5106_s26, %s9533_s26   ;;  %s4990_s25 = sphi %s5104_s25, %s9535_s25   ;;  %s4986_s24 = sphi %s5102_s24, %s9534_s24  }
  0x11   : > { %8675 = sst [smem:[#allocation9_spill]] %s4994_s26  ;;  %s4422_s29 = sadd.s32 4294967294, %s4998_s27  }
  0x12   : > { %8676 = sst [smem:[#allocation10_spill]] %s5123_s28  ;;  %s5127_s0 = sadd.s32 1, %s4998_s27  }
  0x13   : > { %8677 = sst [smem:[#allocation11_spill]] %s5127_s0  ;;  %s40_s30 = sadd.s32 1, %s4994_s26 }
  0x14   : > { %s37_s18 = ssub.s32 %s4998_s27, %s5127_s0  ;;  %p47_p0 = scmp.ne.s32.totalorder %s4994_s26, %s4990_s25 }
  0x15   : > { %p38_p1 = scmp.eq.s32.totalorder %s37_s18, 0  ;;  %p48_p2 = scmp.eq.s32.totalorder %s4998_s27, 0 }
  0x16   : > { %p53_p3 = scmp.ne.s32.totalorder %s4990_s25, %s4986_s24  ;;  %p54_p4 = scmp.eq.s32.totalorder %s5123_s28, 0 }
  0x17   : > { %s5139_s19 = scalar_select %p38_p1, %s4994_s26, %s40_s30  }
  0x18   : > { %p5141_p5 = por %p48_p2, %p47_p0  ;;  %p5145_p6 = por %p54_p4, %p53_p3 }
  0x19   : > { %8678 = sst [smem:[#allocation12_spill]] %s5139_s19  ;;  %p413_p7 = scmp.eq.s32.totalorder %s5123_s28, 1 }
  0x1a   : > { %p419_p8 = scmp.eq.s32.totalorder %s4422_s29, 1  ;;  %p4802_p10 = scmp.lt.s32.totalorder %s4998_s27, 2 }
  0x1b   : > { %p5152_p11 = por %p413_p7, %p47_p0  ;;  %s487_s23 = sand.u32 1, %s4994_s26  }
  0x1c   : > { %p5156_p12 = por %p419_p8, %p53_p3  ;;  %s4725_s30 = sshll.u32 %s4998_s27, 8 }
  0x1d   : > { %s8681_s21 = scalar_select %p5152_p11, 1, 0 }
  0x1e   : > { %s8683_s22 = scalar_select %p5156_p12, 1, 0 }
  0x1f   : > { %8682 = sst [smem:[#allocation13_spill]] %s8681_s21  ;;  %s4425_s18 = sshll.u32 %s487_s23, 8 }
  0x20   : > { %8684 = sst [smem:[#allocation14_spill]] %s8683_s22  ;;  %s491_s29 = scalar_lea.vmem [#allocation2], %s4425_s18 }
  0x21   : > { %s8685_s24 = sld [smem:[#allocation144_spill]]  ;;  %s499_s15 = sshll.u32 %s491_s29, 4  ;;  %s500_s15 = int_to_ptr.vmem [resolvable:$true] %s499_s15 }
  0x22   : > { %p5167_p13 = pnand %p4802_p10, %p5141_p5  ;;  %p4428_p0 = scmp.ge.s32.totalorder %s4998_s27, 1 }
  0x23   : > { %p507_p1 = scmp.lt.s32.totalorder %s4998_s27, 3  ;;  %s488_s26 = scalar_lea.sflag [#allocation3], %s487_s23 }
  0x24   : > { %p4906_p3 = pneg %p5167_p13 }
  0x27   : > { %s8686_s17 = smov %s8685_s24  ;;  %s496_s28 = scalar_lea.hbm %s8685_s24, %s4725_s30 }
  0x28   : > { %s497_s4 = sshll.u32 %s496_s28, 4  ;;  %s4909_s0 = scalar_lea.hbm %s8686_s17, 512  ;;  %s498_s4 = int_to_ptr.hbm [resolvable:$true] %s497_s4 }
  0x29   : > { %s4902_s22 = sshra.s32 %s498_s4, 4  ;;  %s4903_s22 = int_to_ptr.hbm [resolvable:$true] %s4902_s22 }
  0x2a   : > { %s4904_s21 = scalar_lea.hbm %s4903_s22, 256  ;;  %p4910_p5 = scmp.lt.s32.totalorder %s4903_s22, %s8686_s17 }
  0x2b   : > { %p4905_p2 = scmp.ne.s32.totalorder %s4903_s22, %s4904_s21  ;;  %p4911_p8 = scmp.lt.s32.totalorder %s4909_s0, %s4904_s21 }
  0x2d   : > { %p4907_p4 = pnand %p4906_p3, %p4905_p2  ;;  %p4912_p10 = por %p4911_p8, %p4910_p5 }
  0x2f   : > { %p4908_p7 = pneg %p4907_p4 }
  0x31   : > { %p4913_p9 = pnand %p4912_p10, %p4908_p7 }
  0x33   : > { %4916 = shalt.err (!%p4913_p9)
}
  0x34   : > { %s5000_s23 = smov 128   ;;  %s5001_s30 = smov 8  }
  0x35   : > { %4797 = dma.hbm_to_vmem [thread:$0]  (!%p5167_p13), %s498_s4, 4096, %s500_s15, %s488_s26, %s5000_s23, %s5000_s23, %s5001_s30  }
  0x36   : > { %p508_p2 = pnand %p4428_p0, %p507_p1 }
  0x38   : > { %511 = sbr.rel (%p508_p2) target bundleno = 2168 (0x878), region = 88 }
  0x3d   : > { %s5188_s18 = sand.u32 1, %s4990_s25  }
  0x3e   : > { %s4429_s21 = sshll.u32 %s5188_s18, 8  ;;  %s514_s22 = scalar_lea.sflag [#allocation3], %s5188_s18 }
  0x3f   : > { %s5194_s29 = scalar_lea.vmem [#allocation2], %s4429_s21 }
  0x40   : > { %4977 = dma.done.wait (%p5145_p6), %s514_s22, 4096  }
  0x41   : > { %4979 = vsyncadd (%p5145_p6), %s514_s22, 4294963200  ;;  %v5201_v0 = vld [vmem:[%s5194_s29] sm:$0xff]  ;;  %v5204_v1 = vld [vmem:[%s5194_s29 + $0x8] sm:$0xff]  ;;  %s8690_s15 = sld [smem:[#allocation145_spill]]  ;;  %vm826_vm0 = vcmask 130048   ;;  %vm935_vm1 = vcmask 261120  }
  0x42   : > { %v5207_v2 = vld [vmem:[%s5194_s29 + $0x10] sm:$0xff]  ;;  %v5210_v3 = vld [vmem:[%s5194_s29 + $0x18] sm:$0xff]  ;;  %v5213_v4 = vld [vmem:[%s5194_s29 + $0x20] sm:$0xff]  ;;  %s8691_s5 = sld [smem:[#allocation149_spill]]  ;;  %vm964_vm2 = vcmask 1040384   ;;  %vm960_vm3 = vcmask 7168  }
  0x43   : > { %v5216_v5 = vld [vmem:[%s5194_s29 + $0x28] sm:$0xff]  ;;  %v5220_v6 = vadd.f32 %v5207_v2, %v5201_v0  ;;  %v5223_v7 = vld [vmem:[%s5194_s29 + $0x30] sm:$0xff]  ;;  %v5227_v8 = vadd.f32 %v5210_v3, %v5204_v1  ;;  %v5230_v9 = vld [vmem:[%s5194_s29 + $0x38] sm:$0xff]  ;;  %s8692_s2 = sld [smem:[#allocation146_spill]]  ;;  %vm1339_vm4 = vcmask 15360   ;;  %vm1940_vm5 = vcmask 1041408  }
  0x44   : > { %v5235_v11 = vld [vmem:[%s5194_s29 + $0x40] sm:$0xff]  ;;  %v5240_v13 = vld [vmem:[%s5194_s29 + $0x48] sm:$0xff]  ;;  %v5246_v15 = vld [vmem:[%s5194_s29 + $0x50] sm:$0xff]  ;;  %s8693_s3 = sld [smem:[#allocation147_spill]]  ;;  %vm1936_vm6 = vcmask 31744   ;;  %vm2982_vm7 = vcmask 1043456  }
  0x45   : > { %8688 = vst [vmem:[#allocation15_spill] sm:$0xff] %v5220_v6  ;;  %v789_v10 = vadd.f32 %v5220_v6, %v5213_v4  ;;  %v790_v12 = vadd.f32 %v5227_v8, %v5216_v5  ;;  %v5252_v17 = vld [vmem:[%s5194_s29 + $0x58] sm:$0xff]  ;;  %v5257_v19 = vld [vmem:[%s5194_s29 + $0x60] sm:$0xff]  ;;  %v5262_v21 = vld [vmem:[%s5194_s29 + $0x68] sm:$0xff]  ;;  %s8700_s6 = sld [smem:[#allocation150_spill]]  ;;  %vm2978_vm8 = vcmask 64512  }
  0x46   : > { %8689 = vst [vmem:[#allocation16_spill] sm:$0xff] %v5227_v8  ;;  %v5266_v23 = vld [vmem:[%s5194_s29 + $0x70] sm:$0xff]  ;;  %v5270_v25 = vld [vmem:[%s5194_s29 + $0x78] sm:$0xff]  ;;  %v5277_v28 = vld [vmem:[%s5194_s29 + $0x80] sm:$0xff]  ;;  %s8844_s26 = sld [smem:[#allocation151_spill]]  ;;  %s8070_s4 = scalar_lea.vmem [#allocation5], %s4429_s21 }
  0x47   : > { %v5243_v14 = vadd.f32 %v789_v10, %v5223_v7  ;;  %v5249_v16 = vadd.f32 %v790_v12, %v5230_v9  ;;  %v4749_v27 = vld [vmem:[%s8690_s15 + $0x38] sm:$0xff]  ;;  %v5281_v30 = vld [vmem:[%s5194_s29 + $0x88] sm:$0xff]  ;;  %v5296_v35 = vld [vmem:[%s5194_s29 + $0x98] sm:$0xff]  ;;  %s9402_s22 = sld [smem:[#allocation148_spill]]  ;;  %s4346_s19 = sshll.u32 %s8070_s4, 4  ;;  %s4347_s19 = int_to_ptr.vmem [resolvable:$true] %s4346_s19 }
  0x48   : > { %908 = vmatpush.bf16.msra.mxu2 %v4749_v27  ;;  %v4748_v32 = vld [vmem:[%s8690_s15 + $0x30] sm:$0xff]  ;;  %v5290_v33 = vld [vmem:[%s5194_s29 + $0x90] sm:$0xff]  ;;  %v5301_v37 = vld [vmem:[%s5194_s29 + $0xa0] sm:$0xff]  ;;  %s9525_s21 = sld [smem:[#allocation10_spill]]  ;;  %s4334_s30 = scalar_lea.sflag [#allocation4], %s5188_s18 }
  0x49   : > { %v793_v18 = vadd.f32 %v5243_v14, %v5235_v11  ;;  %v794_v20 = vadd.f32 %v5249_v16, %v5240_v13  ;;  %v5306_v39 = vld [vmem:[%s5194_s29 + $0xa8] sm:$0xff]  ;;  %v4747_v41 = vld [vmem:[%s8690_s15 + $0x28] sm:$0xff]  ;;  %v5313_v42 = vld [vmem:[%s5194_s29 + $0xb0] sm:$0xff]  ;;  %s9526_s28 = sld [smem:[#allocation153_spill]] }
  0x4a   : > { %v5317_v44 = vld [vmem:[%s5194_s29 + $0xb8] sm:$0xff]  ;;  %v5321_v46 = vld [vmem:[%s5194_s29 + $0xc0] sm:$0xff]  ;;  %v5325_v48 = vld [vmem:[%s5194_s29 + $0xc8] sm:$0xff] }
  0x4b   : > { %v795_v22 = vadd.f32 %v793_v18, %v5246_v15  ;;  %v796_v24 = vadd.f32 %v794_v20, %v5252_v17  ;;  %v4746_v50 = vld [vmem:[%s8690_s15 + $0x20] sm:$0xff]  ;;  %v5332_v51 = vld [vmem:[%s5194_s29 + $0xd0] sm:$0xff]  ;;  %v5340_v55 = vld [vmem:[%s5194_s29 + $0xe0] sm:$0xff] }
  0x4c   : > { %909 = vmatpush.bf16.msra.mxu2 %v4748_v32  ;;  %v5336_v53 = vld [vmem:[%s5194_s29 + $0xd8] sm:$0xff]  ;;  %v5344_v57 = vld [vmem:[%s5194_s29 + $0xe8] sm:$0xff]  ;;  %v4745_v59 = vld [vmem:[%s8690_s15 + $0x18] sm:$0xff]  ;;  %s8845_s20 = smov %s8844_s26 }
  0x4d   : > { %v797_v26 = vadd.f32 %v795_v22, %v5257_v19  ;;  %v798_v29 = vadd.f32 %v796_v24, %v5262_v21  ;;  %v5351_v60 = vld [vmem:[%s5194_s29 + $0xf0] sm:$0xff]  ;;  %v5355_v62 = vld [vmem:[%s5194_s29 + $0xf8] sm:$0xff]  ;;  %v4744_v18 = vld [vmem:[%s8690_s15 + $0x10] sm:$0xff] }
  0x4e   : > { %v4743_v27 = vld [vmem:[%s8690_s15 + $0x8] sm:$0xff]  ;;  %s4789_s14 = sshll.u32 %s9525_s21, 8 }
  0x4f   : > { %v5284_v31 = vadd.f32 %v797_v26, %v5266_v23  ;;  %v5293_v34 = vadd.f32 %v798_v29, %v5270_v25  ;;  %s4345_s0 = scalar_lea.hbm %s9526_s28, %s4789_s14  ;;  %s4952_s24 = scalar_lea.hbm %s9526_s28, 512 }
  0x50   : > { %910 = vmatpush.bf16.msra.mxu2 %v4747_v41  ;;  %v4732_v41 = vld [vmem:[%s8692_s2 + $0x30] sm:$0xff]  ;;  %s4348_s1 = sshll.u32 %s4345_s0, 4  ;;  %s4349_s1 = int_to_ptr.hbm [resolvable:$true] %s4348_s1 }
  0x51   : > { %v801_v36 = vadd.f32 %v5284_v31, %v5277_v28  ;;  %v802_v38 = vadd.f32 %v5293_v34, %v5281_v30 }
  0x53   : > { %v803_v40 = vadd.f32 %v801_v36, %v5290_v33  ;;  %v804_v43 = vadd.f32 %v802_v38, %v5296_v35  ;;  %v817_v36 = vld [vmem:[%s8691_s5] sm:$0x1] }
  0x54   : > { %911 = vmatpush.bf16.msra.mxu2 %v4746_v50  ;;  %v4742_v38 = vld [vmem:[%s8690_s15] sm:$0xff]  ;;  %v4727_v50 = vld [vmem:[%s8692_s2 + $0x8] sm:$0xff] }
  0x55   : > { %v805_v45 = vadd.f32 %v803_v40, %v5301_v37  ;;  %v806_v47 = vadd.f32 %v804_v43, %v5306_v39  ;;  %v4733_v40 = vld [vmem:[%s8692_s2 + $0x38] sm:$0xff]  ;;  %v4731_v43 = vld [vmem:[%s8692_s2 + $0x28] sm:$0xff] }
  0x56   : > { %682 = vmatpush.bf16.msra.mxu0 %v4733_v40 }
  0x57   : > { %v807_v49 = vadd.f32 %v805_v45, %v5313_v42  ;;  %v808_v52 = vadd.f32 %v806_v47, %v5317_v44  ;;  %v4730_v45 = vld [vmem:[%s8692_s2 + $0x20] sm:$0xff]  ;;  %v4729_v47 = vld [vmem:[%s8692_s2 + $0x18] sm:$0xff] }
  0x58   : > { %912 = vmatpush.bf16.msra.mxu2 %v4745_v59 }
  0x59   : > { %v809_v54 = vadd.f32 %v807_v49, %v5321_v46  ;;  %v810_v56 = vadd.f32 %v808_v52, %v5325_v48  ;;  %v4728_v49 = vld [vmem:[%s8692_s2 + $0x10] sm:$0xff] }
  0x5a   : > { %683 = vmatpush.bf16.msra.mxu0 %v4732_v41 }
  0x5b   : > { %v811_v58 = vadd.f32 %v809_v54, %v5332_v51  ;;  %v812_v61 = vadd.f32 %v810_v56, %v5336_v53  ;;  %v4726_v56 = vld [vmem:[%s8692_s2] sm:$0xff] }
  0x5c   : > { %913 = vmatpush.bf16.msra.mxu2 %v4744_v18 }
  0x5d   : > { %v813_v63 = vadd.f32 %v811_v58, %v5340_v55  ;;  %v814_v10 = vadd.f32 %v812_v61, %v5344_v57  ;;  %v602_v58 = vpack.c.bf16 %v5204_v1, %v5201_v0  ;;  %v603_v61 = vpack.c.bf16 %v5210_v3, %v5207_v2  ;;  %v4734_v3 = vld [vmem:[%s8693_s3] sm:$0xff] }
  0x5e   : > { %684 = vmatpush.bf16.msra.mxu0 %v4731_v43  ;;  %v606_v0 = vpack.c.bf16 %v5240_v13, %v5235_v11  ;;  %v607_v1 = vpack.c.bf16 %v5252_v17, %v5246_v15  ;;  %v608_v2 = vpack.c.bf16 %v5262_v21, %v5257_v19 }
  0x5f   : > { %v815_v12 = vadd.f32 %v813_v63, %v5351_v60  ;;  %v816_v20 = vadd.f32 %v814_v10, %v5355_v62  ;;  %v604_v63 = vpack.c.bf16 %v5216_v5, %v5213_v4  ;;  %v605_v10 = vpack.c.bf16 %v5230_v9, %v5223_v7 }
  0x60   : > { %914 = vmatpush.bf16.msra.mxu2 %v4743_v27  ;;  %v609_v4 = vpack.c.bf16 %v5270_v25, %v5266_v23  ;;  %v610_v5 = vpack.c.bf16 %v5281_v30, %v5277_v28  ;;  %v613_v27 = vpack.c.bf16 %v5317_v44, %v5313_v42 }
  0x61   : > { %v818_v22 = vpack.c.bf16 %v815_v12, %v815_v12  ;;  %v819_v24 = vpack.c.bf16 %v816_v20, %v816_v20  ;;  %v4735_v12 = vld [vmem:[%s8693_s3 + $0x8] sm:$0xff] }
  0x62   : > { %685 = vmatpush.bf16.msra.mxu0 %v4730_v45  ;;  %945 = vmatpush.bf16.msra.mxu3 %v4735_v12  ;;  %v5463_v12 = vld [vmem:[%s8354_s7 + $0x8] sm:$0xff] }
  0x63   : > { %v822_v26 = vunpack.c.l.b16 %v818_v22  ;;  %v823_v29 = vunpack.c.l.b16 %v819_v24  ;;  %v611_v22 = vpack.c.bf16 %v5296_v35, %v5290_v33  ;;  %v612_v24 = vpack.c.bf16 %v5306_v39, %v5301_v37 }
  0x64   : > { %915 = vmatpush.bf16.msra.mxu2 %v4742_v38 }
  0x65   : > { %v824_v32 = vpack.c.b16 %v823_v29, %v822_v26  ;;  %v8380_v29 = vmov 0  }
  0x66   : > { %686 = vmatpush.bf16.msra.mxu0 %v4729_v47  ;;  %946 = vmatpush.bf16.msra.mxu3 %v4734_v3  ;;  %v614_v47 = vpack.c.bf16 %v5325_v48, %v5321_v46  ;;  %v995_v3 = vrot.slane %v5463_v12, 1 }
  0x67   : > { %837 = vmatpush.bf16.msra.mxu1 %v824_v32  ;;  %4848 = vset.pattern.permute.xlu0 %v8380_v29  ;;  %v5437_v32 = vld [vmem:[%s8354_s7] sm:$0xff] }
  0x68   : > { %4849 = vset.pattern.permute.xlu1 %v8380_v29  ;;  %4850 = vset.pattern.permute.xlu2 %v8380_v29  ;;  %v989_v40 = vrot.slane %v5437_v32, 2  ;;  %v988_v41 = vrot.slane %v5437_v32, 1 }
  0x6a   : > { %4463 = vmatmul.msk.bf16.vlgmr.msra.gmra.mxu1 %vm826_vm0, %v817_v36  ;;  %687 = vmatpush.bf16.msra.mxu0 %v4728_v49  ;;  %v1002_v36 = vperm.slane %v5437_v32, 0  ;;  %v1004_v43 = vperm.slane %v989_v40, 0  ;;  %v1003_v45 = vperm.slane %v988_v41, 0 }
  0x6c   : > { %1019 = vperm.xlu0 %4848, %v1002_v36   ;;  %1027 = vperm.xlu1 %4849, %v1004_v43  }
  0x6e   : > { %688 = vmatpush.bf16.msra.mxu0 %v4727_v50  ;;  %v990_v50 = vrot.slane %v5437_v32, 3 }
  0x72   : > { %689 = vmatpush.bf16.msra.mxu0 %v4726_v56 }
  0x74   : > { %1023 = vperm.xlu0 %4848, %v1003_v45   ;;  %v992_v45 = vrot.slane %v5437_v32, 5 }
  0x75   : > { %690 = vmatmul.bf16.vlgmr.msra.gmra.mxu0 %v602_v58 }
  0x85   : > { %695 = vmatmul.bf16.gmra.mxu0 %v603_v61 }
  0x95   : > { %700 = vmatmul.bf16.gmra.mxu0 %v604_v63 }
  0xa5   : > { %705 = vmatmul.bf16.gmra.mxu0 %v605_v10  ;;  %v616_v10 = vpack.c.bf16 %v5344_v57, %v5340_v55 }
  0xb5   : > { %710 = vmatmul.bf16.gmra.mxu0 %v606_v0  ;;  %v5467_v0 = vadd.f32 %v5290_v33, %v5277_v28 }
  0xb7   : > { %8697 = vst [vmem:[#allocation20_spill] sm:$0xff] %v5467_v0 }
  0xc5   : > { %715 = vmatmul.bf16.gmra.mxu0 %v607_v1  ;;  %v5471_v1 = vadd.f32 %v5296_v35, %v5281_v30  ;;  %v1148_v30 = vadd.f32 %v5467_v0, %v5301_v37  ;;  %v617_v37 = vpack.c.bf16 %v5355_v62, %v5351_v60 }
  0xc7   : > { %8698 = vst [vmem:[#allocation21_spill] sm:$0xff] %v5471_v1  ;;  %v1149_v33 = vadd.f32 %v5471_v1, %v5306_v39  ;;  %v1160_v39 = vld [vmem:[%s8355_s8] sm:$0x1] }
  0xd5   : > { %720 = vmatmul.bf16.gmra.mxu0 %v608_v2  ;;  %v994_v2 = vrot.slane %v5437_v32, 7 }
  0xe5   : > { %725 = vmatmul.bf16.gmra.mxu0 %v609_v4 }
  0xe7   : > { %v839_v52 = vpop.f32.mrf.mxu1 }
  0xe8   : > { %v843_v54 = vpack.c.bf16 %v839_v52, %v839_v52  ;;  %v993_v52 = vrot.slane %v5437_v32, 6 }
  0xea   : > { %916 = vmatmul.bf16.vlgmr.msra.gmra.mxu2 %v843_v54  ;;  %v1005_v54 = vperm.slane %v990_v50, 0  ;;  %v1008_v56 = vperm.slane %v993_v52, 0  ;;  %v1001_v50 = vrot.slane %v5463_v12, 7 }
  0xec   : > { %1031 = vperm.xlu1 %4849, %v1005_v54   ;;  %1043 = vperm.xlu0 %4848, %v1008_v56   ;;  %v1007_v56 = vperm.slane %v992_v45, 0  ;;  %v4756_v45 = vld [vmem:[%s8690_s15 + $0x28] sm:$0xff] }
  0xef   : > { %v841_v59 = vpop.f32.mrf.mxu1 }
  0xf0   : > { %v615_v59 = vpack.c.bf16 %v5336_v53, %v5332_v51 }
  0xf2   : > { %v5427_v26 = vpop.f32.mrf.mxu0 }
  0xf5   : > { %730 = vmatmul.bf16.gmra.mxu0 %v610_v5  ;;  %v1009_v5 = vperm.slane %v994_v2, 0 }
  0xf7   : > { %1047 = vperm.xlu1 %4849, %v1009_v5  }
  0xfa   : > { %v5440_v38 = vpop.f32.mrf.mxu0 }
  0xfb   : > { %8694 = vst [vmem:[#allocation17_spill] sm:$0xff] %v5440_v38 }
 0x102   : > { %v5446_v49 = vpop.f32.mrf.mxu0 }
 0x105   : > { %735 = vmatmul.bf16.gmra.mxu0 %v611_v22  ;;  %v5486_v22 = vadd.f32 %v1148_v30, %v5313_v42 }
 0x10a   : > { %v5450_v58 = vpop.f32.mrf.mxu0 }
 0x10b   : > { %8695 = vst [vmem:[#allocation18_spill] sm:$0xff] %v5450_v58  ;;  %v5672_v58 = vld [vmem:[%s8363_s16 + $0x8] sm:$0xff] }
 0x10c   : > { %8715 = vst [vmem:[#allocation37_spill] sm:$0xff] %v5672_v58 }
 0x112   : > { %v5454_v61 = vpop.f32.mrf.mxu0 }
 0x115   : > { %740 = vmatmul.bf16.gmra.mxu0 %v612_v24  ;;  %v5489_v24 = vadd.f32 %v1149_v33, %v5317_v44  ;;  %v1152_v44 = vadd.f32 %v5486_v22, %v5321_v46 }
 0x117   : > { %v1153_v43 = vadd.f32 %v5489_v24, %v5325_v48  ;;  %v1154_v52 = vadd.f32 %v1152_v44, %v5332_v51  ;;  %v1161_v44 = vld [vmem:[%s8355_s8 + $0x1] sm:$0x1] }
 0x119   : > { %v1155_v54 = vadd.f32 %v1153_v43, %v5336_v53  ;;  %v1156_v2 = vadd.f32 %v1154_v52, %v5340_v55  ;;  %v4757_v43 = vld [vmem:[%s8690_s15 + $0x30] sm:$0xff]  ;;  %v4754_v52 = vld [vmem:[%s8690_s15 + $0x18] sm:$0xff] }
 0x11a   : > { %v5456_v63 = vpop.f32.mrf.mxu0 }
 0x11b   : > { %8696 = vst [vmem:[#allocation19_spill] sm:$0xff] %v5456_v63 }
 0x122   : > { %v5475_v4 = vpop.f32.mrf.mxu0 }
 0x125   : > { %745 = vmatmul.bf16.gmra.mxu0 %v613_v27  ;;  %v998_v27 = vrot.slane %v5463_v12, 4 }
 0x127   : > { %v1014_v40 = vperm.slane %v998_v27, 0 }
 0x12a   : > { %v5499_v41 = vpop.f32.mrf.mxu0 }
 0x12b   : > { %8699 = vst [vmem:[#allocation22_spill] sm:$0xff] %v5499_v41 }
 0x135   : > { %750 = vmatmul.bf16.gmra.mxu0 %v614_v47  ;;  %v999_v47 = vrot.slane %v5463_v12, 5 }
 0x145   : > { %755 = vmatmul.bf16.gmra.mxu0 %v615_v59  ;;  %v1015_v59 = vperm.slane %v999_v47, 0 }
 0x155   : > { %760 = vmatmul.bf16.gmra.mxu0 %v616_v10  ;;  %v1017_v10 = vperm.slane %v1001_v50, 0  ;;  %v4755_v50 = vld [vmem:[%s8690_s15 + $0x20] sm:$0xff] }
 0x165   : > { %765 = vmatmul.bf16.gmra.mxu0 %v617_v37 }
 0x16d   : > { %v917_v7 = vpop.f32.mrf.mxu2 }
 0x16e   : > { %v921_v9 = vmax.f32 %v917_v7, 0.0  ;;  %v1011_v7 = vperm.slane %v995_v3, 0  ;;  %v1157_v3 = vadd.f32 %v1155_v54, %v5344_v57  ;;  %v4753_v54 = vld [vmem:[%s8690_s15 + $0x10] sm:$0xff] }
 0x170   : > { %v922_v18 = vpack.c.bf16 %v921_v9, %v921_v9  ;;  %v1162_v9 = vpack.c.bf16 %v5284_v31, %v5284_v31  ;;  %1055 = vperm.xlu0 %4848, %v1011_v7   ;;  %v991_v31 = vrot.slane %v5437_v32, 4  ;;  %v1158_v32 = vadd.f32 %v1156_v2, %v5351_v60  ;;  %v4737_v2 = vld [vmem:[%s8693_s3 + $0x18] sm:$0xff] }
 0x171   : > { %v1159_v5 = vadd.f32 %v1157_v3, %v5355_v62  ;;  %v1010_v7 = vperm.slane %v5463_v12, 0  ;;  %1318 = vmatpush.bf16.msrb.mxu2 %v4737_v2 }
 0x172   : > { %4504 = vmatmul.msk.bf16.vlgmr.msra.gmra.mxu3 %vm935_vm1, %v922_v18  ;;  %v1163_v18 = vpack.c.bf16 %v5293_v34, %v5293_v34  ;;  %v1168_v28 = vunpack.c.l.b16 %v1162_v9  ;;  %v996_v34 = vrot.slane %v5463_v12, 2  ;;  %v1006_v36 = vperm.slane %v991_v31, 0 }
 0x173   : > { %v1164_v9 = vpack.c.bf16 %v1158_v32, %v1158_v32  ;;  %v966_v31 = vsel %vm964_vm2, 65535, %v8380_v29 }
 0x174   : > { %v1169_v35 = vunpack.c.l.b16 %v1163_v18  ;;  %v1012_v42 = vperm.slane %v996_v34, 0  ;;  %1035 = vperm.xlu2 %4850, %v1006_v36   ;;  %v1165_v18 = vpack.c.bf16 %v1159_v5, %v1159_v5  ;;  %v4750_v36 = vld [vmem:[%s8700_s6] sm:$0xff] }
 0x175   : > { %v919_v20 = vpop.f32.mrf.mxu2  ;;  %v1190_v30 = vunpack.c.l.b16 %v1164_v9 }
 0x176   : > { %v1170_v20 = vpack.c.b16 %v1169_v35, %v1168_v28  ;;  %1059 = vperm.xlu1 %4849, %v1012_v42   ;;  %v997_v28 = vrot.slane %v5463_v12, 3  ;;  %v1191_v33 = vunpack.c.l.b16 %v1165_v18 }
 0x178   : > { %1182 = vmatpush.bf16.msrb.mxu3 %v1170_v20  ;;  %1067 = vperm.xlu0 %4848, %v1014_v40   ;;  %v1013_v35 = vperm.slane %v997_v28, 0  ;;  %v1192_v27 = vpack.c.b16 %v1191_v33, %v1190_v30  ;;  %v4736_v28 = vld [vmem:[%s8693_s3 + $0x10] sm:$0xff]  ;;  %v5564_v30 = vld [vmem:[%s8357_s10] sm:$0xff] }
 0x179   : > { %1319 = vmatpush.bf16.msrb.mxu2 %v4736_v28  ;;  %v1390_v33 = vrot.slane %v5564_v30, 2 }
 0x17c   : > { %1039 = vperm.xlu2 %4850, %v1007_v56  }
 0x17e   : > { %1071 = vperm.xlu1 %4849, %v1015_v59   ;;  %v4752_v59 = vld [vmem:[%s8690_s15 + $0x8] sm:$0xff] }
 0x180   : > { %1079 = vperm.xlu0 %4848, %v1017_v10   ;;  %v4751_v10 = vld [vmem:[%s8690_s15] sm:$0xff] }
 0x182   : > { %4510 = vmatmul.msk.bf16.vlgmr.msrb.gmra.mxu3 %vm826_vm0, %v1160_v39  ;;  %v1000_v39 = vrot.slane %v5463_v12, 6  ;;  %v4758_v12 = vld [vmem:[%s8690_s15 + $0x38] sm:$0xff] }
 0x183   : > { %1282 = vmatpush.bf16.msra.mxu3 %v4758_v12  ;;  %v8379_v12 = vperm.slane %v5564_v30, 0 }
 0x184   : > { %1051 = vperm.xlu2 %4850, %v1010_v7   ;;  %v1016_v42 = vperm.slane %v1000_v39, 0 }
 0x186   : > { %1420 = vperm.xlu1 %4849, %v8379_v12  }
 0x187   : > { %1283 = vmatpush.bf16.msra.mxu3 %v4757_v43 }
 0x18b   : > { %1284 = vmatpush.bf16.msra.mxu3 %v4756_v45 }
 0x18c   : > { %1063 = vperm.xlu2 %4850, %v1013_v35   ;;  %v5567_v35 = vperm.slane %v1390_v33, 0 }
 0x18e   : > { %1428 = vperm.xlu0 %4848, %v5567_v35  }
 0x18f   : > { %1285 = vmatpush.bf16.msra.mxu3 %v4755_v50 }
 0x193   : > { %1286 = vmatpush.bf16.msra.mxu3 %v4754_v52  ;;  %v1391_v52 = vrot.slane %v5564_v30, 3 }
 0x194   : > { %1075 = vperm.xlu2 %4850, %v1016_v42  }
 0x197   : > { %1287 = vmatpush.bf16.msra.mxu3 %v4753_v54  ;;  %v5601_v54 = vperm.slane %v1391_v52, 0 }
 0x199   : > { %1432 = vperm.xlu1 %4849, %v5601_v54  }
 0x19b   : > { %1288 = vmatpush.bf16.msra.mxu3 %v4752_v59 }
 0x19f   : > { %1289 = vmatpush.bf16.msra.mxu3 %v4751_v10  ;;  %v1394_v10 = vrot.slane %v5564_v30, 6 }
 0x1a1   : > { %v5609_v2 = vperm.slane %v1394_v10, 0  ;;  %v1395_v10 = vrot.slane %v5564_v30, 7 }
 0x1a3   : > { %1444 = vperm.xlu1 %4849, %v5609_v2  }
 0x1f5   : > { %v948_v20 = vpop.f32.mrf.mxu3 }
 0x1f6   : > { %v952_v34 = vpack.c.bf16 %v948_v20, %v948_v20  ;;  %v1393_v20 = vrot.slane %v5564_v30, 5 }
 0x1f8   : > { %v968_v37 = vand.u32 %v966_v31, %v952_v34  ;;  %v5571_v31 = vperm.slane %v1393_v20, 0  ;;  %v5577_v34 = vld [vmem:[%s8357_s10 + $0x8] sm:$0xff] }
 0x1f9   : > { %v1396_v28 = vrot.slane %v5577_v34, 1  ;;  %v1397_v12 = vrot.slane %v5577_v34, 2 }
 0x1fa   : > { %977 = vmatpush.bf16.msrb.mxu1 %v968_v37  ;;  %1440 = vperm.xlu0 %4848, %v5571_v31   ;;  %v1398_v37 = vrot.slane %v5577_v34, 3 }
 0x1fb   : > { %v5623_v20 = vperm.slane %v1396_v28, 0  ;;  %v1410_v28 = vperm.slane %v1395_v10, 0  ;;  %v1413_v41 = vperm.slane %v1397_v12, 0 }
 0x1fc   : > { %v5583_v42 = vperm.slane %v1398_v37, 0 }
 0x1fd   : > { %v950_v40 = vpop.f32.mrf.mxu3  ;;  %4509 = vmatmul.msk.bf16.vlgmr.msrb.gmra.mxu1 %vm960_vm3, %v4750_v36  ;;  %1456 = vperm.xlu1 %4849, %v5623_v20  }
 0x1fe   : > { %1204 = vmatpush.bf16.msra.mxu1 %v1192_v27  ;;  %v8378_v27 = vperm.slane %v5577_v34, 0 }
 0x202   : > { %1452 = vperm.xlu0 %4848, %v8378_v27  }
 0x205   : > { %v1184_v47 = vpop.f32.mrf.mxu3 }
 0x206   : > { %1212 = vst [vmem:[#allocation1] ss:$4 sm:$0xff] %v1184_v47  ;;  %v5596_v47 = vld [vmem:[%s8360_s13] sm:$0xff] }
 0x207   : > { %8702 = vst [vmem:[#allocation24_spill] sm:$0xff] %v5596_v47  ;;  %v2038_v50 = vrot.slane %v5596_v47, 2  ;;  %v2043_v59 = vrot.slane %v5596_v47, 7 }
 0x20a   : > { %1464 = vperm.xlu0 %4848, %v5583_v42  }
 0x20d   : > { %4511 = vmatmul.msk.bf16.vlgmr.msra.gmra.mxu1 %vm826_vm0, %v1161_v44  ;;  %v1186_v56 = vpop.f32.mrf.mxu3  ;;  %v1401_v44 = vrot.slane %v5577_v34, 6 }
 0x20e   : > { %v5603_v56 = vperm.slane %v2038_v50, 0 }
 0x20f   : > { %v5591_v45 = vperm.slane %v1401_v44, 0  ;;  %v5632_v44 = vpop.permute.xlu0 %1019 }
 0x210   : > { %8703 = vst [vmem:[#allocation25_spill] sm:$0xff] %v5603_v56 }
 0x211   : > { %8707 = vst [vmem:[#allocation29_spill] sm:$0xff] %v5632_v44 }
 0x212   : > { %1476 = vperm.xlu0 %4848, %v5591_v45  }
 0x21a   : > { %2076 = vperm.xlu0 %4848, %v5603_v56  }
 0x27a   : > { %v5554_v3 = vpop.f32.mrf.mxu1 }
 0x282   : > { %v5556_v32 = vpop.f32.mrf.mxu1 }
 0x283   : > { %8701 = vst [vmem:[#allocation23_spill] sm:$0xff] %v5556_v32  ;;  %v3191_v32 = vrot.slane %v5672_v58, 6 }
 0x28a   : > { %v1206_v5 = vpop.f32.mrf.mxu1 }
 0x28b   : > { %1214 = vst [vmem:[#allocation1 + $0x1] ss:$4 sm:$0xff] %v1206_v5  ;;  %v5611_v5 = vperm.slane %v2043_v59, 0  ;;  %v5639_v59 = vpop.f32.mrf.mxu0 }
 0x28d   : > { %8704 = vst [vmem:[#allocation26_spill] sm:$0xff] %v5611_v5  ;;  %2096 = vperm.xlu0 %4848, %v5611_v5  }
 0x292   : > { %v1208_v7 = vpop.f32.mrf.mxu1  ;;  %v1215_v9 = vld.sshfl [vmem:[#allocation1] sm:$0xff pattern:$0x73625140] }
 0x293   : > { %v1217_v18 = vpack.c.bf16 %v1215_v9, %v1215_v9  ;;  %v5617_v7 = vld [vmem:[%s8360_s13 + $0x8] sm:$0xff]  ;;  %v5660_v29 = vpop.f32.mrf.mxu0 }
 0x294   : > { %8705 = vst [vmem:[#allocation27_spill] sm:$0xff] %v5617_v7  ;;  %v2045_v9 = vrot.slane %v5617_v7, 2 }
 0x295   : > { %1290 = vmatmul.bf16.vlgmr.msra.gmra.mxu3 %v1217_v18  ;;  %v1389_v18 = vrot.slane %v5564_v30, 1  ;;  %8712 = vst [vmem:[#allocation34_spill] sm:$0xff] %v5660_v29 }
 0x296   : > { %v5625_v37 = vperm.slane %v2045_v9, 0  ;;  %v1402_v9 = vrot.slane %v5577_v34, 7 }
 0x297   : > { %v1404_v33 = vperm.slane %v1389_v18, 0  ;;  %v5647_v18 = vld [vmem:[%s8363_s16] sm:$0xff] }
 0x298   : > { %8706 = vst [vmem:[#allocation28_spill] sm:$0xff] %v5625_v37  ;;  %2108 = vperm.xlu0 %4848, %v5625_v37   ;;  %v3183_v27 = vrot.slane %v5647_v18, 5 }
 0x299   : > { %1424 = vperm.xlu2 %4850, %v1404_v33   ;;  %8709 = vst [vmem:[#allocation31_spill] sm:$0xff] %v5647_v18 }
 0x29a   : > { %v5662_v10 = vperm.slane %v3183_v27, 0  ;;  %v5677_v27 = vperm.slane %v5672_v58, 0 }
 0x29b   : > { %v5674_v38 = vpop.f32.mrf.mxu0 }
 0x29c   : > { %8713 = vst [vmem:[#allocation35_spill] sm:$0xff] %v5662_v10 }
 0x29d   : > { %8716 = vst [vmem:[#allocation38_spill] sm:$0xff] %v5677_v27 }
 0x2a3   : > { %v5685_v29 = vpop.f32.mrf.mxu0 }
 0x2a4   : > { %8719 = vst [vmem:[#allocation41_spill] sm:$0xff] %v5685_v29 }
 0x318   : > { %v1291_v39 = vpop.f32.mrf.mxu3 }
 0x319   : > { %v1295_v36 = vmax.f32 %v1291_v39, 0.0  ;;  %v2048_v39 = vrot.slane %v5617_v7, 5 }
 0x31b   : > { %v1296_v40 = vpack.c.bf16 %v1295_v36, %v1295_v36  ;;  %v1392_v36 = vrot.slane %v5564_v30, 4  ;;  %v5636_v52 = vperm.slane %v2048_v39, 0  ;;  %v5651_v39 = vpop.permute.xlu0 %1023 }
 0x31c   : > { %8710 = vst [vmem:[#allocation32_spill] sm:$0xff] %v5651_v39  ;;  %v1084_v47 = vmul.f32 %v5651_v39, %v5554_v3 }
 0x31d   : > { %4552 = vmatmul.msk.bf16.vlgmr.msrb.gmra.mxu2 %vm935_vm1, %v1296_v40  ;;  %v1399_v40 = vrot.slane %v5577_v34, 4  ;;  %8708 = vst [vmem:[#allocation30_spill] sm:$0xff] %v5636_v52  ;;  %2120 = vperm.xlu0 %4848, %v5636_v52  }
 0x31f   : > { %v5634_v50 = vperm.slane %v1399_v40, 0  ;;  %v5654_v40 = vperm.slane %v5647_v18, 0  ;;  %v4766_v18 = vld [vmem:[%s8690_s15 + $0x28] sm:$0xff] }
 0x320   : > { %v1293_v43 = vpop.f32.mrf.mxu3 }
 0x321   : > { %v1407_v43 = vperm.slane %v1392_v36, 0  ;;  %1468 = vperm.xlu1 %4849, %v5634_v50   ;;  %v5649_v36 = vperm.slane %v1402_v9, 0  ;;  %8711 = vst [vmem:[#allocation33_spill] sm:$0xff] %v5654_v40  ;;  %v8382_v9 = vmov 1  }
 0x323   : > { %1436 = vperm.xlu2 %4850, %v1407_v43   ;;  %v5666_v63 = vpop.permute.xlu0 %1043 }
 0x324   : > { %8714 = vst [vmem:[#allocation36_spill] sm:$0xff] %v5666_v63 }
 0x325   : > { %3210 = vperm.xlu0 %4848, %v5654_v40   ;;  %v5691_v40 = vperm.slane %v3191_v32, 0  ;;  %v1400_v32 = vrot.slane %v5577_v34, 5 }
 0x327   : > { %8721 = vst [vmem:[#allocation43_spill] sm:$0xff] %v5691_v40  ;;  %v1416_v1 = vperm.slane %v1400_v32, 0 }
 0x329   : > { %1480 = vperm.xlu1 %4849, %v5649_v36  }
 0x32b   : > { %1448 = vperm.xlu2 %4850, %v1410_v28   ;;  %v5679_v12 = vpop.permute.xlu0 %1055 }
 0x32c   : > { %8717 = vst [vmem:[#allocation39_spill] sm:$0xff] %v5679_v12 }
 0x32d   : > { %3230 = vperm.xlu0 %4848, %v5662_v10  }
 0x331   : > { %4852 = vset.pattern.permute.xlu1 %v8382_v9 }
 0x332   : > { %1556 = vperm.xlu1 %4852, %v5567_v35   ;;  %v3188_v35 = vrot.slane %v5672_v58, 3 }
 0x333   : > { %1460 = vperm.xlu2 %4850, %v1413_v41   ;;  %v5689_v10 = vpop.permute.xlu0 %1067 }
 0x334   : > { %v5683_v9 = vperm.slane %v3188_v35, 0  ;;  %8720 = vst [vmem:[#allocation42_spill] sm:$0xff] %v5689_v10  ;;  %v8722_v35 = vmov 1  }
 0x335   : > { %3242 = vperm.xlu0 %4848, %v5677_v27  }
 0x336   : > { %8718 = vst [vmem:[#allocation40_spill] sm:$0xff] %v5683_v9 }
 0x33a   : > { %1564 = vperm.xlu1 %4852, %v1407_v43   ;;  %v5693_v43 = vpop.f32.mrf.mxu0 }
 0x33b   : > { %v5696_v27 = vpop.permute.xlu0 %1079  ;;  %1472 = vperm.xlu2 %4850, %v1416_v1  }
 0x33d   : > { %3254 = vperm.xlu0 %4848, %v5683_v9  }
 0x342   : > { %1576 = vperm.xlu1 %4852, %v1410_v28   ;;  %v5699_v28 = vpop.f32.mrf.mxu0 }
 0x343   : > { %8723 = vst [vmem:[#allocation44_spill] sm:$0xff] %v5699_v28  ;;  %v5701_v29 = vpop.permute.xlu0 %1428  ;;  %v5716_v28 = vadd.f32 %v5252_v17, %v5240_v13  ;;  %4851 = vset.pattern.permute.xlu2 %v8722_v35  ;;  %v8729_v17 = vperm.slane %v5564_v30, 0  ;;  %v1691_v30 = vpack.c.bf16 %v5243_v14, %v5243_v14 }
 0x345   : > { %3266 = vperm.xlu0 %4848, %v5691_v40   ;;  %8725 = vst [vmem:[#allocation46_spill] sm:$0xff] %v5716_v28  ;;  %v1680_v32 = vadd.f32 %v5716_v28, %v5262_v21  ;;  %1548 = vperm.xlu2 %4851, %v8729_v17  }
 0x34a   : > { %1588 = vperm.xlu1 %4852, %v1413_v41   ;;  %v5704_v9 = vpop.f32.mrf.mxu0 }
 0x34b   : > { %v5707_v41 = vpop.permute.xlu0 %1440 }
 0x34d   : > { %4863 = vset.pattern.permute.xlu0 %v8722_v35  ;;  %1560 = vperm.xlu2 %4851, %v5601_v54   ;;  %v1696_v54 = vpack.c.bf16 %v5489_v24, %v5489_v24 }
 0x34e   : > { %1552 = vperm.xlu0 %4863, %v1404_v33   ;;  %v5712_v33 = vadd.f32 %v5246_v15, %v5235_v11  ;;  %v8728_v15 = vmov 0  }
 0x350   : > { %8724 = vst [vmem:[#allocation45_spill] sm:$0xff] %v5712_v33  ;;  %v1679_v40 = vadd.f32 %v5712_v33, %v5257_v19 }
 0x352   : > { %1600 = vperm.xlu1 %4852, %v1416_v1   ;;  %v1683_v1 = vadd.f32 %v1679_v40, %v5266_v23  ;;  %v1688_v23 = vld [vmem:[%s8358_s11 + $0x2] sm:$0x3]  ;;  %v1692_v40 = vpack.c.bf16 %v5249_v16, %v5249_v16 }
 0x353   : > { %v5724_v0 = vpop.permute.xlu0 %1452 }
 0x354   : > { %8727 = vst [vmem:[#allocation48_spill] sm:$0xff] %v5724_v0  ;;  %v1693_v11 = vpack.c.bf16 %v1683_v1, %v1683_v1  ;;  %v1695_v1 = vpack.c.bf16 %v5486_v22, %v5486_v22 }
 0x355   : > { %1568 = vperm.xlu2 %4851, %v5571_v31  }
 0x356   : > { %1572 = vperm.xlu0 %4863, %v5609_v2   ;;  %v5718_v2 = vpop.f32.mrf.mxu0  ;;  %v1723_v19 = vunpack.c.l.b16 %v1693_v11  ;;  %v1702_v11 = vunpack.c.l.b16 %v1692_v40 }
 0x357   : > { %8726 = vst [vmem:[#allocation47_spill] sm:$0xff] %v5718_v2 }
 0x35a   : > { %4853 = vset.pattern.permute.xlu1 %v8728_v15 }
 0x35e   : > { %1584 = vperm.xlu0 %4863, %v5623_v20   ;;  %v1684_v20 = vadd.f32 %v1680_v32, %v5270_v25  ;;  %v5733_v28 = vpop.f32.mrf.mxu0  ;;  %v5738_v25 = vpop.permute.xlu0 %1464  ;;  %v5753_v32 = vadd.f32 %v5332_v51, %v5321_v46 }
 0x35f   : > { %8730 = vst [vmem:[#allocation49_spill] sm:$0xff] %v5738_v25 }
 0x360   : > { %v1694_v13 = vpack.c.bf16 %v1684_v20, %v1684_v20  ;;  %8733 = vst [vmem:[#allocation52_spill] sm:$0xff] %v5753_v32  ;;  %v1681_v14 = vadd.f32 %v5753_v32, %v5340_v55  ;;  %v1701_v20 = vunpack.c.l.b16 %v1691_v30 }
 0x362   : > { %v1724_v2 = vunpack.c.l.b16 %v1694_v13  ;;  %v1685_v46 = vadd.f32 %v1681_v14, %v5351_v60  ;;  %v1746_v13 = vunpack.c.l.b16 %v1696_v54  ;;  %v1703_v24 = vpack.c.b16 %v1702_v11, %v1701_v20  ;;  %v4759_v54 = vld [vmem:[%s8356_s9] sm:$0xff]  ;;  %v4760_v20 = vld [vmem:[%s8356_s9 + $0x8] sm:$0xff] }
 0x364   : > { %v1725_v21 = vpack.c.b16 %v1724_v2, %v1723_v19  ;;  %v5749_v2 = vpop.permute.xlu2 %1035  ;;  %v1697_v22 = vpack.c.bf16 %v1685_v46, %v1685_v46  ;;  %v8739_v46 = vperm.slane %v5577_v34, 0 }
 0x365   : > { %8732 = vst [vmem:[#allocation51_spill] sm:$0xff] %v5749_v2 }
 0x366   : > { %1596 = vperm.xlu0 %4863, %v5634_v50   ;;  %1737 = vmatpush.bf16.msrb.mxu3 %v1725_v21  ;;  %v5741_v50 = vpop.permute.xlu1 %1027  ;;  %v5772_v55 = vpop.permute.xlu0 %1476  ;;  %v1767_v30 = vunpack.c.l.b16 %v1697_v22 }
 0x367   : > { %8731 = vst [vmem:[#allocation50_spill] sm:$0xff] %v5741_v50  ;;  %1580 = vperm.xlu2 %4851, %v8739_v46  }
 0x368   : > { %8736 = vst [vmem:[#allocation55_spill] sm:$0xff] %v5772_v55 }
 0x369   : > { %4564 = vmatmul.msk.bf16.vlgmr.msrb.gmra.mxu3 %vm826_vm0, %v1688_v23 }
 0x36c   : > { %v5776_v40 = vpop.permute.xlu2 %1039 }
 0x36d   : > { %8738 = vst [vmem:[#allocation57_spill] sm:$0xff] %v5776_v40 }
 0x36e   : > { %1608 = vperm.xlu0 %4863, %v5649_v36   ;;  %v5757_v36 = vadd.f32 %v5336_v53, %v5325_v48  ;;  %v5769_v48 = vpop.f32.mrf.mxu0  ;;  %v1745_v53 = vunpack.c.l.b16 %v1695_v1  ;;  %v5774_v21 = vpop.permute.xlu1 %1031 }
 0x36f   : > { %8735 = vst [vmem:[#allocation54_spill] sm:$0xff] %v5769_v48  ;;  %1592 = vperm.xlu2 %4851, %v5583_v42  }
 0x370   : > { %8734 = vst [vmem:[#allocation53_spill] sm:$0xff] %v5757_v36  ;;  %v1682_v16 = vadd.f32 %v5757_v36, %v5344_v57  ;;  %v1747_v14 = vpack.c.b16 %v1746_v13, %v1745_v53  ;;  %v5790_v53 = vpop.permute.xlu0 %2076 }
 0x371   : > { %8737 = vst [vmem:[#allocation56_spill] sm:$0xff] %v5774_v21 }
 0x372   : > { %v1686_v51 = vadd.f32 %v1682_v16, %v5355_v62  ;;  %8740 = vst [vmem:[#allocation58_spill] sm:$0xff] %v5790_v53 }
 0x374   : > { %v1698_v17 = vpack.c.bf16 %v1686_v51, %v1686_v51  ;;  %v5794_v22 = vpop.permute.xlu2 %1051 }
 0x375   : > { %8742 = vst [vmem:[#allocation60_spill] sm:$0xff] %v5794_v22 }
 0x376   : > { %v1768_v60 = vunpack.c.l.b16 %v1698_v17  ;;  %v5788_v51 = vpop.f32.mrf.mxu0  ;;  %v5792_v13 = vpop.permute.xlu1 %1047 }
 0x377   : > { %8741 = vst [vmem:[#allocation59_spill] sm:$0xff] %v5792_v13  ;;  %1604 = vperm.xlu2 %4851, %v5591_v45  }
 0x378   : > { %v1769_v31 = vpack.c.b16 %v1768_v60, %v1767_v30  ;;  %v5802_v34 = vpop.permute.xlu0 %2096 }
 0x379   : > { %8744 = vst [vmem:[#allocation62_spill] sm:$0xff] %v5802_v34 }
 0x37e   : > { %v5797_v17 = vpop.f32.mrf.mxu0 }
 0x37f   : > { %8743 = vst [vmem:[#allocation61_spill] sm:$0xff] %v5797_v17  ;;  %4854 = vset.pattern.permute.xlu2 %v8728_v15 }
 0x380   : > { %v5816_v30 = vpop.permute.xlu0 %2108 }
 0x381   : > { %8747 = vst [vmem:[#allocation65_spill] sm:$0xff] %v5816_v30 }
 0x386   : > { %v5814_v42 = vpop.f32.mrf.mxu0 }
 0x3a0   : > { %v1321_v19 = vpop.f32.mrf.mxu2 }
 0x3a1   : > { %v1326_v57 = vrot.slane %v1321_v19, 2  ;;  %v1328_v23 = vpack.c.bf16 %v1321_v19, %v1321_v19  ;;  %v1687_v19 = vld [vmem:[%s8358_s11] sm:$0x3] }
 0x3a3   : > { %v1329_v62 = vpack.c.bf16 %v1326_v57, %v1326_v57  ;;  %v1344_v1 = vsel %vm964_vm2, %v1328_v23, 0  ;;  %v1689_v57 = vld [vmem:[%s8358_s11 + $0x4] sm:$0x3]  ;;  %v5809_v23 = vpop.permute.xlu2 %1063 }
 0x3a4   : > { %1353 = vmatpush.bf16.msrb.mxu1 %v1344_v1  ;;  %8746 = vst [vmem:[#allocation64_spill] sm:$0xff] %v5809_v23  ;;  %v1690_v1 = vld [vmem:[%s8358_s11 + $0x6] sm:$0x3] }
 0x3a5   : > { %v1369_v16 = vsel %vm964_vm2, %v1329_v62, 0 }
 0x3a6   : > { %1378 = vmatpush.bf16.msra.mxu2 %v1369_v16 }
 0x3a7   : > { %4557 = vmatmul.msk.bf16.vlgmr.msrb.gmra.mxu1 %vm1339_vm4, %v4759_v54  ;;  %v5826_v54 = vpop.f32.mrf.mxu0 }
 0x3a8   : > { %1715 = vmatpush.bf16.msra.mxu1 %v1703_v24  ;;  %v1323_v11 = vpop.f32.mrf.mxu2  ;;  %v5804_v24 = vpop.permute.xlu1 %1059  ;;  %8750 = vst [vmem:[#allocation68_spill] sm:$0xff] %v5826_v54 }
 0x3a9   : > { %4562 = vmatmul.msk.bf16.vlgmr.msra.gmra.mxu2 %vm1339_vm4, %v4760_v20  ;;  %8745 = vst [vmem:[#allocation63_spill] sm:$0xff] %v5804_v24 }
 0x3aa   : > { %1759 = vmatpush.bf16.msrb.mxu2 %v1747_v14  ;;  %v5831_v14 = vpop.permute.xlu0 %2120 }
 0x3ab   : > { %v5821_v62 = vpop.permute.xlu2 %1075  ;;  %8751 = vst [vmem:[#allocation69_spill] sm:$0xff] %v5831_v14 }
 0x3ac   : > { %1781 = vmatpush.bf16.msrb.mxu1 %v1769_v31  ;;  %8749 = vst [vmem:[#allocation67_spill] sm:$0xff] %v5821_v62  ;;  %v1110_v39 = vmul.f32 %v5821_v62, %v5554_v3 }
 0x3af   : > { %v5835_v16 = vpop.f32.mrf.mxu0 }
 0x3b0   : > { %v5818_v60 = vpop.permute.xlu1 %1071 }
 0x3b1   : > { %8748 = vst [vmem:[#allocation66_spill] sm:$0xff] %v5818_v60 }
 0x3b2   : > { %v5839_v11 = vpop.permute.xlu0 %3210 }
 0x3b3   : > { %v5833_v31 = vpop.permute.xlu2 %1424  ;;  %8752 = vst [vmem:[#allocation70_spill] sm:$0xff] %v5839_v11 }
 0x3b7   : > { %4563 = vmatmul.msk.bf16.vlgmr.msra.gmra.mxu1 %vm826_vm0, %v1687_v19  ;;  %v5843_v19 = vpop.f32.mrf.mxu0 }
 0x3b8   : > { %v5829_v45 = vpop.permute.xlu1 %1420  ;;  %8753 = vst [vmem:[#allocation71_spill] sm:$0xff] %v5843_v19 }
 0x3b9   : > { %4565 = vmatmul.msk.bf16.vlgmr.msrb.gmra.mxu2 %vm826_vm0, %v1689_v57 }
 0x3ba   : > { %v5847_v30 = vpop.permute.xlu0 %3230 }
 0x3bb   : > { %v5841_v46 = vpop.permute.xlu2 %1436  ;;  %8754 = vst [vmem:[#allocation72_spill] sm:$0xff] %v5847_v30 }
 0x3bf   : > { %v5851_v34 = vpop.f32.mrf.mxu0 }
 0x3c0   : > { %v5837_v20 = vpop.permute.xlu1 %1432 }
 0x3c2   : > { %v5855_v53 = vpop.permute.xlu0 %3242 }
 0x3c3   : > { %8757 = vst [vmem:[#allocation75_spill] sm:$0xff] %v5855_v53 }
 0x3c7   : > { %4566 = vmatmul.msk.bf16.vlgmr.msrb.gmra.mxu1 %vm826_vm0, %v1690_v1  ;;  %v5849_v1 = vpop.permute.xlu2 %1448  ;;  %v5859_v17 = vpop.f32.mrf.mxu0 }
 0x3c8   : > { %v5845_v57 = vpop.permute.xlu1 %1444  ;;  %8755 = vst [vmem:[#allocation73_spill] sm:$0xff] %v5849_v1 }
 0x3c9   : > { %8759 = vst [vmem:[#allocation77_spill] sm:$0xff] %v5859_v17 }
 0x3ca   : > { %v5863_v48 = vpop.permute.xlu0 %3254 }
 0x3cb   : > { %8761 = vst [vmem:[#allocation79_spill] sm:$0xff] %v5863_v48 }
 0x3cf   : > { %v5857_v54 = vpop.permute.xlu2 %1460  ;;  %v756_v36 = vpop.f32.mrf.mxu0 }
 0x3d0   : > { %v5853_v14 = vpop.permute.xlu1 %1456  ;;  %8758 = vst [vmem:[#allocation76_spill] sm:$0xff] %v5857_v54 }
 0x3d1   : > { %8756 = vst [vmem:[#allocation74_spill] sm:$0xff] %v5853_v14 }
 0x3d2   : > { %v5869_v32 = vpop.permute.xlu0 %3266 }
 0x3d3   : > { %8763 = vst [vmem:[#allocation81_spill] sm:$0xff] %v5869_v32  ;;  %v4768_v32 = vld [vmem:[%s8690_s15 + $0x38] sm:$0xff] }
 0x3d4   : > { %1867 = vmatpush.bf16.msra.mxu3 %v4768_v32  ;;  %v1082_v32 = vmul.f32 %v5632_v44, %v5554_v3  ;;  %v1096_v44 = vmul.f32 %v5792_v13, %v5554_v3  ;;  %v1106_v13 = vmul.f32 %v5689_v10, %v5554_v3 }
 0x3d7   : > { %v5865_v19 = vpop.permute.xlu2 %1472  ;;  %v5873_v33 = vpop.f32.mrf.mxu0 }
 0x3d8   : > { %v5861_v11 = vpop.permute.xlu1 %1468  ;;  %8762 = vst [vmem:[#allocation80_spill] sm:$0xff] %v5865_v19 }
 0x3d9   : > { %8760 = vst [vmem:[#allocation78_spill] sm:$0xff] %v5861_v11 }
 0x3da   : > { %8764 = vst [vmem:[#allocation82_spill] sm:$0xff] %v5873_v33  ;;  %v5877_v8 = vpop.permute.xlu0 %1552  ;;  %v4767_v33 = vld [vmem:[%s8690_s15 + $0x30] sm:$0xff] }
 0x3db   : > { %1868 = vmatpush.bf16.msra.mxu3 %v4767_v33  ;;  %v1090_v33 = vmul.f32 %v5749_v2, %v5554_v3  ;;  %v1100_v2 = vmul.f32 %v5679_v12, %v5554_v3  ;;  %v1114_v12 = vadd.f32 %v1082_v32, %v5427_v26  ;;  %v4764_v26 = vld [vmem:[%s8690_s15 + $0x18] sm:$0xff] }
 0x3dd   : > { %v1122_v10 = vadd.f32 %v1090_v33, %v5639_v59 }
 0x3df   : > { %v5871_v15 = vpop.permute.xlu2 %1548  ;;  %v761_v6 = vpop.f32.mrf.mxu0  ;;  %1869 = vmatpush.bf16.msra.mxu3 %v4766_v18  ;;  %v1108_v18 = vmul.f32 %v5818_v60, %v5554_v3 }
 0x3e0   : > { %v5867_v30 = vpop.permute.xlu1 %1480  ;;  %v1142_v59 = vadd.f32 %v1110_v39, %v761_v6  ;;  %v4763_v6 = vld [vmem:[%s8690_s15 + $0x10] sm:$0xff] }
 0x3e2   : > { %v5883_v48 = vpop.permute.xlu0 %1572 }
 0x3e3   : > { %8766 = vst [vmem:[#allocation84_spill] sm:$0xff] %v5883_v48 }
 0x3e7   : > { %v5879_v17 = vpop.permute.xlu2 %1560  ;;  %v5893_v5 = vpop.f32.mrf.mxu0 }
 0x3e8   : > { %v5875_v53 = vpop.permute.xlu1 %1556  ;;  %8768 = vst [vmem:[#allocation86_spill] sm:$0xff] %v5893_v5  ;;  %v1086_v5 = vmul.f32 %v5741_v50, %v5554_v3  ;;  %v4765_v50 = vld [vmem:[%s8690_s15 + $0x20] sm:$0xff] }
 0x3e9   : > { %1870 = vmatpush.bf16.msra.mxu3 %v4765_v50 }
 0x3ea   : > { %v5897_v58 = vpop.permute.xlu0 %1584 }
 0x3eb   : > { %8770 = vst [vmem:[#allocation88_spill] sm:$0xff] %v5897_v58  ;;  %v1088_v58 = vmul.f32 %v5774_v21, %v5554_v3  ;;  %v1098_v21 = vmul.f32 %v5794_v22, %v5554_v3  ;;  %v1112_v22 = vmul.f32 %v5696_v27, %v5554_v3 }
 0x3ec   : > { %v1739_v7 = vpop.f32.mrf.mxu3 }
 0x3ed   : > { %1793 = vst [vmem:[#allocation1 + $0x1] ss:$2 sm:$0xff] %v1739_v7  ;;  %v1094_v7 = vmul.f32 %v5666_v63, %v5554_v3  ;;  %v1104_v63 = vmul.f32 %v5809_v23, %v5554_v3  ;;  %v1120_v23 = vadd.f32 %v1088_v58, %v5475_v4  ;;  %v1132_v58 = vadd.f32 %v1100_v2, %v5788_v51 }
 0x3ee   : > { %1871 = vmatpush.bf16.msra.mxu3 %v4764_v26 }
 0x3ef   : > { %v5885_v37 = vpop.permute.xlu2 %1568  ;;  %v766_v48 = vpop.f32.mrf.mxu0  ;;  %v1126_v62 = vadd.f32 %v1094_v7, %v5693_v43  ;;  %v1136_v4 = vadd.f32 %v1104_v63, %v5835_v16 }
 0x3f0   : > { %v5881_v52 = vpop.permute.xlu1 %1564  ;;  %8767 = vst [vmem:[#allocation85_spill] sm:$0xff] %v5885_v37 }
 0x3f1   : > { %8765 = vst [vmem:[#allocation83_spill] sm:$0xff] %v5881_v52  ;;  %v1128_v52 = vadd.f32 %v1096_v44, %v5704_v9  ;;  %v1140_v44 = vadd.f32 %v1108_v18, %v756_v36  ;;  %v1144_v9 = vadd.f32 %v1112_v22, %v766_v48 }
 0x3f2   : > { %1872 = vmatpush.bf16.msra.mxu3 %v4763_v6 }
 0x3f7   : > { %v5899_v35 = vpop.permute.xlu2 %1580 }
 0x3f8   : > { %v5895_v56 = vpop.permute.xlu1 %1576  ;;  %8771 = vst [vmem:[#allocation89_spill] sm:$0xff] %v5899_v35  ;;  %v1092_v35 = vmul.f32 %v5776_v40, %v5554_v3  ;;  %v1102_v40 = vmul.f32 %v5804_v24, %v5554_v3  ;;  %v1118_v24 = vadd.f32 %v1086_v5, %v5454_v61  ;;  %v5949_v3 = vpop.permute.xlu0 %1596  ;;  %v1138_v5 = vadd.f32 %v1106_v13, %v5851_v34 }
 0x3f9   : > { %8769 = vst [vmem:[#allocation87_spill] sm:$0xff] %v5895_v56  ;;  %v1116_v56 = vadd.f32 %v1084_v47, %v5446_v49  ;;  %v1130_v49 = vadd.f32 %v1098_v21, %v5733_v28  ;;  %v1741_v47 = vpop.f32.mrf.mxu3 }
 0x3fa   : > { %v1124_v60 = vadd.f32 %v1092_v35, %v5674_v38  ;;  %8773 = vst [vmem:[#allocation91_spill] sm:$0xff] %v5949_v3  ;;  %v1134_v61 = vadd.f32 %v1102_v40, %v5814_v42 }
 0x3ff   : > { %v5958_v38 = vpop.permute.xlu2 %1592 }
 0x400   : > { %v5943_v37 = vpop.permute.xlu1 %1588  ;;  %8774 = vst [vmem:[#allocation92_spill] sm:$0xff] %v5958_v38 }
 0x401   : > { %8772 = vst [vmem:[#allocation90_spill] sm:$0xff] %v5943_v37 }
 0x424   : > { %v1355_v43 = vpop.f32.mrf.mxu1 }
 0x425   : > { %v1483_v35 = vmul.f32 %v5829_v45, %v1355_v43  ;;  %v1485_v50 = vmul.f32 %v5833_v31, %v1355_v43  ;;  %v1487_v28 = vmul.f32 %v5701_v29, %v1355_v43  ;;  %v1489_v2 = vmul.f32 %v5837_v20, %v1355_v43 }
 0x426   : > { %v1491_v21 = vmul.f32 %v5841_v46, %v1355_v43  ;;  %v1493_v63 = vmul.f32 %v5707_v41, %v1355_v43  ;;  %v1495_v40 = vmul.f32 %v5845_v57, %v1355_v43  ;;  %v1497_v51 = vmul.f32 %v5849_v1, %v1355_v43 }
 0x427   : > { %v1499_v39 = vmul.f32 %v5724_v0, %v1355_v43  ;;  %v1501_v36 = vmul.f32 %v5853_v14, %v1355_v43  ;;  %v1503_v48 = vmul.f32 %v5857_v54, %v1355_v43  ;;  %v1505_v13 = vmul.f32 %v5738_v25, %v1355_v43  ;;  %v4762_v25 = vld [vmem:[%s8690_s15 + $0x8] sm:$0xff] }
 0x428   : > { %v1507_v22 = vmul.f32 %v5861_v11, %v1355_v43  ;;  %v1509_v34 = vmul.f32 %v5865_v19, %v1355_v43  ;;  %v1511_v42 = vmul.f32 %v5772_v55, %v1355_v43  ;;  %v1513_v16 = vmul.f32 %v5867_v30, %v1355_v43  ;;  %v5983_v55 = vpop.permute.xlu1 %1600  ;;  %1873 = vmatpush.bf16.msra.mxu3 %v4762_v25 }
 0x429   : > { %v1515_v32 = vadd.f32 %v1483_v35, %v1114_v12  ;;  %v1517_v33 = vadd.f32 %v1485_v50, %v1116_v56  ;;  %v1519_v7 = vadd.f32 %v1487_v28, %v1118_v24  ;;  %v1521_v18 = vadd.f32 %v1489_v2, %v1120_v23  ;;  %v8779_v50 = vld [vmem:[#allocation87_spill] sm:$0xff]  ;;  %v4761_v2 = vld [vmem:[%s8690_s15] sm:$0xff] }
 0x42a   : > { %v1523_v26 = vadd.f32 %v1491_v21, %v1122_v10  ;;  %v1525_v47 = vadd.f32 %v1493_v63, %v1124_v60  ;;  %v1527_v0 = vadd.f32 %v1495_v40, %v1126_v62  ;;  %v1529_v14 = vadd.f32 %v1497_v51, %v1128_v52  ;;  %v5987_v60 = vpop.permute.xlu2 %1604  ;;  %v5989_v52 = vpop.permute.xlu0 %1608  ;;  %v8780_v21 = vld [vmem:[#allocation89_spill] sm:$0xff]  ;;  %v8781_v40 = vld [vmem:[#allocation88_spill] sm:$0xff] }
 0x42b   : > { %v1531_v11 = vadd.f32 %v1499_v39, %v1130_v49  ;;  %v1533_v54 = vadd.f32 %v1501_v36, %v1132_v58  ;;  %v1535_v19 = vadd.f32 %v1503_v48, %v1134_v61  ;;  %v1537_v1 = vadd.f32 %v1505_v13, %v1136_v4  ;;  %8775 = vst [vmem:[#allocation93_spill] sm:$0xff] %v5987_v60  ;;  %v8776_v4 = vld [vmem:[#allocation83_spill] sm:$0xff] }
 0x42c   : > { %v1539_v43 = vadd.f32 %v1507_v22, %v1138_v5  ;;  %v1541_v12 = vadd.f32 %v1509_v34, %v1140_v44  ;;  %v1543_v56 = vadd.f32 %v1511_v42, %v1142_v59  ;;  %v1545_v24 = vadd.f32 %v1513_v16, %v1144_v9  ;;  %v5985_v23 = vpop.f32.mrf.mxu1  ;;  %v1380_v10 = vpop.f32.mrf.mxu2  ;;  %v8777_v44 = vld [vmem:[#allocation85_spill] sm:$0xff]  ;;  %v8778_v9 = vld [vmem:[#allocation84_spill] sm:$0xff]  ;;  %1874 = vmatpush.bf16.msra.mxu3 %v4761_v2 }
 0x42d   : > { %v1611_v62 = vmul.f32 %v5871_v15, %v1380_v10  ;;  %v1613_v49 = vmul.f32 %v5877_v8, %v1380_v10  ;;  %v1615_v58 = vmul.f32 %v5875_v53, %v1380_v10  ;;  %v1617_v61 = vmul.f32 %v5879_v17, %v1380_v10 }
 0x42e   : > { %v1619_v5 = vmul.f32 %v8776_v4, %v1380_v10  ;;  %v1621_v59 = vmul.f32 %v8777_v44, %v1380_v10  ;;  %v1623_v35 = vmul.f32 %v8778_v9, %v1380_v10  ;;  %v1625_v28 = vmul.f32 %v8779_v50, %v1380_v10 }
 0x42f   : > { %v1627_v63 = vmul.f32 %v8780_v21, %v1380_v10  ;;  %v1629_v51 = vmul.f32 %v8781_v40, %v1380_v10  ;;  %v1631_v6 = vmul.f32 %v5943_v37, %v1380_v10  ;;  %v1633_v39 = vmul.f32 %v5958_v38, %v1380_v10 }
 0x430   : > { %v1635_v36 = vmul.f32 %v5949_v3, %v1380_v10  ;;  %v1637_v48 = vmul.f32 %v5983_v55, %v1380_v10  ;;  %v1639_v13 = vmul.f32 %v5987_v60, %v1380_v10  ;;  %v1641_v25 = vmul.f32 %v5989_v52, %v1380_v10 }
 0x431   : > { %v6010_v22 = vadd.f32 %v1611_v62, %v1515_v32  ;;  %v6012_v34 = vadd.f32 %v1613_v49, %v1517_v33  ;;  %v6014_v42 = vadd.f32 %v1615_v58, %v1519_v7  ;;  %v6016_v16 = vadd.f32 %v1617_v61, %v1521_v18 }
 0x432   : > { %v6018_v40 = vadd.f32 %v1619_v5, %v1523_v26  ;;  %v6020_v37 = vadd.f32 %v1621_v59, %v1525_v47  ;;  %v6022_v38 = vadd.f32 %v1623_v35, %v1527_v0  ;;  %v6024_v3 = vadd.f32 %v1625_v28, %v1529_v14  ;;  %v4738_v59 = vld [vmem:[%s8693_s3 + $0x20] sm:$0xff] }
 0x433   : > { %8782 = vst [vmem:[#allocation83_spill] sm:$0xff] %v6010_v22  ;;  %v6026_v60 = vadd.f32 %v1627_v63, %v1531_v11  ;;  %v6028_v10 = vadd.f32 %v1629_v51, %v1533_v54  ;;  %v6030_v32 = vadd.f32 %v1631_v6, %v1535_v19  ;;  %v6032_v33 = vadd.f32 %v1633_v39, %v1537_v1  ;;  %v8799_v6 = vld [vmem:[#allocation27_spill] sm:$0xff] }
 0x434   : > { %8783 = vst [vmem:[#allocation85_spill] sm:$0xff] %v6012_v34  ;;  %v6034_v7 = vadd.f32 %v1635_v36, %v1539_v43  ;;  %v6036_v18 = vadd.f32 %v1637_v48, %v1541_v12  ;;  %v6038_v26 = vadd.f32 %v1639_v13, %v1543_v56  ;;  %v6040_v47 = vadd.f32 %v1641_v25, %v1545_v24  ;;  %v6042_v0 = vpop.f32.mrf.mxu2  ;;  %v1717_v14 = vpop.f32.mrf.mxu1  ;;  %v8798_v12 = vld [vmem:[#allocation24_spill] sm:$0xff]  ;;  %v4739_v24 = vld [vmem:[%s8693_s3 + $0x28] sm:$0xff] }
 0x435   : > { %8784 = vst [vmem:[#allocation84_spill] sm:$0xff] %v6014_v42  ;;  %v6045_v56 = vperm.slane %v8798_v12, 0  ;;  %1905 = vmatpush.bf16.msra.mxu2 %v4739_v24  ;;  %v2039_v61 = vrot.slane %v8798_v12, 3  ;;  %v2041_v5 = vrot.slane %v8798_v12, 5  ;;  %v2037_v2 = vrot.slane %v8798_v12, 1 }
 0x436   : > { %8785 = vst [vmem:[#allocation87_spill] sm:$0xff] %v6016_v16  ;;  %v2040_v51 = vrot.slane %v8798_v12, 4  ;;  %v6069_v39 = vperm.slane %v8799_v6, 0  ;;  %v2046_v48 = vrot.slane %v8799_v6, 3  ;;  %v2042_v13 = vrot.slane %v8798_v12, 6 }
 0x437   : > { %8786 = vst [vmem:[#allocation89_spill] sm:$0xff] %v6018_v40  ;;  %2068 = vperm.xlu1 %4853, %v6045_v56   ;;  %2196 = vperm.xlu0 %4863, %v6045_v56   ;;  %v6057_v35 = vperm.slane %v2039_v61, 0  ;;  %v6059_v28 = vperm.slane %v2041_v5, 0  ;;  %v6064_v63 = vperm.slane %v2037_v2, 0  ;;  %v2047_v61 = vrot.slane %v8799_v6, 4 }
 0x438   : > { %8787 = vst [vmem:[#allocation94_spill] sm:$0xff] %v6020_v37  ;;  %v6071_v36 = vperm.slane %v2040_v51, 0  ;;  %v6078_v25 = vperm.slane %v2046_v48, 0  ;;  %v2050_v48 = vrot.slane %v8799_v6, 7 }
 0x439   : > { %8788 = vst [vmem:[#allocation95_spill] sm:$0xff] %v6022_v38  ;;  %1906 = vmatpush.bf16.msra.mxu2 %v4738_v59  ;;  %2072 = vperm.xlu2 %4854, %v6064_v63   ;;  %v6099_v2 = vperm.slane %v2047_v61, 0  ;;  %v4892_v38 = vld [vmem:[%s5194_s29 + $0x38] sm:$0xff] }
 0x43a   : > { %8789 = vst [vmem:[#allocation96_spill] sm:$0xff] %v6024_v3 }
 0x43b   : > { %8790 = vst [vmem:[#allocation97_spill] sm:$0xff] %v6026_v60  ;;  %v4890_v60 = vld [vmem:[%s5194_s29 + $0x30] sm:$0xff] }
 0x43c   : > { %8791 = vst [vmem:[#allocation98_spill] sm:$0xff] %v6028_v10  ;;  %v1719_v11 = vpop.f32.mrf.mxu1  ;;  %v1761_v62 = vpop.f32.mrf.mxu2 }
 0x43d   : > { %8792 = vst [vmem:[#allocation99_spill] sm:$0xff] %v6030_v32  ;;  %v2049_v11 = vrot.slane %v8799_v6, 6  ;;  %v8830_v32 = vld [vmem:[#allocation16_spill] sm:$0xff] }
 0x43e   : > { %8793 = vst [vmem:[#allocation100_spill] sm:$0xff] %v6032_v33  ;;  %v2596_v10 = vpack.c.bf16 %v8830_v32, %v8830_v32 }
 0x43f   : > { %8794 = vst [vmem:[#allocation101_spill] sm:$0xff] %v6034_v7  ;;  %2080 = vperm.xlu1 %4853, %v6057_v35   ;;  %2216 = vperm.xlu0 %4863, %v6059_v28  }
 0x440   : > { %8795 = vst [vmem:[#allocation102_spill] sm:$0xff] %v6036_v18 }
 0x441   : > { %8796 = vst [vmem:[#allocation103_spill] sm:$0xff] %v6038_v26  ;;  %2084 = vperm.xlu2 %4854, %v6071_v36  }
 0x442   : > { %8797 = vst [vmem:[#allocation104_spill] sm:$0xff] %v6040_v47 }
 0x443   : > { %1791 = vst [vmem:[#allocation1] ss:$2 sm:$0xff] %v1717_v14  ;;  %v6080_v14 = vperm.slane %v2042_v13, 0 }
 0x444   : > { %1795 = vst [vmem:[#allocation1 + $0x10] ss:$2 sm:$0xff] %v1761_v62  ;;  %v1763_v54 = vpop.f32.mrf.mxu2  ;;  %v1783_v19 = vpop.f32.mrf.mxu1 }
 0x445   : > { %1797 = vst [vmem:[#allocation1 + $0x11] ss:$2 sm:$0xff] %v1783_v19  ;;  %v2044_v54 = vrot.slane %v8799_v6, 1  ;;  %v6087_v19 = vperm.slane %v2049_v11, 0  ;;  %v6108_v11 = vperm.slane %v2050_v48, 0  ;;  %v8466_v48 = vmov 2  }
 0x447   : > { %2088 = vperm.xlu1 %4853, %v6059_v28   ;;  %2228 = vperm.xlu0 %4863, %v6069_v39  }
 0x449   : > { %2092 = vperm.xlu2 %4854, %v6080_v14  }
 0x44a   : > { %v1798_v49 = vld.sshfl [vmem:[#allocation1] sm:$0xff pattern:$0x75316420] }
 0x44c   : > { %v1785_v1 = vpop.f32.mrf.mxu1  ;;  %v1799_v43 = vld.sshfl [vmem:[#allocation1 + $0x10] sm:$0xff pattern:$0x75316420] }
 0x44d   : > { %v1802_v58 = vpack.c.bf16 %v1799_v43, %v1798_v49  ;;  %v6089_v1 = vperm.slane %v2044_v54, 0  ;;  %v8800_v49 = vld [vmem:[#allocation31_spill] sm:$0xff]  ;;  %v8804_v54 = vld [vmem:[#allocation37_spill] sm:$0xff] }
 0x44e   : > { %v3179_v43 = vrot.slane %v8800_v49, 1  ;;  %v3184_v51 = vrot.slane %v8800_v49, 6  ;;  %v3189_v6 = vrot.slane %v8804_v54, 4  ;;  %v3192_v61 = vrot.slane %v8804_v54, 7 }
 0x44f   : > { %1875 = vmatmul.bf16.vlgmr.msra.gmra.mxu3 %v1802_v58  ;;  %2100 = vperm.xlu1 %4853, %v6069_v39   ;;  %v3190_v18 = vrot.slane %v8804_v54, 5 }
 0x450   : > { %2240 = vperm.xlu0 %4863, %v6078_v25   ;;  %v6096_v59 = vperm.slane %v3179_v43, 0  ;;  %v6106_v13 = vperm.slane %v3184_v51, 0  ;;  %v3186_v43 = vrot.slane %v8804_v54, 1  ;;  %v8809_v51 = vld [vmem:[#allocation26_spill] sm:$0xff] }
 0x451   : > { %2104 = vperm.xlu2 %4854, %v6089_v1   ;;  %v6189_v33 = vperm.slane %v3190_v18, 0 }
 0x452   : > { %8801 = vst [vmem:[#allocation24_spill] sm:$0xff] %v6096_v59 }
 0x453   : > { %8802 = vst [vmem:[#allocation27_spill] sm:$0xff] %v6106_v13 }
 0x454   : > { %8822 = vst [vmem:[#allocation112_spill] sm:$0xff] %v6189_v33 }
 0x457   : > { %2112 = vperm.xlu1 %4853, %v6078_v25  }
 0x458   : > { %2252 = vperm.xlu0 %4863, %v6087_v19  }
 0x459   : > { %2116 = vperm.xlu2 %4854, %v6099_v2  }
 0x45f   : > { %2124 = vperm.xlu1 %4853, %v6087_v19  }
 0x460   : > { %3342 = vperm.xlu0 %4863, %v6096_v59  }
 0x461   : > { %2128 = vperm.xlu2 %4854, %v6108_v11  }
 0x468   : > { %3362 = vperm.xlu0 %4863, %v6106_v13  }
 0x4d2   : > { %v1876_v62 = vpop.f32.mrf.mxu3 }
 0x4d3   : > { %v1881_v12 = vmax.f32 %v1876_v62, 0.0  ;;  %v8803_v62 = vmov 1  }
 0x4d4   : > { %4855 = vset.pattern.permute.xlu1 %v8803_v62  ;;  %4856 = vset.pattern.permute.xlu2 %v8803_v62 }
 0x4d5   : > { %2200 = vperm.xlu1 %4855, %v6064_v63  }
 0x4da   : > { %v1878_v58 = vpop.f32.mrf.mxu3 }
 0x4db   : > { %v1882_v24 = vmax.f32 %v1878_v58, 0.0  ;;  %v6115_v58 = vperm.slane %v3186_v43, 0  ;;  %v8810_v43 = vld [vmem:[#allocation28_spill] sm:$0xff] }
 0x4dd   : > { %v1883_v5 = vpack.c.bf16 %v1882_v24, %v1881_v12  ;;  %8805 = vst [vmem:[#allocation31_spill] sm:$0xff] %v6115_v58  ;;  %3374 = vperm.xlu0 %4863, %v6115_v58   ;;  %2208 = vperm.xlu1 %4855, %v6057_v35   ;;  %v8806_v12 = vld [vmem:[#allocation25_spill] sm:$0xff]  ;;  %v6122_v24 = vperm.slane %v3189_v6, 0  ;;  %v8811_v6 = vld [vmem:[#allocation30_spill] sm:$0xff]  ;;  %v6160_v58 = vpop.permute.xlu0 %2196 }
 0x4de   : > { %2204 = vperm.xlu2 %4856, %v8806_v12   ;;  %8813 = vst [vmem:[#allocation28_spill] sm:$0xff] %v6160_v58 }
 0x4df   : > { %4607 = vmatmul.msk.bf16.vlgmr.msra.gmra.mxu2 %vm935_vm1, %v1883_v5  ;;  %8807 = vst [vmem:[#allocation37_spill] sm:$0xff] %v6122_v24  ;;  %v6128_v5 = vperm.slane %v3192_v61, 0  ;;  %v3180_v61 = vrot.slane %v8800_v49, 2 }
 0x4e1   : > { %8808 = vst [vmem:[#allocation25_spill] sm:$0xff] %v6128_v5  ;;  %v6152_v62 = vperm.slane %v3180_v61, 0  ;;  %v3187_v61 = vrot.slane %v8804_v54, 2 }
 0x4e3   : > { %8812 = vst [vmem:[#allocation26_spill] sm:$0xff] %v6152_v62  ;;  %v6176_v58 = vperm.slane %v3187_v61, 0 }
 0x4e5   : > { %3386 = vperm.xlu0 %4863, %v6122_v24   ;;  %2220 = vperm.xlu1 %4855, %v6080_v14   ;;  %v6158_v24 = vpop.permute.xlu1 %2068  ;;  %8818 = vst [vmem:[#allocation108_spill] sm:$0xff] %v6176_v58 }
 0x4e6   : > { %2212 = vperm.xlu2 %4856, %v6071_v36  }
 0x4ed   : > { %3398 = vperm.xlu0 %4863, %v6128_v5   ;;  %2232 = vperm.xlu1 %4855, %v6089_v1   ;;  %v6154_v5 = vpop.permute.xlu2 %2072  ;;  %v6171_v26 = vpop.permute.xlu1 %2080 }
 0x4ee   : > { %2224 = vperm.xlu2 %4856, %v8809_v51   ;;  %8816 = vst [vmem:[#allocation106_spill] sm:$0xff] %v6171_v26 }
 0x4f5   : > { %4866 = vset.pattern.permute.xlu0 %v8466_v48  ;;  %2244 = vperm.xlu1 %4855, %v6099_v2   ;;  %v6168_v47 = vpop.permute.xlu2 %2084  ;;  %v6185_v7 = vpop.permute.xlu1 %2088 }
 0x4f6   : > { %2328 = vperm.xlu0 %4866, %v6064_v63   ;;  %2236 = vperm.xlu2 %4856, %v8810_v43   ;;  %8815 = vst [vmem:[#allocation105_spill] sm:$0xff] %v6168_v47 }
 0x4f7   : > { %8820 = vst [vmem:[#allocation110_spill] sm:$0xff] %v6185_v7 }
 0x4fd   : > { %2256 = vperm.xlu1 %4855, %v6108_v11   ;;  %v6197_v54 = vpop.permute.xlu1 %2100 }
 0x4fe   : > { %2348 = vperm.xlu0 %4866, %v6080_v14   ;;  %2248 = vperm.xlu2 %4856, %v8811_v6   ;;  %8824 = vst [vmem:[#allocation114_spill] sm:$0xff] %v6197_v54 }
 0x505   : > { %4858 = vset.pattern.permute.xlu1 %v8466_v48 }
 0x506   : > { %2360 = vperm.xlu0 %4866, %v6089_v1   ;;  %2332 = vperm.xlu1 %4858, %v8806_v12  }
 0x507   : > { %4857 = vset.pattern.permute.xlu2 %v8466_v48  ;;  %v3185_v48 = vrot.slane %v8800_v49, 7  ;;  %v6173_v49 = vpop.permute.xlu0 %2216 }
 0x508   : > { %2324 = vperm.xlu2 %4857, %v6045_v56   ;;  %8817 = vst [vmem:[#allocation107_spill] sm:$0xff] %v6173_v49 }
 0x509   : > { %v6164_v13 = vperm.slane %v3185_v48, 0  ;;  %v8478_v48 = vmov 3  }
 0x50b   : > { %8814 = vst [vmem:[#allocation30_spill] sm:$0xff] %v6164_v13 }
 0x50e   : > { %2372 = vperm.xlu0 %4866, %v6099_v2   ;;  %2340 = vperm.xlu1 %4858, %v6071_v36  }
 0x50f   : > { %v6187_v49 = vpop.permute.xlu0 %2228 }
 0x510   : > { %2336 = vperm.xlu2 %4857, %v6057_v35   ;;  %8821 = vst [vmem:[#allocation111_spill] sm:$0xff] %v6187_v49 }
 0x516   : > { %2384 = vperm.xlu0 %4866, %v6108_v11   ;;  %2352 = vperm.xlu1 %4858, %v8809_v51  }
 0x517   : > { %v6199_v61 = vpop.permute.xlu0 %2240 }
 0x518   : > { %2344 = vperm.xlu2 %4857, %v6059_v28   ;;  %8825 = vst [vmem:[#allocation115_spill] sm:$0xff] %v6199_v61 }
 0x51e   : > { %3474 = vperm.xlu0 %4866, %v6152_v62   ;;  %2364 = vperm.xlu1 %4858, %v8810_v43  }
 0x520   : > { %2356 = vperm.xlu2 %4857, %v6069_v39  }
 0x526   : > { %3494 = vperm.xlu0 %4866, %v6164_v13   ;;  %2376 = vperm.xlu1 %4858, %v8811_v6   ;;  %v6181_v13 = vpop.permute.xlu2 %2092 }
 0x527   : > { %8819 = vst [vmem:[#allocation109_spill] sm:$0xff] %v6181_v13 }
 0x528   : > { %2368 = vperm.xlu2 %4857, %v6078_v25  }
 0x52e   : > { %3506 = vperm.xlu0 %4866, %v6176_v58   ;;  %4859 = vset.pattern.permute.xlu1 %v8478_v48  ;;  %v4888_v58 = vld [vmem:[%s5194_s29 + $0x78] sm:$0xff] }
 0x52f   : > { %2452 = vperm.xlu1 %4859, %v6045_v56   ;;  %v6195_v56 = vpop.permute.xlu2 %2104 }
 0x530   : > { %2380 = vperm.xlu2 %4857, %v6087_v19   ;;  %8823 = vst [vmem:[#allocation113_spill] sm:$0xff] %v6195_v56 }
 0x536   : > { %3518 = vperm.xlu0 %4866, %v6189_v33  }
 0x537   : > { %2464 = vperm.xlu1 %4859, %v6057_v35   ;;  %v6205_v18 = vpop.permute.xlu2 %2116  ;;  %v6207_v35 = vpop.permute.xlu1 %2112 }
 0x538   : > { %4860 = vset.pattern.permute.xlu2 %v8478_v48  ;;  %8826 = vst [vmem:[#allocation116_spill] sm:$0xff] %v6205_v18  ;;  %v8902_v18 = vld [vmem:[#allocation41_spill] sm:$0xff] }
 0x539   : > { %2456 = vperm.xlu2 %4860, %v6064_v63   ;;  %8827 = vst [vmem:[#allocation117_spill] sm:$0xff] %v6207_v35  ;;  %v6209_v63 = vpop.permute.xlu0 %2252  ;;  %v8903_v35 = vld [vmem:[#allocation44_spill] sm:$0xff] }
 0x53a   : > { %8828 = vst [vmem:[#allocation118_spill] sm:$0xff] %v6209_v63  ;;  %v4889_v63 = vld [vmem:[%s5194_s29 + $0x20] sm:$0xff] }
 0x53b   : > { %v2579_v3 = vadd.f32 %v4890_v60, %v4889_v63  ;;  %v8832_v60 = vld [vmem:[#allocation45_spill] sm:$0xff] }
 0x53c   : > { %v2599_v32 = vpack.c.bf16 %v8832_v60, %v8832_v60  ;;  %v4894_v60 = vld [vmem:[%s5194_s29 + $0xb0] sm:$0xff] }
 0x53e   : > { %4869 = vset.pattern.permute.xlu0 %v8478_v48  ;;  %v4885_v48 = vld [vmem:[%s5194_s29 + $0x60] sm:$0xff] }
 0x53f   : > { %2460 = vperm.xlu0 %4869, %v8806_v12   ;;  %2472 = vperm.xlu1 %4859, %v6059_v28   ;;  %v4886_v12 = vld [vmem:[%s5194_s29 + $0x70] sm:$0xff]  ;;  %v4887_v28 = vld [vmem:[%s5194_s29 + $0x68] sm:$0xff]  ;;  %v6226_v34 = vpop.permute.xlu2 %2128 }
 0x540   : > { %v2581_v33 = vadd.f32 %v4886_v12, %v4885_v48  ;;  %v2582_v61 = vadd.f32 %v4888_v58, %v4887_v28  ;;  %v2614_v12 = vunpack.c.l.b16 %v2596_v10  ;;  %v2597_v58 = vpack.c.bf16 %v2579_v3, %v2579_v3 }
 0x541   : > { %2468 = vperm.xlu2 %4860, %v6071_v36   ;;  %v8829_v36 = vld [vmem:[#allocation15_spill] sm:$0xff] }
 0x542   : > { %v2595_v49 = vpack.c.bf16 %v8829_v36, %v8829_v36  ;;  %v2601_v37 = vpack.c.bf16 %v2581_v33, %v2581_v33  ;;  %v2602_v40 = vpack.c.bf16 %v2582_v61, %v2582_v61  ;;  %8831 = vst [vmem:[#allocation15_spill] sm:$0xff] %v6226_v34  ;;  %v6238_v61 = vpop.permute.xlu1 %2124  ;;  %v2635_v63 = vunpack.c.l.b16 %v2597_v58 }
 0x543   : > { %8834 = vst [vmem:[#allocation16_spill] sm:$0xff] %v6238_v61 }
 0x544   : > { %v2613_v48 = vunpack.c.l.b16 %v2595_v49  ;;  %v2680_v10 = vunpack.c.l.b16 %v2602_v40  ;;  %v4770_v40 = vld [vmem:[%s8359_s12 + $0x8] sm:$0xff] }
 0x547   : > { %2480 = vperm.xlu0 %4869, %v8809_v51   ;;  %2484 = vperm.xlu1 %4859, %v6069_v39   ;;  %v4891_v51 = vld [vmem:[%s5194_s29 + $0x28] sm:$0xff] }
 0x548   : > { %v2580_v39 = vadd.f32 %v4892_v38, %v4891_v51  ;;  %v8833_v38 = vld [vmem:[#allocation46_spill] sm:$0xff] }
 0x549   : > { %2476 = vperm.xlu2 %4860, %v6080_v14   ;;  %v2600_v33 = vpack.c.bf16 %v8833_v38, %v8833_v38  ;;  %v2679_v14 = vunpack.c.l.b16 %v2601_v37 }
 0x54a   : > { %v2598_v28 = vpack.c.bf16 %v2580_v39, %v2580_v39 }
 0x54b   : > { %v2658_v39 = vunpack.c.l.b16 %v2600_v33 }
 0x54c   : > { %v2636_v51 = vunpack.c.l.b16 %v2598_v28 }
 0x54e   : > { %v2637_v58 = vpack.c.b16 %v2636_v51, %v2635_v63  ;;  %v4772_v63 = vld [vmem:[%s8359_s12 + $0x18] sm:$0xff]  ;;  %v6263_v51 = vpop.permute.xlu1 %2200 }
 0x54f   : > { %2492 = vperm.xlu0 %4869, %v8810_v43   ;;  %2496 = vperm.xlu1 %4859, %v6078_v25   ;;  %v6240_v43 = vpop.permute.xlu0 %3342  ;;  %v2615_v25 = vpack.c.b16 %v2614_v12, %v2613_v48  ;;  %v2681_v48 = vpack.c.b16 %v2680_v10, %v2679_v14  ;;  %v6256_v10 = vpop.permute.xlu2 %2204  ;;  %8837 = vst [vmem:[#allocation119_spill] sm:$0xff] %v6263_v51 }
 0x550   : > { %8835 = vst [vmem:[#allocation45_spill] sm:$0xff] %v6240_v43 }
 0x551   : > { %2488 = vperm.xlu2 %4860, %v6089_v1   ;;  %8836 = vst [vmem:[#allocation46_spill] sm:$0xff] %v6256_v10  ;;  %v8899_v10 = vld [vmem:[#allocation19_spill] sm:$0xff] }
 0x557   : > { %2504 = vperm.xlu0 %4869, %v8811_v6   ;;  %2508 = vperm.xlu1 %4859, %v6087_v19   ;;  %v6265_v19 = vpop.permute.xlu0 %3362 }
 0x558   : > { %8838 = vst [vmem:[#allocation120_spill] sm:$0xff] %v6265_v19 }
 0x559   : > { %2500 = vperm.xlu2 %4860, %v6099_v2  }
 0x561   : > { %2512 = vperm.xlu2 %4860, %v6108_v11  }
 0x562   : > { %v1908_v16 = vpop.f32.mrf.mxu2 }
 0x563   : > { %v1915_v36 = vrot.slane %v1908_v16, 4  ;;  %v1919_v42 = vpack.c.bf16 %v1908_v16, %v1908_v16  ;;  %v4769_v16 = vld [vmem:[%s8359_s12] sm:$0xff] }
 0x565   : > { %v1920_v49 = vpack.c.bf16 %v1915_v36, %v1915_v36  ;;  %v1942_v3 = vsel %vm1940_vm5, %v1919_v42, 0  ;;  %v2657_v42 = vunpack.c.l.b16 %v2599_v32  ;;  %v4893_v36 = vld [vmem:[%s5194_s29 + $0xa0] sm:$0xff] }
 0x566   : > { %1951 = vmatpush.bf16.msra.mxu1 %v1942_v3  ;;  %v2583_v38 = vadd.f32 %v4894_v60, %v4893_v36  ;;  %v4896_v3 = vld [vmem:[%s5194_s29 + $0xb8] sm:$0xff]  ;;  %v8842_v36 = vmov 0  }
 0x567   : > { %v1967_v37 = vsel %vm1940_vm5, %v1920_v49, 0  ;;  %v4895_v49 = vld [vmem:[%s5194_s29 + $0xa8] sm:$0xff]  ;;  %v2659_v32 = vpack.c.b16 %v2658_v39, %v2657_v42  ;;  %4861 = vset.pattern.permute.xlu1 %v8842_v36 }
 0x568   : > { %1976 = vmatpush.bf16.msrb.mxu2 %v1967_v37  ;;  %v2584_v37 = vadd.f32 %v4896_v3, %v4895_v49  ;;  %3214 = vperm.xlu1 %4861, %v6096_v59   ;;  %v6279_v49 = vpop.permute.xlu2 %2212 }
 0x569   : > { %4612 = vmatmul.msk.bf16.vlgmr.msra.gmra.mxu1 %vm1936_vm6, %v4769_v16  ;;  %v2605_v16 = vpack.c.bf16 %v2583_v38, %v2583_v38  ;;  %4862 = vset.pattern.permute.xlu2 %v8842_v36  ;;  %v2588_v36 = vld [vmem:[%s8845_s20 + $0x4] sm:$0xf] }
 0x56a   : > { %v1910_v12 = vpop.f32.mrf.mxu2  ;;  %3218 = vperm.xlu2 %4862, %v6152_v62   ;;  %v8878_v62 = vld [vmem:[#allocation23_spill] sm:$0xff] }
 0x56b   : > { %v1916_v28 = vrot.slane %v1910_v12, 4  ;;  %v1921_v1 = vpack.c.bf16 %v1910_v12, %v1910_v12  ;;  %4617 = vmatmul.msk.bf16.vlgmr.msrb.gmra.mxu2 %vm1936_vm6, %v4770_v40  ;;  %v2723_v40 = vunpack.c.l.b16 %v2605_v16  ;;  %v8840_v12 = vld [vmem:[#allocation21_spill] sm:$0xff] }
 0x56c   : > { %2627 = vmatpush.bf16.msra.mxu2 %v2615_v25  ;;  %v2606_v25 = vpack.c.bf16 %v2584_v37, %v2584_v37  ;;  %v2587_v37 = vld [vmem:[%s8844_s26] sm:$0xf] }
 0x56d   : > { %v1922_v33 = vpack.c.bf16 %v1916_v28, %v1916_v28  ;;  %v1992_v14 = vsel %vm1940_vm5, %v1921_v1, 0  ;;  %v2604_v28 = vpack.c.bf16 %v8840_v12, %v8840_v12  ;;  %v8841_v1 = vld [vmem:[#allocation33_spill] sm:$0xff] }
 0x56e   : > { %2001 = vmatpush.bf16.msrb.mxu1 %v1992_v14  ;;  %v2724_v42 = vunpack.c.l.b16 %v2606_v25  ;;  %3594 = vperm.xlu0 %4869, %v8841_v1   ;;  %v8848_v14 = vld [vmem:[#allocation52_spill] sm:$0xff]  ;;  %v8849_v25 = vld [vmem:[#allocation53_spill] sm:$0xff] }
 0x56f   : > { %v2017_v6 = vsel %vm1940_vm5, %v1922_v33, 0  ;;  %v2702_v38 = vunpack.c.l.b16 %v2604_v28  ;;  %v6287_v33 = vpop.permute.xlu0 %3374  ;;  %v2607_v16 = vpack.c.bf16 %v8848_v14, %v8848_v14  ;;  %v2608_v11 = vpack.c.bf16 %v8849_v25, %v8849_v25  ;;  %v8850_v28 = vld [vmem:[#allocation35_spill] sm:$0xff]  ;;  %v8879_v1 = vld [vmem:[#allocation29_spill] sm:$0xff] }
 0x570   : > { %2693 = vmatpush.bf16.msrb.mxu2 %v2681_v48  ;;  %2026 = vmatpush.bf16.msrb.mxu3 %v2017_v6  ;;  %v2725_v39 = vpack.c.b16 %v2724_v42, %v2723_v40  ;;  %v8839_v48 = vld [vmem:[#allocation20_spill] sm:$0xff]  ;;  %8847 = vst [vmem:[#allocation121_spill] sm:$0xff] %v6287_v33  ;;  %v4897_v40 = vld [vmem:[%s5194_s29 + $0xe0] sm:$0xff]  ;;  %v4898_v42 = vld [vmem:[%s5194_s29 + $0xf0] sm:$0xff] }
 0x571   : > { %v2603_v2 = vpack.c.bf16 %v8839_v48, %v8839_v48  ;;  %8843 = vst [vmem:[#allocation20_spill] sm:$0xff] %v6279_v49  ;;  %v2745_v6 = vunpack.c.l.b16 %v2607_v16  ;;  %v4899_v48 = vld [vmem:[%s5194_s29 + $0xe8] sm:$0xff] }
 0x572   : > { %2649 = vmatpush.bf16.msra.mxu1 %v2637_v58  ;;  %v4771_v58 = vld [vmem:[%s8359_s12 + $0x10] sm:$0xff] }
 0x573   : > { %4627 = vmatmul.msk.bf16.vlgmr.msrb.gmra.mxu3 %vm1936_vm6, %v4772_v63  ;;  %v2701_v60 = vunpack.c.l.b16 %v2603_v2  ;;  %v2746_v63 = vunpack.c.l.b16 %v2608_v11  ;;  %v4900_v2 = vld [vmem:[%s5194_s29 + $0xf8] sm:$0xff]  ;;  %s9150_s29 = sld [smem:[#allocation152_spill]] }
 0x574   : > { %2671 = vmatpush.bf16.msra.mxu3 %v2659_v32  ;;  %v6285_v32 = vpop.permute.xlu1 %2208  ;;  %v2586_v12 = vadd.f32 %v4900_v2, %v4899_v48 }
 0x575   : > { %v2703_v3 = vpack.c.b16 %v2702_v38, %v2701_v60  ;;  %8846 = vst [vmem:[#allocation21_spill] sm:$0xff] %v6285_v32  ;;  %v8898_v32 = vld [vmem:[#allocation18_spill] sm:$0xff] }
 0x576   : > { %3614 = vperm.xlu0 %4869, %v8850_v28   ;;  %v2610_v38 = vpack.c.bf16 %v2586_v12, %v2586_v12  ;;  %v2592_v12 = vld [vmem:[%s8845_s20 + $0x14] sm:$0xf]  ;;  %v4780_v28 = vld [vmem:[%s8690_s15 + $0x38] sm:$0xff] }
 0x577   : > { %v6308_v11 = vpop.permute.xlu0 %3386 }
 0x578   : > { %2737 = vmatpush.bf16.msrb.mxu3 %v2725_v39  ;;  %v2585_v39 = vadd.f32 %v4898_v42, %v4897_v40  ;;  %v2768_v16 = vunpack.c.l.b16 %v2610_v38  ;;  %8853 = vst [vmem:[#allocation122_spill] sm:$0xff] %v6308_v11  ;;  %v2590_v40 = vld [vmem:[%s8845_s20 + $0xc] sm:$0xf]  ;;  %v2591_v38 = vld [vmem:[%s8845_s20 + $0x10] sm:$0xf] }
 0x579   : > { %4622 = vmatmul.msk.bf16.vlgmr.msrb.gmra.mxu1 %vm1936_vm6, %v4771_v58  ;;  %v2747_v58 = vpack.c.b16 %v2746_v63, %v2745_v6  ;;  %v8854_v6 = vld [vmem:[#allocation38_spill] sm:$0xff] }
 0x57a   : > { %2715 = vmatpush.bf16.msrb.mxu1 %v2703_v3  ;;  %v2609_v60 = vpack.c.bf16 %v2585_v39, %v2585_v39  ;;  %v2589_v3 = vld [vmem:[%s8845_s20 + $0x8] sm:$0xf]  ;;  %v8856_v39 = vld [vmem:[#allocation40_spill] sm:$0xff] }
 0x57b   : > { %4628 = vmatmul.msk.bf16.vlgmr.msra.gmra.mxu2 %vm826_vm0, %v2587_v37  ;;  %v6304_v37 = vpop.permute.xlu2 %2224 }
 0x57c   : > { %2759 = vmatpush.bf16.msra.mxu2 %v2747_v58  ;;  %8851 = vst [vmem:[#allocation52_spill] sm:$0xff] %v6304_v37  ;;  %v2767_v14 = vunpack.c.l.b16 %v2609_v60  ;;  %v6306_v25 = vpop.permute.xlu1 %2220  ;;  %v8859_v58 = vld [vmem:[#allocation43_spill] sm:$0xff] }
 0x57d   : > { %8852 = vst [vmem:[#allocation53_spill] sm:$0xff] %v6306_v25 }
 0x57e   : > { %3626 = vperm.xlu0 %4869, %v8854_v6   ;;  %v2769_v63 = vpack.c.b16 %v2768_v16, %v2767_v14  ;;  %v2593_v16 = vld [vmem:[%s8845_s20 + $0x18] sm:$0xf] }
 0x57f   : > { %v6325_v2 = vpop.permute.xlu0 %3398 }
 0x580   : > { %8858 = vst [vmem:[#allocation125_spill] sm:$0xff] %v6325_v2 }
 0x583   : > { %4630 = vmatmul.msk.bf16.vlgmr.msra.gmra.mxu3 %vm826_vm0, %v2589_v3  ;;  %v6320_v42 = vpop.permute.xlu2 %2236 }
 0x584   : > { %8855 = vst [vmem:[#allocation123_spill] sm:$0xff] %v6320_v42  ;;  %v6323_v48 = vpop.permute.xlu1 %2232  ;;  %2855 = vmatpush.bf16.msra.mxu3 %v4780_v28 }
 0x585   : > { %8857 = vst [vmem:[#allocation124_spill] sm:$0xff] %v6323_v48 }
 0x586   : > { %3638 = vperm.xlu0 %4869, %v8856_v39  }
 0x587   : > { %v6339_v14 = vpop.permute.xlu0 %2328 }
 0x588   : > { %8862 = vst [vmem:[#allocation128_spill] sm:$0xff] %v6339_v14 }
 0x589   : > { %4629 = vmatmul.msk.bf16.vlgmr.msra.gmra.mxu1 %vm826_vm0, %v2588_v36 }
 0x58a   : > { %2781 = vmatpush.bf16.msra.mxu1 %v2769_v63 }
 0x58b   : > { %4631 = vmatmul.msk.bf16.vlgmr.msrb.gmra.mxu2 %vm826_vm0, %v2590_v40  ;;  %v6332_v60 = vpop.permute.xlu2 %2248 }
 0x58c   : > { %8860 = vst [vmem:[#allocation126_spill] sm:$0xff] %v6332_v60  ;;  %v6337_v3 = vpop.permute.xlu1 %2244 }
 0x58d   : > { %8861 = vst [vmem:[#allocation127_spill] sm:$0xff] %v6337_v3 }
 0x58e   : > { %3650 = vperm.xlu0 %4869, %v8859_v58  }
 0x58f   : > { %v6350_v40 = vpop.permute.xlu0 %2348 }
 0x590   : > { %8865 = vst [vmem:[#allocation131_spill] sm:$0xff] %v6350_v40 }
 0x593   : > { %4633 = vmatmul.msk.bf16.vlgmr.msrb.gmra.mxu3 %vm826_vm0, %v2592_v12  ;;  %v6346_v36 = vpop.permute.xlu2 %2324  ;;  %v2594_v12 = vld [vmem:[%s8845_s20 + $0x1c] sm:$0xf] }
 0x594   : > { %8863 = vst [vmem:[#allocation129_spill] sm:$0xff] %v6346_v36  ;;  %v6348_v63 = vpop.permute.xlu1 %2256 }
 0x595   : > { %8864 = vst [vmem:[#allocation130_spill] sm:$0xff] %v6348_v63 }
 0x597   : > { %v6360_v33 = vpop.permute.xlu0 %2360 }
 0x598   : > { %8868 = vst [vmem:[#allocation134_spill] sm:$0xff] %v6360_v33  ;;  %v1083_v33 = vmul.f32 %v8879_v1, %v8878_v62  ;;  %v1113_v1 = vmul.f32 %v5696_v27, %v8878_v62  ;;  %v8892_v27 = vld [vmem:[#allocation42_spill] sm:$0xff] }
 0x599   : > { %4632 = vmatmul.msk.bf16.vlgmr.msrb.gmra.mxu1 %vm826_vm0, %v2591_v38  ;;  %v1107_v28 = vmul.f32 %v8892_v27, %v8878_v62  ;;  %v8901_v27 = vld [vmem:[#allocation34_spill] sm:$0xff] }
 0x59b   : > { %4634 = vmatmul.msk.bf16.vlgmr.msra.gmra.mxu2 %vm826_vm0, %v2593_v16  ;;  %v6355_v2 = vpop.permute.xlu2 %2336 }
 0x59c   : > { %8866 = vst [vmem:[#allocation132_spill] sm:$0xff] %v6355_v2  ;;  %v6358_v11 = vpop.permute.xlu1 %2332  ;;  %v8885_v2 = vld [vmem:[#allocation36_spill] sm:$0xff] }
 0x59d   : > { %8867 = vst [vmem:[#allocation133_spill] sm:$0xff] %v6358_v11  ;;  %v1095_v11 = vmul.f32 %v8885_v2, %v8878_v62  ;;  %v8891_v2 = vld [vmem:[#allocation64_spill] sm:$0xff] }
 0x59e   : > { %v1105_v42 = vmul.f32 %v8891_v2, %v8878_v62  ;;  %v8900_v2 = vld [vmem:[#allocation22_spill] sm:$0xff] }
 0x59f   : > { %v6366_v19 = vpop.permute.xlu0 %2372  ;;  %v1127_v56 = vadd.f32 %v1095_v11, %v8903_v35  ;;  %v1486_v35 = vmul.f32 %v5833_v31, %v5985_v23  ;;  %v1490_v11 = vmul.f32 %v5837_v20, %v5985_v23  ;;  %v8913_v31 = vld [vmem:[#allocation48_spill] sm:$0xff] }
 0x5a0   : > { %8871 = vst [vmem:[#allocation137_spill] sm:$0xff] %v6366_v19  ;;  %v8880_v19 = vld [vmem:[#allocation32_spill] sm:$0xff] }
 0x5a1   : > { %v8915_v20 = vld [vmem:[#allocation76_spill] sm:$0xff] }
 0x5a3   : > { %v6362_v38 = vpop.permute.xlu2 %2344 }
 0x5a4   : > { %8869 = vst [vmem:[#allocation135_spill] sm:$0xff] %v6362_v38  ;;  %v6364_v16 = vpop.permute.xlu1 %2340 }
 0x5a5   : > { %8870 = vst [vmem:[#allocation136_spill] sm:$0xff] %v6364_v16 }
 0x5a7   : > { %v6372_v58 = vpop.permute.xlu0 %2384 }
 0x5a8   : > { %8874 = vst [vmem:[#allocation140_spill] sm:$0xff] %v6372_v58  ;;  %v8882_v58 = vld [vmem:[#allocation56_spill] sm:$0xff] }
 0x5a9   : > { %4635 = vmatmul.msk.bf16.vlgmr.msra.gmra.mxu1 %vm826_vm0, %v2594_v12 }
 0x5ab   : > { %v6368_v43 = vpop.permute.xlu2 %2356 }
 0x5ac   : > { %8872 = vst [vmem:[#allocation138_spill] sm:$0xff] %v6368_v43  ;;  %v6370_v59 = vpop.permute.xlu1 %2352  ;;  %v1085_v43 = vmul.f32 %v8880_v19, %v8878_v62  ;;  %v8886_v19 = vld [vmem:[#allocation59_spill] sm:$0xff] }
 0x5ad   : > { %8873 = vst [vmem:[#allocation139_spill] sm:$0xff] %v6370_v59  ;;  %v8881_v59 = vld [vmem:[#allocation50_spill] sm:$0xff]  ;;  %v1097_v14 = vmul.f32 %v8886_v19, %v8878_v62 }
 0x5ae   : > { %v1087_v40 = vmul.f32 %v8881_v59, %v8878_v62  ;;  %v8887_v59 = vld [vmem:[#allocation60_spill] sm:$0xff]  ;;  %v8893_v19 = vld [vmem:[#allocation66_spill] sm:$0xff] }
 0x5af   : > { %v6378_v12 = vpop.permute.xlu0 %3474  ;;  %v1099_v36 = vmul.f32 %v8887_v59, %v8878_v62  ;;  %v1109_v48 = vmul.f32 %v8893_v19, %v8878_v62  ;;  %v8894_v59 = vld [vmem:[#allocation67_spill] sm:$0xff] }
 0x5b0   : > { %8877 = vst [vmem:[#allocation143_spill] sm:$0xff] %v6378_v12  ;;  %v8884_v12 = vld [vmem:[#allocation57_spill] sm:$0xff]  ;;  %v1111_v37 = vmul.f32 %v8894_v59, %v8878_v62  ;;  %v1119_v51 = vadd.f32 %v1087_v40, %v8899_v10 }
 0x5b1   : > { %v1093_v16 = vmul.f32 %v8884_v12, %v8878_v62  ;;  %v768_v12 = vpop.f32.mrf.mxu0  ;;  %v8909_v10 = vld [vmem:[#allocation77_spill] sm:$0xff] }
 0x5b2   : > { %v1145_v34 = vadd.f32 %v1113_v1, %v768_v12  ;;  %v1139_v40 = vadd.f32 %v1107_v28, %v8909_v10  ;;  %v8911_v12 = vld [vmem:[#allocation86_spill] sm:$0xff] }
 0x5b3   : > { %v6374_v39 = vpop.permute.xlu2 %2368  ;;  %v1125_v19 = vadd.f32 %v1093_v16, %v8902_v18  ;;  %v1484_v18 = vmul.f32 %v5829_v45, %v5985_v23  ;;  %v8912_v45 = vld [vmem:[#allocation73_spill] sm:$0xff] }
 0x5b4   : > { %8875 = vst [vmem:[#allocation141_spill] sm:$0xff] %v6374_v39  ;;  %v6376_v6 = vpop.permute.xlu1 %2364  ;;  %v1089_v39 = vmul.f32 %v8882_v58, %v8878_v62  ;;  %v8888_v58 = vld [vmem:[#allocation39_spill] sm:$0xff] }
 0x5b5   : > { %8876 = vst [vmem:[#allocation142_spill] sm:$0xff] %v6376_v6  ;;  %v8883_v6 = vld [vmem:[#allocation51_spill] sm:$0xff]  ;;  %v1101_v63 = vmul.f32 %v8888_v58, %v8878_v62 }
 0x5b6   : > { %v1091_v38 = vmul.f32 %v8883_v6, %v8878_v62  ;;  %v8889_v6 = vld [vmem:[#allocation63_spill] sm:$0xff]  ;;  %v1121_v22 = vadd.f32 %v1089_v39, %v8900_v2  ;;  %v8910_v39 = vld [vmem:[#allocation82_spill] sm:$0xff] }
 0x5b7   : > { %v1103_v60 = vmul.f32 %v8889_v6, %v8878_v62  ;;  %v6419_v58 = vpop.permute.xlu0 %3494  ;;  %v8897_v6 = vld [vmem:[#allocation17_spill] sm:$0xff]  ;;  %v8904_v62 = vld [vmem:[#allocation47_spill] sm:$0xff]  ;;  %v1141_v1 = vadd.f32 %v1109_v48, %v8910_v39  ;;  %v1494_v48 = vmul.f32 %v5707_v41, %v5985_v23  ;;  %v4779_v41 = vld [vmem:[%s8690_s15 + $0x30] sm:$0xff] }
 0x5b8   : > { %8896 = vst [vmem:[#allocation32_spill] sm:$0xff] %v6419_v58  ;;  %v1115_v49 = vadd.f32 %v1083_v33, %v8897_v6  ;;  %v1123_v61 = vadd.f32 %v1091_v38, %v8901_v27  ;;  %v1129_v59 = vadd.f32 %v1097_v14, %v8904_v62  ;;  %v8906_v58 = vld [vmem:[#allocation61_spill] sm:$0xff]  ;;  %v8907_v33 = vld [vmem:[#allocation68_spill] sm:$0xff]  ;;  %v1143_v38 = vadd.f32 %v1111_v37, %v8911_v12  ;;  %v8919_v27 = vld [vmem:[#allocation55_spill] sm:$0xff] }
 0x5b9   : > { %v1133_v13 = vadd.f32 %v1101_v63, %v8906_v58  ;;  %v1135_v6 = vadd.f32 %v1103_v60, %v8907_v33  ;;  %v1496_v37 = vmul.f32 %v5845_v57, %v5985_v23  ;;  %v1498_v60 = vmul.f32 %v8912_v45, %v5985_v23  ;;  %v8917_v57 = vld [vmem:[#allocation78_spill] sm:$0xff]  ;;  %v8918_v58 = vld [vmem:[#allocation80_spill] sm:$0xff]  ;;  %2856 = vmatpush.bf16.msra.mxu3 %v4779_v41 }
 0x5ba   : > { %v1500_v14 = vmul.f32 %v8913_v31, %v5985_v23  ;;  %v1504_v63 = vmul.f32 %v8915_v20, %v5985_v23  ;;  %v1508_v28 = vmul.f32 %v8917_v57, %v5985_v23  ;;  %v1510_v2 = vmul.f32 %v8918_v58, %v5985_v23 }
 0x5bb   : > { %v6407_v3 = vpop.permute.xlu2 %2380  ;;  %v1512_v62 = vmul.f32 %v8919_v27, %v5985_v23  ;;  %v1514_v33 = vmul.f32 %v5867_v30, %v5985_v23  ;;  %v1516_v10 = vadd.f32 %v1484_v18, %v1115_v49  ;;  %v1522_v45 = vadd.f32 %v1490_v11, %v1121_v22  ;;  %v4778_v30 = vld [vmem:[%s8690_s15 + $0x28] sm:$0xff] }
 0x5bc   : > { %8890 = vst [vmem:[#allocation23_spill] sm:$0xff] %v6407_v3  ;;  %v6417_v25 = vpop.permute.xlu1 %2376  ;;  %v1117_v3 = vadd.f32 %v1085_v43, %v8898_v32  ;;  %v8908_v43 = vld [vmem:[#allocation71_spill] sm:$0xff]  ;;  %v1528_v20 = vadd.f32 %v1496_v37, %v1127_v56  ;;  %v1536_v47 = vadd.f32 %v1504_v63, %v1135_v6  ;;  %v1612_v56 = vmul.f32 %v5871_v15, %v6042_v0 }
 0x5bd   : > { %8895 = vst [vmem:[#allocation29_spill] sm:$0xff] %v6417_v25  ;;  %v8905_v25 = vld [vmem:[#allocation54_spill] sm:$0xff]  ;;  %v1137_v32 = vadd.f32 %v1105_v42, %v8908_v43  ;;  %v1492_v42 = vmul.f32 %v5841_v46, %v5985_v23  ;;  %v8916_v46 = vld [vmem:[#allocation49_spill] sm:$0xff]  ;;  %v1544_v22 = vadd.f32 %v1512_v62, %v1143_v38  ;;  %v1546_v49 = vadd.f32 %v1514_v33, %v1145_v34 }
 0x5be   : > { %v1131_v54 = vadd.f32 %v1099_v36, %v8905_v25  ;;  %v1488_v25 = vmul.f32 %v5701_v29, %v5985_v23  ;;  %v8914_v29 = vld [vmem:[#allocation74_spill] sm:$0xff]  ;;  %v1506_v16 = vmul.f32 %v8916_v46, %v5985_v23  ;;  %v1518_v39 = vadd.f32 %v1486_v35, %v1117_v3  ;;  %2857 = vmatpush.bf16.msra.mxu3 %v4778_v30 }
 0x5bf   : > { %v1502_v36 = vmul.f32 %v8914_v29, %v5985_v23  ;;  %v1524_v31 = vadd.f32 %v1492_v42, %v1123_v61  ;;  %v1526_v29 = vadd.f32 %v1494_v48, %v1125_v19  ;;  %v1530_v46 = vadd.f32 %v1498_v60, %v1129_v59  ;;  %v6475_v58 = vpop.permute.xlu0 %3506  ;;  %v8931_v33 = vld [vmem:[#allocation58_spill] sm:$0xff] }
 0x5c0   : > { %v1520_v12 = vadd.f32 %v1488_v25, %v1119_v51  ;;  %8922 = vst [vmem:[#allocation51_spill] sm:$0xff] %v6475_v58  ;;  %v1532_v7 = vadd.f32 %v1500_v14, %v1131_v54  ;;  %v1538_v26 = vadd.f32 %v1506_v16, %v1137_v32  ;;  %v1540_v23 = vadd.f32 %v1508_v28, %v1139_v40 }
 0x5c1   : > { %v1534_v27 = vadd.f32 %v1502_v36, %v1133_v13  ;;  %v1542_v51 = vadd.f32 %v1510_v2, %v1141_v1  ;;  %v1614_v61 = vmul.f32 %v5877_v8, %v6042_v0  ;;  %v1616_v54 = vmul.f32 %v5875_v53, %v6042_v0  ;;  %v8923_v53 = vld [vmem:[#allocation88_spill] sm:$0xff] }
 0x5c2   : > { %v1618_v13 = vmul.f32 %v5879_v17, %v6042_v0  ;;  %v1620_v3 = vmul.f32 %v8776_v4, %v6042_v0  ;;  %v1622_v19 = vmul.f32 %v8777_v44, %v6042_v0  ;;  %v1624_v34 = vmul.f32 %v8778_v9, %v6042_v0  ;;  %v8924_v17 = vld [vmem:[#allocation90_spill] sm:$0xff]  ;;  %v8925_v4 = vld [vmem:[#allocation92_spill] sm:$0xff]  ;;  %v8926_v44 = vld [vmem:[#allocation91_spill] sm:$0xff] }
 0x5c3   : > { %v6471_v43 = vpop.permute.xlu2 %2456  ;;  %v1626_v15 = vmul.f32 %v8779_v50, %v6042_v0  ;;  %v1628_v8 = vmul.f32 %v8780_v21, %v6042_v0  ;;  %v1630_v59 = vmul.f32 %v8923_v53, %v6042_v0  ;;  %v1632_v6 = vmul.f32 %v8924_v17, %v6042_v0  ;;  %v8927_v50 = vld [vmem:[#allocation93_spill] sm:$0xff]  ;;  %v8943_v53 = vld [vmem:[#allocation16_spill] sm:$0xff]  ;;  %v8944_v17 = vld [vmem:[#allocation15_spill] sm:$0xff] }
 0x5c4   : > { %8920 = vst [vmem:[#allocation50_spill] sm:$0xff] %v6471_v43  ;;  %v6473_v57 = vpop.permute.xlu1 %2452  ;;  %v1634_v32 = vmul.f32 %v8925_v4, %v6042_v0  ;;  %v1636_v40 = vmul.f32 %v8926_v44, %v6042_v0  ;;  %v1638_v9 = vmul.f32 %v5983_v55, %v6042_v0  ;;  %v1640_v1 = vmul.f32 %v8927_v50, %v6042_v0  ;;  %v8945_v4 = vld [vmem:[#allocation83_spill] sm:$0xff]  ;;  %v8946_v44 = vld [vmem:[#allocation85_spill] sm:$0xff] }
 0x5c5   : > { %8921 = vst [vmem:[#allocation56_spill] sm:$0xff] %v6473_v57  ;;  %v1642_v21 = vmul.f32 %v5989_v52, %v6042_v0  ;;  %v6512_v38 = vadd.f32 %v1612_v56, %v1516_v10  ;;  %v6514_v18 = vadd.f32 %v1614_v61, %v1518_v39  ;;  %v6516_v35 = vadd.f32 %v1616_v54, %v1520_v12  ;;  %v8932_v10 = vld [vmem:[#allocation106_spill] sm:$0xff]  ;;  %v8933_v12 = vld [vmem:[#allocation105_spill] sm:$0xff] }
 0x5c6   : > { %v6518_v25 = vadd.f32 %v1618_v13, %v1522_v45  ;;  %v6520_v11 = vadd.f32 %v1620_v3, %v1524_v31  ;;  %v6522_v42 = vadd.f32 %v1622_v19, %v1526_v29  ;;  %v6524_v48 = vadd.f32 %v1624_v34, %v1528_v20  ;;  %v8934_v31 = vld [vmem:[#allocation110_spill] sm:$0xff]  ;;  %v8935_v20 = vld [vmem:[#allocation109_spill] sm:$0xff]  ;;  %v8941_v19 = vld [vmem:[#allocation116_spill] sm:$0xff] }
 0x5c7   : > { %v6526_v55 = vadd.f32 %v1626_v15, %v1530_v46  ;;  %v6530_v60 = vadd.f32 %v1628_v8, %v1532_v7  ;;  %v6532_v52 = vadd.f32 %v1630_v59, %v1534_v27  ;;  %v6534_v0 = vadd.f32 %v1632_v6, %v1536_v47  ;;  %v6548_v62 = vpop.permute.xlu0 %3518  ;;  %v8936_v27 = vld [vmem:[#allocation62_spill] sm:$0xff]  ;;  %v8939_v56 = vld [vmem:[#allocation65_spill] sm:$0xff] }
 0x5c8   : > { %v6536_v14 = vadd.f32 %v1634_v32, %v1538_v26  ;;  %v6538_v63 = vadd.f32 %v1636_v40, %v1540_v23  ;;  %v6540_v16 = vadd.f32 %v1638_v9, %v1542_v51  ;;  %v6542_v41 = vadd.f32 %v1640_v1, %v1544_v22  ;;  %8930 = vst [vmem:[#allocation59_spill] sm:$0xff] %v6548_v62  ;;  %v8937_v23 = vld [vmem:[#allocation114_spill] sm:$0xff]  ;;  %v8938_v22 = vld [vmem:[#allocation113_spill] sm:$0xff]  ;;  %v8947_v9 = vld [vmem:[#allocation84_spill] sm:$0xff] }
 0x5c9   : > { %v6544_v28 = vadd.f32 %v1642_v21, %v1546_v49  ;;  %v8940_v54 = vld [vmem:[#allocation117_spill] sm:$0xff]  ;;  %v4777_v3 = vld [vmem:[%s8690_s15 + $0x20] sm:$0xff]  ;;  %v8948_v1 = vld [vmem:[#allocation87_spill] sm:$0xff] }
 0x5ca   : > { %v8942_v15 = vld [vmem:[#allocation69_spill] sm:$0xff]  ;;  %2858 = vmatpush.bf16.msra.mxu3 %v4777_v3 }
 0x5cb   : > { %v6528_v37 = vpop.permute.xlu2 %2468  ;;  %v8949_v62 = vld [vmem:[#allocation89_spill] sm:$0xff] }
 0x5cc   : > { %8928 = vst [vmem:[#allocation57_spill] sm:$0xff] %v6528_v37  ;;  %v6546_v2 = vpop.permute.xlu1 %2464  ;;  %v8950_v37 = vld [vmem:[#allocation94_spill] sm:$0xff] }
 0x5cd   : > { %8929 = vst [vmem:[#allocation36_spill] sm:$0xff] %v6546_v2 }
 0x5e6   : > { %v1953_v36 = vpop.f32.mrf.mxu1 }
 0x5e7   : > { %v2131_v7 = vmul.f32 %v6158_v24, %v1953_v36  ;;  %v2133_v47 = vmul.f32 %v6154_v5, %v1953_v36  ;;  %v2135_v26 = vmul.f32 %v8931_v33, %v1953_v36  ;;  %v2137_v39 = vmul.f32 %v8932_v10, %v1953_v36 }
 0x5e8   : > { %v2139_v45 = vmul.f32 %v8933_v12, %v1953_v36  ;;  %v2141_v29 = vmul.f32 %v8934_v31, %v1953_v36  ;;  %v2143_v46 = vmul.f32 %v8935_v20, %v1953_v36  ;;  %v2145_v30 = vmul.f32 %v8936_v27, %v1953_v36 }
 0x5e9   : > { %v2147_v51 = vmul.f32 %v8937_v23, %v1953_v36  ;;  %v2149_v49 = vmul.f32 %v8938_v22, %v1953_v36  ;;  %v2151_v61 = vmul.f32 %v8939_v56, %v1953_v36  ;;  %v2153_v13 = vmul.f32 %v8940_v54, %v1953_v36 }
 0x5ea   : > { %v2155_v34 = vmul.f32 %v8941_v19, %v1953_v36  ;;  %v2157_v8 = vmul.f32 %v8942_v15, %v1953_v36  ;;  %v2159_v59 = vmul.f32 %v8943_v53, %v1953_v36  ;;  %v2161_v6 = vmul.f32 %v8944_v17, %v1953_v36  ;;  %v8951_v36 = vld [vmem:[#allocation95_spill] sm:$0xff] }
 0x5eb   : > { %v6570_v32 = vadd.f32 %v2131_v7, %v8945_v4  ;;  %v6573_v40 = vadd.f32 %v2133_v47, %v8946_v44  ;;  %v6576_v50 = vadd.f32 %v2135_v26, %v8947_v9  ;;  %v6579_v21 = vadd.f32 %v2137_v39, %v8948_v1  ;;  %v8952_v7 = vld [vmem:[#allocation96_spill] sm:$0xff]  ;;  %v8953_v47 = vld [vmem:[#allocation97_spill] sm:$0xff]  ;;  %v8954_v26 = vld [vmem:[#allocation98_spill] sm:$0xff] }
 0x5ec   : > { %v6582_v58 = vadd.f32 %v2139_v45, %v8949_v62  ;;  %v6585_v2 = vadd.f32 %v2141_v29, %v8950_v37  ;;  %v6588_v43 = vadd.f32 %v2143_v46, %v8951_v36  ;;  %v6591_v4 = vadd.f32 %v2145_v30, %v8952_v7  ;;  %v8955_v39 = vld [vmem:[#allocation99_spill] sm:$0xff]  ;;  %v8956_v62 = vld [vmem:[#allocation100_spill] sm:$0xff]  ;;  %v8957_v37 = vld [vmem:[#allocation101_spill] sm:$0xff] }
 0x5ed   : > { %v6594_v44 = vadd.f32 %v2147_v51, %v8953_v47  ;;  %v6597_v9 = vadd.f32 %v2149_v49, %v8954_v26  ;;  %v6600_v3 = vadd.f32 %v2151_v61, %v8955_v39  ;;  %v6603_v45 = vadd.f32 %v2153_v13, %v8956_v62  ;;  %v8958_v46 = vld [vmem:[#allocation102_spill] sm:$0xff]  ;;  %v8959_v30 = vld [vmem:[#allocation103_spill] sm:$0xff]  ;;  %v8960_v51 = vld [vmem:[#allocation104_spill] sm:$0xff]  ;;  %v6617_v26 = vpop.permute.xlu2 %2476 }
 0x5ee   : > { %v6606_v29 = vadd.f32 %v2155_v34, %v8957_v37  ;;  %v6609_v1 = vadd.f32 %v2157_v8, %v8958_v46  ;;  %v6612_v36 = vadd.f32 %v2159_v59, %v8959_v30  ;;  %v6615_v7 = vadd.f32 %v2161_v6, %v8960_v51  ;;  %v1955_v49 = vpop.f32.mrf.mxu1  ;;  %v1978_v47 = vpop.f32.mrf.mxu2  ;;  %8961 = vst [vmem:[#allocation60_spill] sm:$0xff] %v6617_v26 }
 0x5ef   : > { %v2132_v61 = vmul.f32 %v6158_v24, %v1955_v49  ;;  %v2134_v13 = vmul.f32 %v6154_v5, %v1955_v49  ;;  %v2136_v34 = vmul.f32 %v8931_v33, %v1955_v49  ;;  %v2138_v39 = vmul.f32 %v8932_v10, %v1955_v49  ;;  %v6627_v37 = vpop.permute.xlu1 %2472  ;;  %v6629_v46 = vpop.permute.xlu0 %2460 }
 0x5f0   : > { %v2140_v8 = vmul.f32 %v8933_v12, %v1955_v49  ;;  %v2142_v59 = vmul.f32 %v8934_v31, %v1955_v49  ;;  %v2144_v62 = vmul.f32 %v8935_v20, %v1955_v49  ;;  %v2146_v6 = vmul.f32 %v8936_v27, %v1955_v49  ;;  %8962 = vst [vmem:[#allocation39_spill] sm:$0xff] %v6627_v37  ;;  %v4775_v37 = vld [vmem:[%s8690_s15 + $0x10] sm:$0xff] }
 0x5f1   : > { %8963 = vst [vmem:[#allocation63_spill] sm:$0xff] %v6629_v46  ;;  %v2148_v24 = vmul.f32 %v8937_v23, %v1955_v49  ;;  %v2150_v5 = vmul.f32 %v8938_v22, %v1955_v49  ;;  %v2152_v33 = vmul.f32 %v8939_v56, %v1955_v49  ;;  %v2154_v10 = vmul.f32 %v8940_v54, %v1955_v49  ;;  %v4776_v56 = vld [vmem:[%s8690_s15 + $0x18] sm:$0xff]  ;;  %v8989_v46 = vld [vmem:[#allocation127_spill] sm:$0xff] }
 0x5f2   : > { %v2156_v12 = vmul.f32 %v8941_v19, %v1955_v49  ;;  %v2158_v31 = vmul.f32 %v8942_v15, %v1955_v49  ;;  %v2160_v20 = vmul.f32 %v8943_v53, %v1955_v49  ;;  %v2162_v27 = vmul.f32 %v8944_v17, %v1955_v49  ;;  %2859 = vmatpush.bf16.msra.mxu3 %v4776_v56  ;;  %v8988_v56 = vld [vmem:[#allocation115_spill] sm:$0xff] }
 0x5f3   : > { %v6640_v30 = vadd.f32 %v2132_v61, %v6512_v38  ;;  %v6643_v51 = vadd.f32 %v2134_v13, %v6514_v18  ;;  %v6646_v23 = vadd.f32 %v2136_v34, %v6516_v35  ;;  %v6649_v22 = vadd.f32 %v2138_v39, %v6518_v25  ;;  %v8977_v61 = vld [vmem:[#allocation46_spill] sm:$0xff] }
 0x5f4   : > { %v6655_v54 = vadd.f32 %v2140_v8, %v6520_v11  ;;  %v6658_v19 = vadd.f32 %v2142_v59, %v6522_v42  ;;  %v6661_v38 = vadd.f32 %v2144_v62, %v6524_v48  ;;  %v6664_v18 = vadd.f32 %v2146_v6, %v6526_v55  ;;  %v8982_v62 = vld [vmem:[#allocation53_spill] sm:$0xff]  ;;  %v8983_v6 = vld [vmem:[#allocation52_spill] sm:$0xff] }
 0x5f5   : > { %v6667_v35 = vadd.f32 %v2148_v24, %v6530_v60  ;;  %v6670_v25 = vadd.f32 %v2150_v5, %v6532_v52  ;;  %v6673_v15 = vadd.f32 %v2152_v33, %v6534_v0  ;;  %v6676_v11 = vadd.f32 %v2154_v10, %v6536_v14  ;;  %v8975_v0 = vld [vmem:[#allocation28_spill] sm:$0xff]  ;;  %v8976_v14 = vld [vmem:[#allocation119_spill] sm:$0xff]  ;;  %v6702_v5 = vpop.permute.xlu2 %2488 }
 0x5f6   : > { %8964 = vst [vmem:[#allocation64_spill] sm:$0xff] %v6661_v38  ;;  %v6679_v42 = vadd.f32 %v2156_v12, %v6538_v63  ;;  %v6682_v48 = vadd.f32 %v2158_v31, %v6540_v16  ;;  %v6685_v55 = vadd.f32 %v2160_v20, %v6542_v41  ;;  %v6688_v60 = vadd.f32 %v2162_v27, %v6544_v28  ;;  %v1980_v52 = vpop.f32.mrf.mxu2  ;;  %v6690_v53 = vpop.f32.mrf.mxu1  ;;  %v8978_v63 = vld [vmem:[#allocation21_spill] sm:$0xff]  ;;  %v8980_v16 = vld [vmem:[#allocation20_spill] sm:$0xff]  ;;  %v8981_v41 = vld [vmem:[#allocation107_spill] sm:$0xff] }
 0x5f7   : > { %8965 = vst [vmem:[#allocation42_spill] sm:$0xff] %v6664_v18  ;;  %v2259_v17 = vmul.f32 %v8975_v0, %v1978_v47  ;;  %v2261_v49 = vmul.f32 %v8976_v14, %v1978_v47  ;;  %v2263_v13 = vmul.f32 %v8977_v61, %v1978_v47  ;;  %v2265_v34 = vmul.f32 %v8978_v63, %v1978_v47  ;;  %v6696_v39 = vpop.f32.mrf.mxu3  ;;  %v8985_v33 = vld [vmem:[#allocation111_spill] sm:$0xff]  ;;  %v8986_v12 = vld [vmem:[#allocation124_spill] sm:$0xff] }
 0x5f8   : > { %8966 = vst [vmem:[#allocation66_spill] sm:$0xff] %v6667_v35  ;;  %v2267_v8 = vmul.f32 %v8980_v16, %v1978_v47  ;;  %v2269_v59 = vmul.f32 %v8981_v41, %v1978_v47  ;;  %v2271_v28 = vmul.f32 %v8982_v62, %v1978_v47  ;;  %v2273_v24 = vmul.f32 %v8983_v6, %v1978_v47  ;;  %v8987_v20 = vld [vmem:[#allocation123_spill] sm:$0xff] }
 0x5f9   : > { %8967 = vst [vmem:[#allocation67_spill] sm:$0xff] %v6670_v25  ;;  %v2275_v10 = vmul.f32 %v8985_v33, %v1978_v47  ;;  %v2277_v31 = vmul.f32 %v8986_v12, %v1978_v47  ;;  %v2279_v27 = vmul.f32 %v8987_v20, %v1978_v47  ;;  %v2281_v26 = vmul.f32 %v8988_v56, %v1978_v47 }
 0x5fa   : > { %8968 = vst [vmem:[#allocation17_spill] sm:$0xff] %v6673_v15  ;;  %v2283_v57 = vmul.f32 %v8989_v46, %v1978_v47  ;;  %v6720_v15 = vadd.f32 %v2259_v17, %v6570_v32  ;;  %v6723_v25 = vadd.f32 %v2261_v49, %v6573_v40  ;;  %v6726_v35 = vadd.f32 %v2263_v13, %v6576_v50 }
 0x5fb   : > { %8969 = vst [vmem:[#allocation18_spill] sm:$0xff] %v6676_v11  ;;  %v6717_v11 = vpop.permute.xlu0 %2480  ;;  %v6729_v18 = vadd.f32 %v2265_v34, %v6579_v21  ;;  %2860 = vmatpush.bf16.msra.mxu3 %v4775_v37  ;;  %v6732_v38 = vadd.f32 %v2267_v8, %v6582_v58  ;;  %v6741_v32 = vadd.f32 %v2273_v24, %v6591_v4 }
 0x5fc   : > { %8970 = vst [vmem:[#allocation19_spill] sm:$0xff] %v6679_v42  ;;  %v6715_v42 = vpop.permute.xlu1 %2484  ;;  %v6744_v40 = vadd.f32 %v2275_v10, %v6594_v44  ;;  %v6747_v50 = vadd.f32 %v2277_v31, %v6597_v9  ;;  %v6750_v21 = vadd.f32 %v2279_v27, %v6600_v3  ;;  %v6753_v58 = vadd.f32 %v2281_v26, %v6603_v45 }
 0x5fd   : > { %8971 = vst [vmem:[#allocation22_spill] sm:$0xff] %v6682_v48  ;;  %v8992_v48 = vld [vmem:[#allocation130_spill] sm:$0xff]  ;;  %v2260_v3 = vmul.f32 %v8975_v0, %v1980_v52  ;;  %v2262_v45 = vmul.f32 %v8976_v14, %v1980_v52  ;;  %v2272_v26 = vmul.f32 %v8982_v62, %v1980_v52  ;;  %v2280_v0 = vmul.f32 %v8987_v20, %v1980_v52  ;;  %v6789_v34 = vpop.permute.xlu2 %2500 }
 0x5fe   : > { %8972 = vst [vmem:[#allocation34_spill] sm:$0xff] %v6685_v55  ;;  %v6767_v9 = vpop.f32.mrf.mxu1  ;;  %v6769_v37 = vpop.f32.mrf.mxu2  ;;  %v2282_v17 = vmul.f32 %v8988_v56, %v1980_v52  ;;  %v2284_v49 = vmul.f32 %v8989_v46, %v1980_v52  ;;  %v4774_v46 = vld [vmem:[%s8690_s15 + $0x8] sm:$0xff] }
 0x5ff   : > { %8973 = vst [vmem:[#allocation41_spill] sm:$0xff] %v6688_v60  ;;  %v8991_v60 = vld [vmem:[#allocation118_spill] sm:$0xff]  ;;  %v6783_v14 = vpop.f32.mrf.mxu3  ;;  %v6795_v8 = vadd.f32 %v2262_v45, %v6643_v51  ;;  %2861 = vmatpush.bf16.msra.mxu3 %v4774_v46  ;;  %v9032_v46 = vld [vmem:[#allocation135_spill] sm:$0xff] }
 0x600   : > { %8974 = vst [vmem:[#allocation44_spill] sm:$0xff] %v6690_v53  ;;  %v2287_v55 = vmul.f32 %v8991_v60, %v1978_v47  ;;  %v2288_v13 = vmul.f32 %v8991_v60, %v1980_v52  ;;  %v9005_v51 = vld [vmem:[#allocation42_spill] sm:$0xff] }
 0x601   : > { %8979 = vst [vmem:[#allocation47_spill] sm:$0xff] %v6696_v39  ;;  %v8990_v39 = vld [vmem:[#allocation126_spill] sm:$0xff] }
 0x602   : > { %8984 = vst [vmem:[#allocation54_spill] sm:$0xff] %v6702_v5  ;;  %v2285_v53 = vmul.f32 %v8990_v39, %v1978_v47  ;;  %v2289_v5 = vmul.f32 %v8992_v48, %v1978_v47  ;;  %v6735_v47 = vadd.f32 %v2269_v59, %v6585_v2  ;;  %v6756_v2 = vadd.f32 %v2283_v57, %v6606_v29  ;;  %v9009_v62 = vld [vmem:[#allocation66_spill] sm:$0xff] }
 0x603   : > { %8993 = vst [vmem:[#allocation61_spill] sm:$0xff] %v6715_v42  ;;  %v6738_v42 = vadd.f32 %v2271_v28, %v6588_v43  ;;  %v6762_v4 = vadd.f32 %v2287_v55, %v6612_v36  ;;  %v2264_v57 = vmul.f32 %v8977_v61, %v1980_v52  ;;  %v2266_v29 = vmul.f32 %v8978_v63, %v1980_v52  ;;  %v9017_v10 = vld [vmem:[#allocation19_spill] sm:$0xff] }
 0x604   : > { %8994 = vst [vmem:[#allocation68_spill] sm:$0xff] %v6717_v11  ;;  %v6759_v43 = vadd.f32 %v2285_v53, %v6609_v1  ;;  %v6765_v44 = vadd.f32 %v2289_v5, %v6615_v7  ;;  %v2268_v1 = vmul.f32 %v8980_v16, %v1980_v52  ;;  %v2270_v36 = vmul.f32 %v8981_v41, %v1980_v52  ;;  %v9019_v31 = vld [vmem:[#allocation22_spill] sm:$0xff] }
 0x605   : > { %8995 = vst [vmem:[#allocation71_spill] sm:$0xff] %v6769_v37  ;;  %v2274_v7 = vmul.f32 %v8983_v6, %v1980_v52  ;;  %v2276_v55 = vmul.f32 %v8985_v33, %v1980_v52  ;;  %v2278_v53 = vmul.f32 %v8986_v12, %v1980_v52  ;;  %v2286_v61 = vmul.f32 %v8990_v39, %v1980_v52  ;;  %v9011_v6 = vld [vmem:[#allocation67_spill] sm:$0xff]  ;;  %v9021_v27 = vld [vmem:[#allocation34_spill] sm:$0xff] }
 0x606   : > { %8996 = vst [vmem:[#allocation77_spill] sm:$0xff] %v6783_v14  ;;  %v2290_v63 = vmul.f32 %v8992_v48, %v1980_v52  ;;  %v6792_v16 = vadd.f32 %v2260_v3, %v6640_v30  ;;  %v6798_v41 = vadd.f32 %v2264_v57, %v6646_v23  ;;  %v6801_v59 = vadd.f32 %v2266_v29, %v6649_v22  ;;  %v9003_v30 = vld [vmem:[#allocation64_spill] sm:$0xff]  ;;  %v6818_v23 = vpop.permute.xlu1 %2496  ;;  %v6820_v22 = vpop.permute.xlu0 %2492  ;;  %v9023_v3 = vld [vmem:[#allocation41_spill] sm:$0xff] }
 0x607   : > { %8997 = vst [vmem:[#allocation82_spill] sm:$0xff] %v6789_v34  ;;  %v6807_v48 = vadd.f32 %v2268_v1, %v6655_v54  ;;  %v6810_v60 = vadd.f32 %v2270_v36, %v6658_v19  ;;  %v6813_v52 = vadd.f32 %v2272_v26, %v9003_v30  ;;  %v6816_v39 = vadd.f32 %v2274_v7, %v9005_v51  ;;  %v9013_v54 = vld [vmem:[#allocation17_spill] sm:$0xff]  ;;  %v9015_v19 = vld [vmem:[#allocation18_spill] sm:$0xff]  ;;  %v2631_v57 = vpop.f32.mrf.mxu2  ;;  %v6846_v29 = vpop.f32.mrf.mxu1  ;;  %v9026_v1 = vld [vmem:[#allocation44_spill] sm:$0xff] }
 0x608   : > { %8998 = vst [vmem:[#allocation86_spill] sm:$0xff] %v6795_v8  ;;  %v6823_v28 = vadd.f32 %v2276_v55, %v9009_v62  ;;  %v6826_v24 = vadd.f32 %v2278_v53, %v9011_v6  ;;  %v6829_v5 = vadd.f32 %v2280_v0, %v9013_v54  ;;  %v6832_v33 = vadd.f32 %v2282_v17, %v9015_v19  ;;  %v9027_v36 = vld [vmem:[#allocation129_spill] sm:$0xff]  ;;  %v9028_v7 = vld [vmem:[#allocation128_spill] sm:$0xff]  ;;  %v9033_v51 = vld [vmem:[#allocation131_spill] sm:$0xff]  ;;  %v6875_v14 = vpop.f32.mrf.mxu3 }
 0x609   : > { %8999 = vst [vmem:[#allocation73_spill] sm:$0xff] %v6798_v41  ;;  %v6835_v12 = vadd.f32 %v2284_v49, %v9017_v10  ;;  %v6838_v20 = vadd.f32 %v2286_v61, %v9019_v31  ;;  %v6841_v56 = vadd.f32 %v2288_v13, %v9021_v27  ;;  %v6844_v45 = vadd.f32 %v2290_v63, %v9023_v3  ;;  %v9029_v53 = vld [vmem:[#allocation133_spill] sm:$0xff]  ;;  %v9030_v17 = vld [vmem:[#allocation132_spill] sm:$0xff]  ;;  %v4773_v61 = vld [vmem:[%s8690_s15] sm:$0xff] }
 0x60a   : > { %9000 = vst [vmem:[#allocation48_spill] sm:$0xff] %v6801_v59  ;;  %v2387_v26 = vmul.f32 %v9027_v36, %v9026_v1  ;;  %v2389_v55 = vmul.f32 %v9028_v7, %v9026_v1  ;;  %v2391_v0 = vmul.f32 %v9029_v53, %v9026_v1  ;;  %v2393_v49 = vmul.f32 %v9030_v17, %v9026_v1  ;;  %v9031_v13 = vld [vmem:[#allocation136_spill] sm:$0xff]  ;;  %v9034_v6 = vld [vmem:[#allocation139_spill] sm:$0xff]  ;;  %v9035_v19 = vld [vmem:[#allocation138_spill] sm:$0xff] }
 0x60b   : > { %9001 = vst [vmem:[#allocation74_spill] sm:$0xff] %v6807_v48  ;;  %v2395_v63 = vmul.f32 %v9031_v13, %v9026_v1  ;;  %v2397_v30 = vmul.f32 %v9032_v46, %v9026_v1  ;;  %v2399_v62 = vmul.f32 %v9033_v51, %v9026_v1  ;;  %v2401_v54 = vmul.f32 %v9034_v6, %v9026_v1  ;;  %v9036_v31 = vld [vmem:[#allocation134_spill] sm:$0xff] }
 0x60c   : > { %9002 = vst [vmem:[#allocation76_spill] sm:$0xff] %v6810_v60  ;;  %v2403_v10 = vmul.f32 %v9035_v19, %v9026_v1  ;;  %v2405_v27 = vmul.f32 %v9036_v31, %v9026_v1  ;;  %v9037_v3 = vld [vmem:[#allocation142_spill] sm:$0xff]  ;;  %2862 = vmatpush.bf16.msra.mxu3 %v4773_v61  ;;  %v2423_v61 = vadd.f32 %v2391_v0, %v6726_v35 }
 0x60d   : > { %9004 = vst [vmem:[#allocation49_spill] sm:$0xff] %v6813_v52  ;;  %v2407_v57 = vmul.f32 %v9037_v3, %v9026_v1  ;;  %v2421_v52 = vadd.f32 %v2389_v55, %v6723_v25  ;;  %v2427_v60 = vadd.f32 %v2395_v63, %v6732_v38  ;;  %v2429_v48 = vadd.f32 %v2397_v30, %v6735_v47  ;;  %v9048_v55 = vld [vmem:[#allocation56_spill] sm:$0xff] }
 0x60e   : > { %9006 = vst [vmem:[#allocation78_spill] sm:$0xff] %v6816_v39  ;;  %v2419_v39 = vadd.f32 %v2387_v26, %v6720_v15  ;;  %v2431_v59 = vadd.f32 %v2399_v62, %v6738_v42  ;;  %v2433_v41 = vadd.f32 %v2401_v54, %v6741_v32  ;;  %v2435_v8 = vadd.f32 %v2403_v10, %v6744_v40  ;;  %v6897_v26 = vpop.permute.xlu2 %2512  ;;  %v6905_v40 = vpop.permute.xlu1 %2508  ;;  %v9055_v62 = vld [vmem:[#allocation61_spill] sm:$0xff]  ;;  %v9056_v10 = vld [vmem:[#allocation54_spill] sm:$0xff] }
 0x60f   : > { %9007 = vst [vmem:[#allocation80_spill] sm:$0xff] %v6818_v23  ;;  %v2439_v15 = vadd.f32 %v2407_v57, %v6750_v21  ;;  %v2653_v47 = vpop.f32.mrf.mxu1  ;;  %v6903_v32 = vpop.f32.mrf.mxu2  ;;  %v9047_v21 = vld [vmem:[#allocation47_spill] sm:$0xff] }
 0x610   : > { %9008 = vst [vmem:[#allocation55_spill] sm:$0xff] %v6820_v22  ;;  %v2529_v30 = vmul.f32 %v6717_v11, %v9047_v21  ;;  %v2531_v54 = vmul.f32 %v9055_v62, %v9047_v21  ;;  %v2535_v57 = vmul.f32 %v6820_v22, %v9047_v21  ;;  %v2537_v47 = vmul.f32 %v6818_v23, %v9047_v21 }
 0x611   : > { %9010 = vst [vmem:[#allocation88_spill] sm:$0xff] %v6823_v28  ;;  %v2543_v11 = vmul.f32 %v6905_v40, %v9047_v21  ;;  %v2545_v62 = vmul.f32 %v6897_v26, %v9047_v21 }
 0x612   : > { %9012 = vst [vmem:[#allocation90_spill] sm:$0xff] %v6826_v24  ;;  %v9043_v24 = vld [vmem:[#allocation140_spill] sm:$0xff] }
 0x613   : > { %9014 = vst [vmem:[#allocation92_spill] sm:$0xff] %v6829_v5  ;;  %v2417_v28 = vmul.f32 %v9043_v24, %v9026_v1 }
 0x614   : > { %9016 = vst [vmem:[#allocation91_spill] sm:$0xff] %v6832_v33  ;;  %v9042_v33 = vld [vmem:[#allocation23_spill] sm:$0xff] }
 0x615   : > { %9018 = vst [vmem:[#allocation93_spill] sm:$0xff] %v6835_v12  ;;  %v2415_v5 = vmul.f32 %v9042_v33, %v9026_v1  ;;  %v2449_v42 = vadd.f32 %v2417_v28, %v6765_v44  ;;  %v9052_v44 = vld [vmem:[#allocation57_spill] sm:$0xff] }
 0x616   : > { %9020 = vst [vmem:[#allocation58_spill] sm:$0xff] %v6838_v20  ;;  %v9041_v20 = vld [vmem:[#allocation29_spill] sm:$0xff]  ;;  %v2523_v28 = vmul.f32 %v9052_v44, %v9047_v21 }
 0x617   : > { %9022 = vst [vmem:[#allocation106_spill] sm:$0xff] %v6841_v56  ;;  %v2413_v12 = vmul.f32 %v9041_v20, %v9026_v1  ;;  %v2447_v35 = vadd.f32 %v2415_v5, %v6762_v4  ;;  %v9051_v4 = vld [vmem:[#allocation36_spill] sm:$0xff] }
 0x618   : > { %9024 = vst [vmem:[#allocation105_spill] sm:$0xff] %v6844_v45  ;;  %v9040_v45 = vld [vmem:[#allocation137_spill] sm:$0xff]  ;;  %v2521_v5 = vmul.f32 %v9051_v4, %v9047_v21 }
 0x619   : > { %9025 = vst [vmem:[#allocation110_spill] sm:$0xff] %v6846_v29  ;;  %v9038_v29 = vld [vmem:[#allocation141_spill] sm:$0xff]  ;;  %v2411_v56 = vmul.f32 %v9040_v45, %v9026_v1  ;;  %v2445_v38 = vadd.f32 %v2413_v12, %v6759_v43  ;;  %v9053_v12 = vld [vmem:[#allocation39_spill] sm:$0xff] }
 0x61a   : > { %v2409_v37 = vmul.f32 %v9038_v29, %v9026_v1  ;;  %9039 = vst [vmem:[#allocation109_spill] sm:$0xff] %v6875_v14  ;;  %v2425_v14 = vadd.f32 %v2393_v49, %v6729_v18  ;;  %v2437_v1 = vadd.f32 %v2405_v27, %v6747_v50  ;;  %v6907_v50 = vpop.permute.xlu0 %2504  ;;  %v9054_v49 = vld [vmem:[#allocation60_spill] sm:$0xff]  ;;  %v2533_v27 = vmul.f32 %v9056_v10, %v9047_v21 }
 0x61b   : > { %v2443_v18 = vadd.f32 %v2411_v56, %v6756_v2  ;;  %9044 = vst [vmem:[#allocation62_spill] sm:$0xff] %v6903_v32  ;;  %v9050_v2 = vld [vmem:[#allocation63_spill] sm:$0xff]  ;;  %v2525_v56 = vmul.f32 %v9053_v12, %v9047_v21  ;;  %v2527_v63 = vmul.f32 %v9054_v49, %v9047_v21  ;;  %v2675_v32 = vpop.f32.mrf.mxu3  ;;  %v2539_v12 = vmul.f32 %v6789_v34, %v9047_v21 }
 0x61c   : > { %v2441_v25 = vadd.f32 %v2409_v37, %v6753_v58  ;;  %9045 = vst [vmem:[#allocation114_spill] sm:$0xff] %v6905_v40  ;;  %v2515_v58 = vmul.f32 %v9048_v55, %v9047_v21  ;;  %v9049_v37 = vld [vmem:[#allocation50_spill] sm:$0xff]  ;;  %v2519_v43 = vmul.f32 %v9050_v2, %v9047_v21  ;;  %v2541_v49 = vmul.f32 %v6907_v50, %v9047_v21 }
 0x61d   : > { %9046 = vst [vmem:[#allocation113_spill] sm:$0xff] %v6907_v50  ;;  %v2517_v0 = vmul.f32 %v9049_v37, %v9047_v21  ;;  %v6947_v23 = vadd.f32 %v2521_v5, %v2425_v14  ;;  %v6949_v32 = vadd.f32 %v2523_v28, %v2427_v60  ;;  %v6951_v34 = vadd.f32 %v2525_v56, %v2429_v48  ;;  %v9071_v56 = vld [vmem:[#allocation78_spill] sm:$0xff] }
 0x61e   : > { %v6941_v10 = vadd.f32 %v2515_v58, %v2419_v39  ;;  %v6945_v22 = vadd.f32 %v2519_v43, %v2423_v61  ;;  %v6953_v4 = vadd.f32 %v2527_v63, %v2431_v59  ;;  %v6955_v50 = vadd.f32 %v2529_v30, %v2433_v41  ;;  %v2697_v59 = vpop.f32.mrf.mxu2  ;;  %v9067_v58 = vld [vmem:[#allocation48_spill] sm:$0xff]  ;;  %v9068_v43 = vld [vmem:[#allocation74_spill] sm:$0xff] }
 0x61f   : > { %v6943_v44 = vadd.f32 %v2517_v0, %v2421_v52  ;;  %9058 = vst [vmem:[#allocation117_spill] sm:$0xff] %v6947_v23  ;;  %v6957_v40 = vadd.f32 %v2531_v54, %v2435_v8  ;;  %v6959_v2 = vadd.f32 %v2533_v27, %v2437_v1  ;;  %v6961_v39 = vadd.f32 %v2535_v57, %v2439_v15  ;;  %v9073_v30 = vld [vmem:[#allocation90_spill] sm:$0xff]  ;;  %v9076_v27 = vld [vmem:[#allocation93_spill] sm:$0xff] }
 0x620   : > { %9057 = vst [vmem:[#allocation65_spill] sm:$0xff] %v6945_v22  ;;  %v6963_v52 = vadd.f32 %v2537_v47, %v2441_v25  ;;  %v6965_v61 = vadd.f32 %v2539_v12, %v2443_v18  ;;  %v6967_v14 = vadd.f32 %v2541_v49, %v2445_v38  ;;  %v6969_v60 = vadd.f32 %v2543_v11, %v2447_v35  ;;  %v6997_v38 = vpop.f32.mrf.mxu1  ;;  %v9065_v35 = vld [vmem:[#allocation86_spill] sm:$0xff]  ;;  %v9070_v12 = vld [vmem:[#allocation49_spill] sm:$0xff] }
 0x621   : > { %9059 = vst [vmem:[#allocation116_spill] sm:$0xff] %v6949_v32  ;;  %v6971_v48 = vadd.f32 %v2545_v62, %v2449_v42  ;;  %v2388_v41 = vmul.f32 %v9027_v36, %v6767_v9  ;;  %v2390_v8 = vmul.f32 %v9028_v7, %v6767_v9  ;;  %v2392_v1 = vmul.f32 %v9029_v53, %v6767_v9  ;;  %v9066_v42 = vld [vmem:[#allocation73_spill] sm:$0xff]  ;;  %v9075_v62 = vld [vmem:[#allocation91_spill] sm:$0xff]  ;;  %v9077_v47 = vld [vmem:[#allocation58_spill] sm:$0xff] }
 0x622   : > { %9060 = vst [vmem:[#allocation69_spill] sm:$0xff] %v6951_v34  ;;  %v2394_v15 = vmul.f32 %v9030_v17, %v6767_v9  ;;  %v2396_v25 = vmul.f32 %v9031_v13, %v6767_v9  ;;  %v2398_v11 = vmul.f32 %v9032_v46, %v6767_v9  ;;  %v2400_v18 = vmul.f32 %v9033_v51, %v6767_v9 }
 0x623   : > { %9061 = vst [vmem:[#allocation16_spill] sm:$0xff] %v6953_v4  ;;  %v2402_v36 = vmul.f32 %v9034_v6, %v6767_v9  ;;  %v2404_v7 = vmul.f32 %v9035_v19, %v6767_v9  ;;  %v2406_v53 = vmul.f32 %v9036_v31, %v6767_v9  ;;  %v2408_v17 = vmul.f32 %v9037_v3, %v6767_v9  ;;  %v6999_v46 = vpop.f32.mrf.mxu3 }
 0x624   : > { %9062 = vst [vmem:[#allocation15_spill] sm:$0xff] %v6955_v50  ;;  %v2410_v13 = vmul.f32 %v9038_v29, %v6767_v9  ;;  %v2412_v51 = vmul.f32 %v9040_v45, %v6767_v9  ;;  %v2414_v6 = vmul.f32 %v9041_v20, %v6767_v9  ;;  %v2416_v19 = vmul.f32 %v9042_v33, %v6767_v9  ;;  %v9069_v45 = vld [vmem:[#allocation76_spill] sm:$0xff] }
 0x625   : > { %9063 = vst [vmem:[#allocation83_spill] sm:$0xff] %v6957_v40  ;;  %v2418_v31 = vmul.f32 %v9043_v24, %v6767_v9  ;;  %v2420_v3 = vadd.f32 %v2388_v41, %v6792_v16  ;;  %v2422_v29 = vadd.f32 %v2390_v8, %v9065_v35  ;;  %v2424_v21 = vadd.f32 %v2392_v1, %v9066_v42  ;;  %v9072_v33 = vld [vmem:[#allocation88_spill] sm:$0xff]  ;;  %v9078_v41 = vld [vmem:[#allocation106_spill] sm:$0xff]  ;;  %v9079_v1 = vld [vmem:[#allocation105_spill] sm:$0xff] }
 0x626   : > { %9064 = vst [vmem:[#allocation85_spill] sm:$0xff] %v6959_v2  ;;  %v2426_v0 = vadd.f32 %v2394_v15, %v9067_v58  ;;  %v2428_v5 = vadd.f32 %v2396_v25, %v9068_v43  ;;  %v2430_v28 = vadd.f32 %v2398_v11, %v9069_v45  ;;  %v2432_v20 = vadd.f32 %v2400_v18, %v9070_v12  ;;  %v9074_v24 = vld [vmem:[#allocation92_spill] sm:$0xff]  ;;  %v9080_v25 = vld [vmem:[#allocation77_spill] sm:$0xff]  ;;  %v9088_v43 = vld [vmem:[#allocation54_spill] sm:$0xff] }
 0x627   : > { %v2434_v49 = vadd.f32 %v2402_v36, %v9071_v56  ;;  %v2436_v63 = vadd.f32 %v2404_v7, %v9072_v33  ;;  %v2438_v9 = vadd.f32 %v2406_v53, %v9073_v30  ;;  %v2440_v16 = vadd.f32 %v2408_v17, %v9074_v24  ;;  %v9081_v36 = vld [vmem:[#allocation63_spill] sm:$0xff]  ;;  %v9082_v53 = vld [vmem:[#allocation36_spill] sm:$0xff] }
 0x628   : > { %v2442_v54 = vadd.f32 %v2410_v13, %v9075_v62  ;;  %v2444_v57 = vadd.f32 %v2412_v51, %v9076_v27  ;;  %v2446_v59 = vadd.f32 %v2414_v6, %v9077_v47  ;;  %v2448_v8 = vadd.f32 %v2416_v19, %v9078_v41  ;;  %v9083_v13 = vld [vmem:[#allocation57_spill] sm:$0xff]  ;;  %v9084_v6 = vld [vmem:[#allocation39_spill] sm:$0xff]  ;;  %v9090_v33 = vld [vmem:[#allocation80_spill] sm:$0xff]  ;;  %v2719_v24 = vpop.f32.mrf.mxu1 }
 0x629   : > { %v2450_v15 = vadd.f32 %v2418_v31, %v9079_v1  ;;  %v2516_v11 = vmul.f32 %v9048_v55, %v9080_v25  ;;  %v2518_v18 = vmul.f32 %v9049_v37, %v9080_v25  ;;  %v2520_v7 = vmul.f32 %v9081_v36, %v9080_v25  ;;  %v9085_v31 = vld [vmem:[#allocation60_spill] sm:$0xff]  ;;  %v9087_v37 = vld [vmem:[#allocation61_spill] sm:$0xff]  ;;  %v9089_v12 = vld [vmem:[#allocation55_spill] sm:$0xff] }
 0x62a   : > { %v2522_v17 = vmul.f32 %v9082_v53, %v9080_v25  ;;  %v2524_v51 = vmul.f32 %v9083_v13, %v9080_v25  ;;  %v2526_v19 = vmul.f32 %v9084_v6, %v9080_v25  ;;  %v2528_v35 = vmul.f32 %v9085_v31, %v9080_v25  ;;  %v9086_v55 = vld [vmem:[#allocation68_spill] sm:$0xff]  ;;  %v9091_v27 = vld [vmem:[#allocation82_spill] sm:$0xff]  ;;  %v9092_v41 = vld [vmem:[#allocation113_spill] sm:$0xff] }
 0x62b   : > { %v2530_v42 = vmul.f32 %v9086_v55, %v9080_v25  ;;  %v2532_v58 = vmul.f32 %v9087_v37, %v9080_v25  ;;  %v2534_v45 = vmul.f32 %v9088_v43, %v9080_v25  ;;  %v2536_v56 = vmul.f32 %v9089_v12, %v9080_v25  ;;  %v2741_v62 = vpop.f32.mrf.mxu3  ;;  %v9093_v36 = vld [vmem:[#allocation114_spill] sm:$0xff] }
 0x62c   : > { %v2538_v30 = vmul.f32 %v9090_v33, %v9080_v25  ;;  %v2540_v47 = vmul.f32 %v9091_v27, %v9080_v25  ;;  %v2542_v1 = vmul.f32 %v9092_v41, %v9080_v25  ;;  %v2544_v53 = vmul.f32 %v9093_v36, %v9080_v25  ;;  %v9107_v41 = vld [vmem:[#allocation26_spill] sm:$0xff]  ;;  %v9108_v36 = vld [vmem:[#allocation35_spill] sm:$0xff] }
 0x62d   : > { %v2546_v13 = vmul.f32 %v6897_v26, %v9080_v25  ;;  %v7057_v6 = vadd.f32 %v2516_v11, %v2420_v3  ;;  %v7059_v31 = vadd.f32 %v2518_v18, %v2422_v29  ;;  %v7061_v55 = vadd.f32 %v2520_v7, %v2424_v21  ;;  %v9096_v11 = vld [vmem:[#allocation27_spill] sm:$0xff]  ;;  %v9097_v18 = vld [vmem:[#allocation30_spill] sm:$0xff]  ;;  %v9098_v7 = vld [vmem:[#allocation109_spill] sm:$0xff] }
 0x62e   : > { %v7063_v37 = vadd.f32 %v2522_v17, %v2426_v0  ;;  %v7065_v43 = vadd.f32 %v2524_v51, %v2428_v5  ;;  %v7067_v12 = vadd.f32 %v2526_v19, %v2430_v28  ;;  %v7069_v33 = vadd.f32 %v2528_v35, %v2432_v20  ;;  %v9094_v28 = vld [vmem:[#allocation71_spill] sm:$0xff]  ;;  %v9095_v20 = vld [vmem:[#allocation110_spill] sm:$0xff]  ;;  %v9101_v35 = vld [vmem:[#allocation108_spill] sm:$0xff] }
 0x62f   : > { %v7071_v24 = vadd.f32 %v2530_v42, %v2434_v49  ;;  %v7073_v62 = vadd.f32 %v2532_v58, %v2436_v63  ;;  %v7075_v27 = vadd.f32 %v2534_v45, %v2438_v9  ;;  %v7077_v26 = vadd.f32 %v2536_v56, %v2440_v16  ;;  %v4901_v63 = vld [vmem:[%s8363_s16] sm:$0xff]  ;;  %v9100_v19 = vld [vmem:[#allocation31_spill] sm:$0xff]  ;;  %v9102_v42 = vld [vmem:[#allocation37_spill] sm:$0xff] }
 0x630   : > { %v7079_v3 = vadd.f32 %v2538_v30, %v2442_v54  ;;  %v7081_v29 = vadd.f32 %v2540_v47, %v2444_v57  ;;  %v7083_v21 = vadd.f32 %v2542_v1, %v2446_v59  ;;  %v7085_v0 = vadd.f32 %v2544_v53, %v2448_v8  ;;  %v2761_v57 = vpop.f32.mrf.mxu2  ;;  %v2783_v25 = vpop.f32.mrf.mxu1  ;;  %v9099_v17 = vld [vmem:[#allocation62_spill] sm:$0xff]  ;;  %v9103_v58 = vld [vmem:[#allocation112_spill] sm:$0xff]  ;;  %v9104_v56 = vld [vmem:[#allocation25_spill] sm:$0xff] }
 0x631   : > { %v7087_v5 = vadd.f32 %v2546_v13, %v2450_v15  ;;  %v2787_v49 = vpack.c.bf16 %v9095_v20, %v9094_v28  ;;  %v3181_v9 = vrot.slane %v4901_v63, 3  ;;  %v3182_v16 = vrot.slane %v4901_v63, 4  ;;  %v9106_v47 = vld [vmem:[#allocation33_spill] sm:$0xff]  ;;  %v9111_v53 = vld [vmem:[#allocation43_spill] sm:$0xff]  ;;  %v7125_v28 = vpop.permute.xlu2 %3218  ;;  %v9113_v20 = vld [vmem:[#allocation24_spill] sm:$0xff] }
 0x632   : > { %v2788_v51 = vpack.c.bf16 %v9099_v17, %v9098_v7  ;;  %v2789_v45 = vpack.c.bf16 %v6999_v46, %v6997_v38  ;;  %v9105_v30 = vmov 1   ;;  %v2790_v1 = vpack.c.bf16 %v2783_v25, %v2761_v57  ;;  %v9109_v38 = vld [vmem:[#allocation38_spill] sm:$0xff]  ;;  %v9110_v46 = vld [vmem:[#allocation40_spill] sm:$0xff]  ;;  %v4741_v63 = vld [vmem:[%s8693_s3 + $0x38] sm:$0xff] }
 0x633   : > { %2863 = vmatmul.bf16.vlgmr.msra.gmra.mxu3 %v2787_v49  ;;  %v7094_v54 = vperm.slane %v3181_v9, 0  ;;  %v7096_v59 = vperm.slane %v3182_v16, 0  ;;  %v9112_v13 = vmov 2   ;;  %2926 = vmatpush.bf16.msrb.mxu2 %v4741_v63  ;;  %v7141_v16 = vpop.permute.xlu1 %3214  ;;  %v4740_v25 = vld [vmem:[%s8693_s3 + $0x30] sm:$0xff] }
 0x635   : > { %3222 = vperm.xlu1 %4861, %v7094_v54   ;;  %3226 = vperm.xlu2 %4862, %v7096_v59  }
 0x637   : > { %2927 = vmatpush.bf16.msrb.mxu2 %v4740_v25 }
 0x638   : > { %v2763_v8 = vpop.f32.mrf.mxu2  ;;  %v2785_v15 = vpop.f32.mrf.mxu1 }
 0x63d   : > { %3234 = vperm.xlu1 %4861, %v9096_v11   ;;  %3238 = vperm.xlu2 %4862, %v9097_v18  }
 0x643   : > { %2868 = vmatmul.bf16.gmra.mxu3 %v2788_v51 }
 0x645   : > { %3246 = vperm.xlu1 %4861, %v9100_v19   ;;  %3250 = vperm.xlu2 %4862, %v9101_v35  }
 0x64d   : > { %3258 = vperm.xlu1 %4861, %v9102_v42   ;;  %3262 = vperm.xlu2 %4862, %v9103_v58  }
 0x653   : > { %2873 = vmatmul.bf16.gmra.mxu3 %v2789_v45  ;;  %v9115_v45 = vmov 3  }
 0x655   : > { %3270 = vperm.xlu1 %4861, %v9104_v56   ;;  %4864 = vset.pattern.permute.xlu2 %v9105_v30 }
 0x656   : > { %3338 = vperm.xlu2 %4864, %v9106_v47  }
 0x65d   : > { %4865 = vset.pattern.permute.xlu1 %v9105_v30 }
 0x65e   : > { %3346 = vperm.xlu1 %4865, %v9107_v41   ;;  %3350 = vperm.xlu2 %4864, %v7094_v54  }
 0x663   : > { %2878 = vmatmul.bf16.gmra.mxu3 %v2790_v1 }
 0x666   : > { %3354 = vperm.xlu1 %4865, %v7096_v59   ;;  %3358 = vperm.xlu2 %4864, %v9108_v36  }
 0x66e   : > { %3366 = vperm.xlu1 %4865, %v9097_v18   ;;  %3370 = vperm.xlu2 %4864, %v9109_v38  }
 0x676   : > { %3378 = vperm.xlu1 %4865, %v9101_v35   ;;  %3382 = vperm.xlu2 %4864, %v9110_v46  }
 0x67e   : > { %3390 = vperm.xlu1 %4865, %v9103_v58   ;;  %3394 = vperm.xlu2 %4864, %v9111_v53  }
 0x686   : > { %4867 = vset.pattern.permute.xlu1 %v9112_v13  ;;  %4868 = vset.pattern.permute.xlu2 %v9112_v13 }
 0x687   : > { %3466 = vperm.xlu1 %4867, %v9106_v47   ;;  %3470 = vperm.xlu2 %4868, %v9113_v20  }
 0x68f   : > { %3478 = vperm.xlu1 %4867, %v7094_v54   ;;  %3482 = vperm.xlu2 %4868, %v7096_v59   ;;  %v7132_v49 = vpop.permute.xlu2 %3226 }
 0x697   : > { %3486 = vperm.xlu1 %4867, %v9108_v36   ;;  %3490 = vperm.xlu2 %4868, %v9096_v11   ;;  %v7139_v9 = vpop.permute.xlu2 %3238 }
 0x69f   : > { %3498 = vperm.xlu1 %4867, %v9109_v38   ;;  %3502 = vperm.xlu2 %4868, %v9100_v19   ;;  %v7145_v57 = vpop.permute.xlu2 %3250 }
 0x6a7   : > { %3510 = vperm.xlu1 %4867, %v9110_v46   ;;  %v7151_v8 = vpop.permute.xlu1 %3222  ;;  %3514 = vperm.xlu2 %4868, %v9102_v42   ;;  %v7154_v15 = vpop.permute.xlu2 %3262 }
 0x6af   : > { %3522 = vperm.xlu1 %4867, %v9111_v53   ;;  %v7157_v7 = vpop.permute.xlu1 %3234  ;;  %3526 = vperm.xlu2 %4868, %v9104_v56  }
 0x6b0   : > { %v7160_v17 = vpop.permute.xlu2 %3338 }
 0x6b1   : > { %9114 = vst [vmem:[#allocation84_spill] sm:$0xff] %v7160_v17 }
 0x6b6   : > { %v2864_v51 = vpop.f32.mrf.mxu3 }
 0x6b7   : > { %4870 = vset.pattern.permute.xlu1 %v9115_v45  ;;  %v7163_v30 = vpop.permute.xlu1 %3246  ;;  %4871 = vset.pattern.permute.xlu2 %v9115_v45  ;;  %v2884_v63 = vmax.f32 %v2864_v51, 0.0 }
 0x6b8   : > { %3598 = vperm.xlu1 %4870, %v9113_v20   ;;  %3602 = vperm.xlu2 %4871, %v9107_v41   ;;  %v7168_v1 = vpop.permute.xlu2 %3350 }
 0x6b9   : > { %9116 = vst [vmem:[#allocation87_spill] sm:$0xff] %v7168_v1  ;;  %v5006_v1 = vmov 4  }
 0x6ba   : > { %4873 = vset.pattern.permute.xlu0 %v5006_v1 }
 0x6bb   : > { %3726 = vperm.xlu0 %4873, %v9113_v20  }
 0x6be   : > { %v2866_v13 = vpop.f32.mrf.mxu3 }
 0x6bf   : > { %v2885_v25 = vmax.f32 %v2866_v13, 0.0  ;;  %v7170_v2 = vpop.permute.xlu1 %3258 }
 0x6c0   : > { %3606 = vperm.xlu1 %4870, %v7094_v54   ;;  %3610 = vperm.xlu2 %4871, %v7096_v59   ;;  %v7174_v40 = vpop.permute.xlu2 %3358 }
 0x6c1   : > { %v2892_v17 = vpack.c.bf16 %v2885_v25, %v2884_v63  ;;  %9117 = vst [vmem:[#allocation89_spill] sm:$0xff] %v7174_v40 }
 0x6c3   : > { %4676 = vmatmul.msk.bf16.vlgmr.msrb.gmra.mxu2 %vm935_vm1, %v2892_v17  ;;  %3746 = vperm.xlu0 %4873, %v9096_v11  }
 0x6c6   : > { %v2869_v50 = vpop.f32.mrf.mxu3 }
 0x6c7   : > { %v7178_v45 = vpop.permute.xlu1 %3270  ;;  %v2886_v63 = vmax.f32 %v2869_v50, 0.0 }
 0x6c8   : > { %3618 = vperm.xlu1 %4870, %v9096_v11   ;;  %3622 = vperm.xlu2 %4871, %v9097_v18   ;;  %v7181_v51 = vpop.permute.xlu2 %3370 }
 0x6c9   : > { %9118 = vst [vmem:[#allocation94_spill] sm:$0xff] %v7181_v51 }
 0x6cb   : > { %3758 = vperm.xlu0 %4873, %v9100_v19  }
 0x6ce   : > { %v2871_v13 = vpop.f32.mrf.mxu3 }
 0x6cf   : > { %v2887_v25 = vmax.f32 %v2871_v13, 0.0 }
 0x6d0   : > { %3630 = vperm.xlu1 %4870, %v9100_v19   ;;  %v7185_v40 = vpop.permute.xlu1 %3346  ;;  %3634 = vperm.xlu2 %4871, %v9101_v35   ;;  %v7188_v4 = vpop.permute.xlu2 %3382 }
 0x6d1   : > { %9119 = vst [vmem:[#allocation95_spill] sm:$0xff] %v7185_v40  ;;  %v2893_v17 = vpack.c.bf16 %v2887_v25, %v2886_v63 }
 0x6d2   : > { %9120 = vst [vmem:[#allocation96_spill] sm:$0xff] %v7188_v4 }
 0x6d3   : > { %4677 = vmatmul.msk.bf16.gmra.mxu2 %vm935_vm1, %v2893_v17  ;;  %3770 = vperm.xlu0 %4873, %v9102_v42  }
 0x6d6   : > { %v2874_v34 = vpop.f32.mrf.mxu3 }
 0x6d7   : > { %v2888_v63 = vmax.f32 %v2874_v34, 0.0 }
 0x6d8   : > { %3642 = vperm.xlu1 %4870, %v9102_v42   ;;  %v7193_v51 = vpop.permute.xlu1 %3354  ;;  %3646 = vperm.xlu2 %4871, %v9103_v58   ;;  %v7196_v50 = vpop.permute.xlu2 %3394 }
 0x6d9   : > { %9121 = vst [vmem:[#allocation97_spill] sm:$0xff] %v7193_v51 }
 0x6da   : > { %9122 = vst [vmem:[#allocation98_spill] sm:$0xff] %v7196_v50 }
 0x6db   : > { %3782 = vperm.xlu0 %4873, %v9104_v56  }
 0x6de   : > { %v2876_v13 = vpop.f32.mrf.mxu3 }
 0x6df   : > { %v2889_v25 = vmax.f32 %v2876_v13, 0.0 }
 0x6e0   : > { %3654 = vperm.xlu1 %4870, %v9104_v56   ;;  %v7200_v4 = vpop.permute.xlu1 %3366  ;;  %4872 = vset.pattern.permute.xlu2 %v5006_v1 }
 0x6e1   : > { %9123 = vst [vmem:[#allocation99_spill] sm:$0xff] %v7200_v4  ;;  %v2894_v40 = vpack.c.bf16 %v2889_v25, %v2888_v63  ;;  %3722 = vperm.xlu2 %4872, %v9106_v47   ;;  %v7204_v17 = vpop.permute.xlu2 %3470 }
 0x6e2   : > { %9124 = vst [vmem:[#allocation100_spill] sm:$0xff] %v7204_v17 }
 0x6e3   : > { %4678 = vmatmul.msk.bf16.gmra.mxu2 %vm935_vm1, %v2894_v40  ;;  %v5007_v40 = vmov 5  }
 0x6e4   : > { %4877 = vset.pattern.permute.xlu0 %v5007_v40 }
 0x6e5   : > { %3858 = vperm.xlu0 %4877, %v9107_v41  }
 0x6e6   : > { %v2879_v50 = vpop.f32.mrf.mxu3 }
 0x6e7   : > { %v2890_v63 = vmax.f32 %v2879_v50, 0.0 }
 0x6e8   : > { %4874 = vset.pattern.permute.xlu1 %v5006_v1  ;;  %v7207_v51 = vpop.permute.xlu1 %3378 }
 0x6e9   : > { %9125 = vst [vmem:[#allocation101_spill] sm:$0xff] %v7207_v51  ;;  %3730 = vperm.xlu1 %4874, %v9107_v41   ;;  %3734 = vperm.xlu2 %4872, %v7094_v54   ;;  %v7212_v34 = vpop.permute.xlu2 %3482 }
 0x6ea   : > { %9126 = vst [vmem:[#allocation102_spill] sm:$0xff] %v7212_v34 }
 0x6ed   : > { %3878 = vperm.xlu0 %4877, %v9097_v18  }
 0x6ee   : > { %v2881_v13 = vpop.f32.mrf.mxu3 }
 0x6ef   : > { %v2891_v25 = vmax.f32 %v2881_v13, 0.0 }
 0x6f0   : > { %v7214_v4 = vpop.permute.xlu1 %3390 }
 0x6f1   : > { %9127 = vst [vmem:[#allocation103_spill] sm:$0xff] %v7214_v4  ;;  %v2895_v17 = vpack.c.bf16 %v2891_v25, %v2890_v63  ;;  %3738 = vperm.xlu1 %4874, %v7096_v59   ;;  %3742 = vperm.xlu2 %4872, %v9108_v36   ;;  %v7218_v1 = vpop.permute.xlu2 %3490 }
 0x6f2   : > { %9128 = vst [vmem:[#allocation104_spill] sm:$0xff] %v7218_v1 }
 0x6f3   : > { %4679 = vmatmul.msk.bf16.gmra.mxu2 %vm935_vm1, %v2895_v17 }
 0x6f5   : > { %3890 = vperm.xlu0 %4877, %v9101_v35  }
 0x6f9   : > { %3750 = vperm.xlu1 %4874, %v9097_v18   ;;  %v7223_v34 = vpop.permute.xlu1 %3466  ;;  %3754 = vperm.xlu2 %4872, %v9109_v38   ;;  %v7226_v50 = vpop.permute.xlu2 %3502 }
 0x6fa   : > { %9129 = vst [vmem:[#allocation28_spill] sm:$0xff] %v7223_v34 }
 0x6fb   : > { %9130 = vst [vmem:[#allocation119_spill] sm:$0xff] %v7226_v50 }
 0x6fd   : > { %3902 = vperm.xlu0 %4877, %v9103_v58  }
 0x701   : > { %3762 = vperm.xlu1 %4874, %v9101_v35   ;;  %v7230_v13 = vpop.permute.xlu1 %3478  ;;  %3766 = vperm.xlu2 %4872, %v9110_v46   ;;  %v7233_v63 = vpop.permute.xlu2 %3514 }
 0x702   : > { %9131 = vst [vmem:[#allocation46_spill] sm:$0xff] %v7230_v13 }
 0x703   : > { %9132 = vst [vmem:[#allocation21_spill] sm:$0xff] %v7233_v63 }
 0x709   : > { %3774 = vperm.xlu1 %4874, %v9103_v58   ;;  %v7237_v17 = vpop.permute.xlu1 %3486  ;;  %3778 = vperm.xlu2 %4872, %v9111_v53   ;;  %v7241_v25 = vpop.permute.xlu2 %3526 }
 0x70a   : > { %9133 = vst [vmem:[#allocation20_spill] sm:$0xff] %v7237_v17 }
 0x70b   : > { %9134 = vst [vmem:[#allocation107_spill] sm:$0xff] %v7241_v25  ;;  %v5008_v25 = vmov 6  }
 0x70c   : > { %4878 = vset.pattern.permute.xlu0 %v5008_v25 }
 0x70d   : > { %3978 = vperm.xlu0 %4878, %v9106_v47  }
 0x711   : > { %4875 = vset.pattern.permute.xlu1 %v5007_v40  ;;  %v7243_v50 = vpop.permute.xlu1 %3498  ;;  %4876 = vset.pattern.permute.xlu2 %v5007_v40 }
 0x712   : > { %9135 = vst [vmem:[#allocation53_spill] sm:$0xff] %v7243_v50  ;;  %3850 = vperm.xlu1 %4875, %v9106_v47   ;;  %3854 = vperm.xlu2 %4876, %v9113_v20   ;;  %v7247_v63 = vpop.permute.xlu2 %3602 }
 0x713   : > { %9136 = vst [vmem:[#allocation52_spill] sm:$0xff] %v7247_v63 }
 0x715   : > { %3998 = vperm.xlu0 %4878, %v9108_v36  }
 0x719   : > { %v7249_v1 = vpop.permute.xlu1 %3510 }
 0x71a   : > { %9137 = vst [vmem:[#allocation111_spill] sm:$0xff] %v7249_v1  ;;  %3862 = vperm.xlu1 %4875, %v7094_v54   ;;  %3866 = vperm.xlu2 %4876, %v7096_v59   ;;  %v7253_v17 = vpop.permute.xlu2 %3610  ;;  %v7281_v1 = vpop.permute.xlu0 %3594 }
 0x71b   : > { %9138 = vst [vmem:[#allocation124_spill] sm:$0xff] %v7253_v17 }
 0x71c   : > { %9146 = vst [vmem:[#allocation42_spill] sm:$0xff] %v7281_v1 }
 0x71d   : > { %4010 = vperm.xlu0 %4878, %v9109_v38  }
 0x721   : > { %v7255_v13 = vpop.permute.xlu1 %3522 }
 0x722   : > { %9139 = vst [vmem:[#allocation123_spill] sm:$0xff] %v7255_v13  ;;  %3870 = vperm.xlu1 %4875, %v9108_v36   ;;  %3874 = vperm.xlu2 %4876, %v9096_v11   ;;  %v7260_v40 = vpop.permute.xlu2 %3622  ;;  %v7290_v34 = vpop.permute.xlu0 %3614 }
 0x723   : > { %9140 = vst [vmem:[#allocation115_spill] sm:$0xff] %v7260_v40 }
 0x724   : > { %9149 = vst [vmem:[#allocation17_spill] sm:$0xff] %v7290_v34 }
 0x725   : > { %4022 = vperm.xlu0 %4878, %v9110_v46  }
 0x72a   : > { %3882 = vperm.xlu1 %4875, %v9109_v38   ;;  %v7263_v63 = vpop.permute.xlu1 %3598  ;;  %3886 = vperm.xlu2 %4876, %v9100_v19   ;;  %v7270_v13 = vpop.permute.xlu2 %3634 }
 0x72b   : > { %9141 = vst [vmem:[#allocation127_spill] sm:$0xff] %v7263_v63  ;;  %v7304_v34 = vpop.permute.xlu0 %3626 }
 0x72c   : > { %9143 = vst [vmem:[#allocation118_spill] sm:$0xff] %v7270_v13 }
 0x72d   : > { %4034 = vperm.xlu0 %4878, %v9111_v53   ;;  %9153 = vst [vmem:[#allocation22_spill] sm:$0xff] %v7304_v34 }
 0x732   : > { %3894 = vperm.xlu1 %4875, %v9110_v46   ;;  %v7268_v17 = vpop.permute.xlu1 %3606  ;;  %3898 = vperm.xlu2 %4876, %v9102_v42   ;;  %v7279_v63 = vpop.permute.xlu2 %3646 }
 0x733   : > { %9142 = vst [vmem:[#allocation126_spill] sm:$0xff] %v7268_v17 }
 0x734   : > { %9145 = vst [vmem:[#allocation64_spill] sm:$0xff] %v7279_v63 }
 0x73a   : > { %3906 = vperm.xlu1 %4875, %v9111_v53   ;;  %v7275_v40 = vpop.permute.xlu1 %3618  ;;  %3910 = vperm.xlu2 %4876, %v9104_v56  }
 0x73b   : > { %9144 = vst [vmem:[#allocation130_spill] sm:$0xff] %v7275_v40  ;;  %v7288_v40 = vpop.permute.xlu2 %3722 }
 0x73c   : > { %9148 = vst [vmem:[#allocation67_spill] sm:$0xff] %v7288_v40 }
 0x742   : > { %4879 = vset.pattern.permute.xlu1 %v5008_v25  ;;  %v7283_v17 = vpop.permute.xlu1 %3630  ;;  %4880 = vset.pattern.permute.xlu2 %v5008_v25 }
 0x743   : > { %9147 = vst [vmem:[#allocation66_spill] sm:$0xff] %v7283_v17  ;;  %3982 = vperm.xlu1 %4879, %v9113_v20   ;;  %3986 = vperm.xlu2 %4880, %v9107_v41   ;;  %v4781_v17 = vld [vmem:[%s9150_s29] sm:$0xff]  ;;  %v7301_v40 = vpop.permute.xlu2 %3734 }
 0x744   : > { %9152 = vst [vmem:[#allocation19_spill] sm:$0xff] %v7301_v40 }
 0x746   : > { %v2929_v13 = vpop.f32.mrf.mxu2 }
 0x747   : > { %v2949_v50 = vpack.c.bf16 %v2929_v13, %v2929_v13 }
 0x749   : > { %v2984_v63 = vsel %vm2982_vm7, %v2949_v50, 0 }
 0x74a   : > { %2993 = vmatpush.bf16.msrb.mxu1 %v2984_v63  ;;  %v7296_v25 = vpop.permute.xlu1 %3642 }
 0x74b   : > { %9151 = vst [vmem:[#allocation18_spill] sm:$0xff] %v7296_v25  ;;  %3990 = vperm.xlu1 %4879, %v7094_v54   ;;  %3994 = vperm.xlu2 %4880, %v7096_v59  }
 0x74d   : > { %4684 = vmatmul.msk.bf16.vlgmr.msrb.gmra.mxu1 %vm2978_vm8, %v4781_v17  ;;  %v7314_v17 = vpop.permute.xlu2 %3742 }
 0x74e   : > { %v2931_v1 = vpop.f32.mrf.mxu2  ;;  %9155 = vst [vmem:[#allocation41_spill] sm:$0xff] %v7314_v17 }
 0x74f   : > { %v2950_v13 = vpack.c.bf16 %v2931_v1, %v2931_v1  ;;  %v4782_v1 = vld [vmem:[%s9150_s29 + $0x8] sm:$0xff] }
 0x751   : > { %v3009_v50 = vsel %vm2982_vm7, %v2950_v13, 0  ;;  %v7317_v13 = vpop.permute.xlu0 %3638 }
 0x752   : > { %3018 = vmatpush.bf16.msra.mxu1 %v3009_v50  ;;  %v7307_v63 = vpop.permute.xlu1 %3654  ;;  %9156 = vst [vmem:[#allocation44_spill] sm:$0xff] %v7317_v13 }
 0x753   : > { %4002 = vperm.xlu1 %4879, %v9096_v11   ;;  %9154 = vst [vmem:[#allocation34_spill] sm:$0xff] %v7307_v63  ;;  %4006 = vperm.xlu2 %4880, %v9097_v18   ;;  %v5009_v63 = vmov 7  }
 0x754   : > { %4882 = vset.pattern.permute.xlu0 %v5009_v63 }
 0x755   : > { %4110 = vperm.xlu0 %4882, %v9113_v20   ;;  %v7328_v13 = vpop.permute.xlu2 %3754 }
 0x756   : > { %v2934_v25 = vpop.f32.mrf.mxu2  ;;  %9159 = vst [vmem:[#allocation133_spill] sm:$0xff] %v7328_v13 }
 0x757   : > { %v2951_v4 = vpack.c.bf16 %v2934_v25, %v2934_v25 }
 0x759   : > { %v3034_v51 = vsel %vm2982_vm7, %v2951_v4, 0  ;;  %v7332_v17 = vpop.permute.xlu0 %3650 }
 0x75a   : > { %3043 = vmatpush.bf16.msrb.mxu1 %v3034_v51  ;;  %9160 = vst [vmem:[#allocation132_spill] sm:$0xff] %v7332_v17 }
 0x75b   : > { %4014 = vperm.xlu1 %4879, %v9100_v19   ;;  %v7319_v50 = vpop.permute.xlu1 %3730  ;;  %4018 = vperm.xlu2 %4880, %v9101_v35  }
 0x75c   : > { %9157 = vst [vmem:[#allocation129_spill] sm:$0xff] %v7319_v50 }
 0x75d   : > { %4689 = vmatmul.msk.bf16.vlgmr.msra.gmra.mxu1 %vm2978_vm8, %v4782_v1  ;;  %4130 = vperm.xlu0 %4882, %v9096_v11  }
 0x75e   : > { %v2936_v4 = vpop.f32.mrf.mxu2 }
 0x75f   : > { %v2952_v25 = vpack.c.bf16 %v2936_v4, %v2936_v4  ;;  %v4783_v4 = vld [vmem:[%s9150_s29 + $0x10] sm:$0xff] }
 0x761   : > { %v3059_v51 = vsel %vm2982_vm7, %v2952_v25, 0  ;;  %v4785_v25 = vld [vmem:[%s9150_s29 + $0x20] sm:$0xff]  ;;  %v7347_v11 = vpop.permute.xlu0 %3726 }
 0x762   : > { %3068 = vmatpush.bf16.msra.mxu1 %v3059_v51  ;;  %9162 = vst [vmem:[#allocation135_spill] sm:$0xff] %v7347_v11 }
 0x763   : > { %4026 = vperm.xlu1 %4879, %v9102_v42   ;;  %v7326_v34 = vpop.permute.xlu1 %3738  ;;  %4030 = vperm.xlu2 %4880, %v9103_v58  }
 0x764   : > { %9158 = vst [vmem:[#allocation128_spill] sm:$0xff] %v7326_v34 }
 0x765   : > { %4142 = vperm.xlu0 %4882, %v9100_v19  }
 0x766   : > { %v2939_v20 = vpop.f32.mrf.mxu2 }
 0x767   : > { %v2953_v40 = vpack.c.bf16 %v2939_v20, %v2939_v20  ;;  %v7349_v20 = vpop.permute.xlu2 %3766 }
 0x768   : > { %9163 = vst [vmem:[#allocation131_spill] sm:$0xff] %v7349_v20 }
 0x769   : > { %v3084_v1 = vsel %vm2982_vm7, %v2953_v40, 0 }
 0x76a   : > { %3093 = vmatpush.bf16.msra.mxu2 %v3084_v1 }
 0x76b   : > { %4038 = vperm.xlu1 %4879, %v9104_v56   ;;  %v7342_v51 = vpop.permute.xlu1 %3750  ;;  %4881 = vset.pattern.permute.xlu2 %v5009_v63 }
 0x76c   : > { %9161 = vst [vmem:[#allocation136_spill] sm:$0xff] %v7342_v51  ;;  %4106 = vperm.xlu2 %4881, %v9106_v47   ;;  %v9198_v51 = vld [vmem:[#allocation75_spill] sm:$0xff] }
 0x76d   : > { %4694 = vmatmul.msk.bf16.vlgmr.msrb.gmra.mxu1 %vm2978_vm8, %v4783_v4  ;;  %4704 = vmatmul.msk.bf16.vlgmr.msra.gmra.mxu2 %vm2978_vm8, %v4785_v25  ;;  %v7358_v25 = vpop.permute.xlu0 %3746 }
 0x76e   : > { %v2941_v40 = vpop.f32.mrf.mxu2  ;;  %4154 = vperm.xlu0 %4882, %v9102_v42   ;;  %9165 = vst [vmem:[#allocation138_spill] sm:$0xff] %v7358_v25 }
 0x76f   : > { %v2954_v17 = vpack.c.bf16 %v2941_v40, %v2941_v40  ;;  %v7360_v20 = vpop.permute.xlu2 %3778 }
 0x770   : > { %9166 = vst [vmem:[#allocation134_spill] sm:$0xff] %v7360_v20  ;;  %v9196_v20 = vld [vmem:[#allocation72_spill] sm:$0xff] }
 0x771   : > { %v3109_v1 = vsel %vm2982_vm7, %v2954_v17, 0 }
 0x772   : > { %3118 = vmatpush.bf16.msrb.mxu1 %v3109_v1  ;;  %v4788_v1 = vld [vmem:[%s9150_s29 + $0x38] sm:$0xff] }
 0x773   : > { %4883 = vset.pattern.permute.xlu1 %v5009_v63  ;;  %v7353_v13 = vpop.permute.xlu1 %3762  ;;  %v4784_v63 = vld [vmem:[%s9150_s29 + $0x18] sm:$0xff] }
 0x774   : > { %9164 = vst [vmem:[#allocation139_spill] sm:$0xff] %v7353_v13  ;;  %4114 = vperm.xlu1 %4883, %v9107_v41   ;;  %4118 = vperm.xlu2 %4881, %v7094_v54   ;;  %v4787_v41 = vld [vmem:[%s9150_s29 + $0x30] sm:$0xff] }
 0x776   : > { %v2944_v19 = vpop.f32.mrf.mxu2  ;;  %4166 = vperm.xlu0 %4882, %v9104_v56  }
 0x777   : > { %v2955_v4 = vpack.c.bf16 %v2944_v19, %v2944_v19  ;;  %v7380_v19 = vpop.permute.xlu0 %3758 }
 0x778   : > { %9168 = vst [vmem:[#allocation141_spill] sm:$0xff] %v7380_v19 }
 0x779   : > { %v3134_v47 = vsel %vm2982_vm7, %v2955_v4, 0 }
 0x77a   : > { %3143 = vmatpush.bf16.msrb.mxu3 %v3134_v47 }
 0x77b   : > { %v7369_v42 = vpop.permute.xlu1 %3774 }
 0x77c   : > { %9167 = vst [vmem:[#allocation142_spill] sm:$0xff] %v7369_v42  ;;  %4122 = vperm.xlu1 %4883, %v7096_v59   ;;  %4126 = vperm.xlu2 %4881, %v9108_v36   ;;  %v7382_v59 = vpop.permute.xlu2 %3854  ;;  %v4786_v36 = vld [vmem:[%s9150_s29 + $0x28] sm:$0xff] }
 0x77d   : > { %4699 = vmatmul.msk.bf16.vlgmr.msra.gmra.mxu1 %vm2978_vm8, %v4784_v63  ;;  %4714 = vmatmul.msk.bf16.vlgmr.msrb.gmra.mxu3 %vm2978_vm8, %v4787_v41  ;;  %9169 = vst [vmem:[#allocation137_spill] sm:$0xff] %v7382_v59 }
 0x77e   : > { %v2946_v54 = vpop.f32.mrf.mxu2 }
 0x77f   : > { %v2956_v17 = vpack.c.bf16 %v2946_v54, %v2946_v54  ;;  %v7392_v4 = vpop.permute.xlu0 %3770 }
 0x780   : > { %9171 = vst [vmem:[#allocation23_spill] sm:$0xff] %v7392_v4 }
 0x781   : > { %v3159_v40 = vsel %vm2982_vm7, %v2956_v17, 0 }
 0x782   : > { %3168 = vmatpush.bf16.msrb.mxu2 %v3159_v40 }
 0x784   : > { %4134 = vperm.xlu1 %4883, %v9097_v18   ;;  %v7385_v56 = vpop.permute.xlu1 %3850  ;;  %4138 = vperm.xlu2 %4881, %v9109_v38   ;;  %v7395_v47 = vpop.permute.xlu2 %3866 }
 0x785   : > { %9170 = vst [vmem:[#allocation29_spill] sm:$0xff] %v7385_v56  ;;  %4719 = vmatmul.msk.bf16.vlgmr.msrb.gmra.mxu2 %vm2978_vm8, %v4788_v1  ;;  %v9194_v56 = vld [vmem:[#allocation70_spill] sm:$0xff] }
 0x786   : > { %9172 = vst [vmem:[#allocation140_spill] sm:$0xff] %v7395_v47 }
 0x787   : > { %v7404_v38 = vpop.permute.xlu0 %3782 }
 0x788   : > { %9175 = vst [vmem:[#allocation50_spill] sm:$0xff] %v7404_v38 }
 0x78c   : > { %4146 = vperm.xlu1 %4883, %v9101_v35   ;;  %v7397_v63 = vpop.permute.xlu1 %3862  ;;  %4150 = vperm.xlu2 %4881, %v9110_v46   ;;  %v7406_v41 = vpop.permute.xlu2 %3874 }
 0x78d   : > { %9173 = vst [vmem:[#allocation47_spill] sm:$0xff] %v7397_v63  ;;  %4709 = vmatmul.msk.bf16.vlgmr.msrb.gmra.mxu1 %vm2978_vm8, %v4786_v36 }
 0x78e   : > { %9176 = vst [vmem:[#allocation86_spill] sm:$0xff] %v7406_v41 }
 0x78f   : > { %v7409_v54 = vpop.permute.xlu0 %3858 }
 0x790   : > { %9177 = vst [vmem:[#allocation73_spill] sm:$0xff] %v7409_v54 }
 0x794   : > { %4158 = vperm.xlu1 %4883, %v9103_v58   ;;  %v7402_v18 = vpop.permute.xlu1 %3870  ;;  %4162 = vperm.xlu2 %4881, %v9111_v53   ;;  %v7413_v17 = vpop.permute.xlu2 %3886 }
 0x795   : > { %9174 = vst [vmem:[#allocation56_spill] sm:$0xff] %v7402_v18 }
 0x796   : > { %9179 = vst [vmem:[#allocation74_spill] sm:$0xff] %v7413_v17 }
 0x797   : > { %v7415_v40 = vpop.permute.xlu0 %3878 }
 0x798   : > { %9180 = vst [vmem:[#allocation76_spill] sm:$0xff] %v7415_v40 }
 0x79c   : > { %v7411_v35 = vpop.permute.xlu1 %3882  ;;  %v7419_v46 = vpop.permute.xlu2 %3898 }
 0x79d   : > { %9178 = vst [vmem:[#allocation48_spill] sm:$0xff] %v7411_v35 }
 0x79e   : > { %9182 = vst [vmem:[#allocation78_spill] sm:$0xff] %v7419_v46 }
 0x79f   : > { %v7421_v58 = vpop.permute.xlu0 %3890 }
 0x7a0   : > { %9183 = vst [vmem:[#allocation88_spill] sm:$0xff] %v7421_v58  ;;  %v9192_v58 = vld [vmem:[#allocation79_spill] sm:$0xff] }
 0x7a4   : > { %v7417_v1 = vpop.permute.xlu1 %3894  ;;  %v7425_v18 = vpop.permute.xlu2 %3910 }
 0x7a5   : > { %9181 = vst [vmem:[#allocation49_spill] sm:$0xff] %v7417_v1 }
 0x7a6   : > { %9185 = vst [vmem:[#allocation92_spill] sm:$0xff] %v7425_v18 }
 0x7a7   : > { %v7427_v41 = vpop.permute.xlu0 %3902 }
 0x7a8   : > { %9186 = vst [vmem:[#allocation91_spill] sm:$0xff] %v7427_v41  ;;  %v9193_v41 = vld [vmem:[#allocation81_spill] sm:$0xff] }
 0x7ac   : > { %v7423_v36 = vpop.permute.xlu1 %3906  ;;  %v7429_v53 = vpop.permute.xlu2 %3986 }
 0x7ad   : > { %9184 = vst [vmem:[#allocation90_spill] sm:$0xff] %v7423_v36 }
 0x7ae   : > { %9187 = vst [vmem:[#allocation93_spill] sm:$0xff] %v7429_v53 }
 0x7af   : > { %v7433_v35 = vpop.permute.xlu0 %3978 }
 0x7b0   : > { %9189 = vst [vmem:[#allocation106_spill] sm:$0xff] %v7433_v35 }
 0x7b4   : > { %v7435_v17 = vpop.permute.xlu2 %3994 }
 0x7b5   : > { %v7431_v47 = vpop.permute.xlu1 %3982  ;;  %9190 = vst [vmem:[#allocation105_spill] sm:$0xff] %v7435_v17 }
 0x7b6   : > { %9188 = vst [vmem:[#allocation58_spill] sm:$0xff] %v7431_v47 }
 0x7b7   : > { %v7449_v35 = vpop.permute.xlu0 %3998 }
 0x7b8   : > { %9195 = vst [vmem:[#allocation63_spill] sm:$0xff] %v7449_v35 }
 0x7bc   : > { %v7455_v19 = vpop.permute.xlu2 %4006 }
 0x7bd   : > { %v7437_v40 = vpop.permute.xlu1 %3990  ;;  %9197 = vst [vmem:[#allocation36_spill] sm:$0xff] %v7455_v19 }
 0x7be   : > { %9191 = vst [vmem:[#allocation77_spill] sm:$0xff] %v7437_v40 }
 0x7c5   : > { %v7465_v35 = vpop.permute.xlu1 %4002 }
 0x7c6   : > { %9201 = vst [vmem:[#allocation60_spill] sm:$0xff] %v7465_v35  ;;  %v9237_v35 = vld [vmem:[#allocation125_spill] sm:$0xff] }
 0x7ca   : > { %v2995_v1 = vpop.f32.mrf.mxu1 }
 0x7cb   : > { %v3293_v46 = vmul.f32 %v7145_v57, %v2995_v1  ;;  %v3295_v63 = vmul.f32 %v9192_v58, %v2995_v1  ;;  %v3297_v36 = vmul.f32 %v7170_v2, %v2995_v1  ;;  %v3299_v18 = vmul.f32 %v7154_v15, %v2995_v1 }
 0x7cc   : > { %v3301_v54 = vmul.f32 %v9193_v41, %v2995_v1  ;;  %v3303_v59 = vmul.f32 %v7178_v45, %v2995_v1  ;;  %v3273_v53 = vmul.f32 %v9194_v56, %v2995_v1  ;;  %v3275_v47 = vmul.f32 %v7141_v16, %v2995_v1 }
 0x7cd   : > { %v3277_v17 = vmul.f32 %v7125_v28, %v2995_v1  ;;  %v3279_v40 = vmul.f32 %v7151_v8, %v2995_v1  ;;  %v3281_v38 = vmul.f32 %v7132_v49, %v2995_v1  ;;  %v3283_v42 = vmul.f32 %v9196_v20, %v2995_v1 }
 0x7ce   : > { %v3285_v4 = vmul.f32 %v7157_v7, %v2995_v1  ;;  %v3287_v13 = vmul.f32 %v7139_v9, %v2995_v1  ;;  %v3289_v25 = vmul.f32 %v9198_v51, %v2995_v1  ;;  %v3291_v34 = vmul.f32 %v7163_v30, %v2995_v1 }
 0x7cf   : > { %v7460_v50 = vadd.f32 %v3293_v46, %v6961_v39  ;;  %v7463_v11 = vadd.f32 %v3295_v63, %v6963_v52  ;;  %v7468_v32 = vadd.f32 %v3297_v36, %v6965_v61  ;;  %v7471_v23 = vadd.f32 %v3299_v18, %v6967_v14 }
 0x7d0   : > { %v7474_v19 = vadd.f32 %v3301_v54, %v6969_v60  ;;  %v7477_v22 = vadd.f32 %v3303_v59, %v6971_v48  ;;  %v7551_v54 = vadd.f32 %v3275_v47, %v6943_v44  ;;  %v9218_v44 = vld [vmem:[#allocation83_spill] sm:$0xff] }
 0x7d1   : > { %9199 = vst [vmem:[#allocation57_spill] sm:$0xff] %v7460_v50  ;;  %v7572_v47 = vadd.f32 %v3289_v25, %v9218_v44 }
 0x7d2   : > { %9200 = vst [vmem:[#allocation39_spill] sm:$0xff] %v7463_v11  ;;  %v2997_v1 = vpop.f32.mrf.mxu1 }
 0x7d3   : > { %9202 = vst [vmem:[#allocation68_spill] sm:$0xff] %v7468_v32  ;;  %v3274_v39 = vmul.f32 %v9194_v56, %v2997_v1  ;;  %v3276_v52 = vmul.f32 %v7141_v16, %v2997_v1  ;;  %v3278_v63 = vmul.f32 %v7125_v28, %v2997_v1  ;;  %v3280_v46 = vmul.f32 %v7151_v8, %v2997_v1 }
 0x7d4   : > { %9203 = vst [vmem:[#allocation61_spill] sm:$0xff] %v7471_v23  ;;  %v3282_v61 = vmul.f32 %v7132_v49, %v2997_v1  ;;  %v3284_v14 = vmul.f32 %v9196_v20, %v2997_v1  ;;  %v3286_v18 = vmul.f32 %v7157_v7, %v2997_v1  ;;  %v3288_v60 = vmul.f32 %v7139_v9, %v2997_v1 }
 0x7d5   : > { %9204 = vst [vmem:[#allocation54_spill] sm:$0xff] %v7474_v19  ;;  %v3290_v48 = vmul.f32 %v9198_v51, %v2997_v1  ;;  %v3292_v59 = vmul.f32 %v7163_v30, %v2997_v1  ;;  %v3294_v56 = vmul.f32 %v7145_v57, %v2997_v1  ;;  %v3296_v16 = vmul.f32 %v9192_v58, %v2997_v1  ;;  %v7545_v51 = vpop.permute.xlu2 %4018 }
 0x7d6   : > { %9205 = vst [vmem:[#allocation55_spill] sm:$0xff] %v7477_v22  ;;  %v3298_v28 = vmul.f32 %v7170_v2, %v2997_v1  ;;  %v3300_v8 = vmul.f32 %v7154_v15, %v2997_v1  ;;  %v3302_v49 = vmul.f32 %v9193_v41, %v2997_v1  ;;  %v3304_v20 = vmul.f32 %v7178_v45, %v2997_v1  ;;  %v7547_v41 = vpop.permute.xlu1 %4014 }
 0x7d7   : > { %v7496_v7 = vadd.f32 %v3274_v39, %v7057_v6  ;;  %v7499_v9 = vadd.f32 %v3276_v52, %v7059_v31  ;;  %v7502_v30 = vadd.f32 %v3278_v63, %v7061_v55  ;;  %v7505_v57 = vadd.f32 %v3280_v46, %v7063_v37  ;;  %9207 = vst [vmem:[#allocation82_spill] sm:$0xff] %v7545_v51  ;;  %v9214_v52 = vld [vmem:[#allocation16_spill] sm:$0xff]  ;;  %v9216_v46 = vld [vmem:[#allocation15_spill] sm:$0xff] }
 0x7d8   : > { %v7508_v2 = vadd.f32 %v3282_v61, %v7065_v43  ;;  %v7511_v15 = vadd.f32 %v3284_v14, %v7067_v12  ;;  %v7514_v45 = vadd.f32 %v3286_v18, %v7069_v33  ;;  %v7517_v6 = vadd.f32 %v3288_v60, %v7071_v24  ;;  %v7531_v12 = vpop.permute.xlu0 %4010  ;;  %9208 = vst [vmem:[#allocation113_spill] sm:$0xff] %v7547_v41  ;;  %v9223_v14 = vld [vmem:[#allocation45_spill] sm:$0xff]  ;;  %v9224_v18 = vld [vmem:[#allocation95_spill] sm:$0xff]  ;;  %v9236_v41 = vld [vmem:[#allocation98_spill] sm:$0xff] }
 0x7d9   : > { %v7520_v31 = vadd.f32 %v3290_v48, %v7073_v62  ;;  %v7523_v55 = vadd.f32 %v3292_v59, %v7075_v27  ;;  %v7526_v37 = vadd.f32 %v3294_v56, %v7077_v26  ;;  %v7529_v43 = vadd.f32 %v3296_v16, %v7079_v3  ;;  %9206 = vst [vmem:[#allocation80_spill] sm:$0xff] %v7531_v12  ;;  %v9226_v59 = vld [vmem:[#allocation97_spill] sm:$0xff] }
 0x7da   : > { %v7534_v33 = vadd.f32 %v3298_v28, %v7081_v29  ;;  %v7537_v24 = vadd.f32 %v3300_v8, %v7083_v21  ;;  %v7540_v62 = vadd.f32 %v3302_v49, %v7085_v0  ;;  %v7543_v27 = vadd.f32 %v3304_v20, %v7087_v5  ;;  %v3020_v26 = vpop.f32.mrf.mxu1  ;;  %v9209_v29 = vld [vmem:[#allocation65_spill] sm:$0xff]  ;;  %v9211_v0 = vld [vmem:[#allocation116_spill] sm:$0xff]  ;;  %9219 = vst [vmem:[#allocation27_spill] sm:$0xff] %v7572_v47  ;;  %v9229_v8 = vld [vmem:[#allocation99_spill] sm:$0xff] }
 0x7db   : > { %v3305_v3 = vadd.f32 %v3273_v53, %v6941_v10  ;;  %v7554_v58 = vadd.f32 %v3277_v17, %v9209_v29  ;;  %v9210_v21 = vld [vmem:[#allocation117_spill] sm:$0xff]  ;;  %v7560_v1 = vadd.f32 %v3281_v38, %v9211_v0  ;;  %v7566_v63 = vadd.f32 %v3285_v4, %v9214_v52  ;;  %v9230_v49 = vld [vmem:[#allocation94_spill] sm:$0xff] }
 0x7dc   : > { %v7557_v36 = vadd.f32 %v3279_v40, %v9210_v21  ;;  %v9212_v5 = vld [vmem:[#allocation69_spill] sm:$0xff]  ;;  %v7569_v10 = vadd.f32 %v3287_v13, %v9216_v46  ;;  %v9222_v40 = vld [vmem:[#allocation84_spill] sm:$0xff]  ;;  %v3403_v38 = vmul.f32 %v9223_v14, %v3020_v26  ;;  %v3405_v60 = vmul.f32 %v9224_v18, %v3020_v26  ;;  %v9234_v46 = vld [vmem:[#allocation122_spill] sm:$0xff] }
 0x7dd   : > { %v7563_v39 = vadd.f32 %v3283_v42, %v9212_v5  ;;  %9215 = vst [vmem:[#allocation71_spill] sm:$0xff] %v7566_v63  ;;  %v9220_v17 = vld [vmem:[#allocation85_spill] sm:$0xff]  ;;  %v3401_v61 = vmul.f32 %v9222_v40, %v3020_v26  ;;  %v9225_v42 = vld [vmem:[#allocation87_spill] sm:$0xff]  ;;  %v3409_v4 = vmul.f32 %v9226_v59, %v3020_v26  ;;  %v9228_v13 = vld [vmem:[#allocation120_spill] sm:$0xff]  ;;  %v3415_v25 = vmul.f32 %v9229_v8, %v3020_v26  ;;  %v7599_v47 = vpop.permute.xlu2 %4030 }
 0x7de   : > { %9217 = vst [vmem:[#allocation110_spill] sm:$0xff] %v7569_v10  ;;  %v7575_v53 = vadd.f32 %v3291_v34, %v9220_v17  ;;  %v3407_v48 = vmul.f32 %v9225_v42, %v3020_v26  ;;  %v9227_v56 = vld [vmem:[#allocation89_spill] sm:$0xff]  ;;  %v3413_v28 = vmul.f32 %v9228_v13, %v3020_v26  ;;  %v3417_v20 = vmul.f32 %v9230_v49, %v3020_v26  ;;  %v9233_v5 = vld [vmem:[#allocation96_spill] sm:$0xff]  ;;  %v9235_v17 = vld [vmem:[#allocation103_spill] sm:$0xff] }
 0x7df   : > { %9213 = vst [vmem:[#allocation114_spill] sm:$0xff] %v7563_v39  ;;  %v3411_v16 = vmul.f32 %v9227_v56, %v3020_v26  ;;  %v9231_v34 = vld [vmem:[#allocation121_spill] sm:$0xff]  ;;  %v3423_v52 = vmul.f32 %v9233_v5, %v3020_v26  ;;  %v3425_v44 = vmul.f32 %v9234_v46, %v3020_v26  ;;  %v3427_v51 = vmul.f32 %v9235_v17, %v3020_v26 }
 0x7e0   : > { %9221 = vst [vmem:[#allocation30_spill] sm:$0xff] %v7575_v53  ;;  %v3419_v29 = vmul.f32 %v9231_v34, %v3020_v26  ;;  %v9232_v21 = vld [vmem:[#allocation101_spill] sm:$0xff]  ;;  %v3429_v12 = vmul.f32 %v9236_v41, %v3020_v26  ;;  %v3431_v22 = vmul.f32 %v9237_v35, %v3020_v26  ;;  %v7593_v19 = vadd.f32 %v3401_v61, %v3305_v3  ;;  %v7601_v10 = vpop.permute.xlu0 %4022  ;;  %v7607_v61 = vpop.permute.xlu1 %4026 }
 0x7e1   : > { %v3421_v0 = vmul.f32 %v9232_v21, %v3020_v26  ;;  %9238 = vst [vmem:[#allocation109_spill] sm:$0xff] %v7599_v47 }
 0x7e2   : > { %v3022_v23 = vpop.f32.mrf.mxu1  ;;  %9239 = vst [vmem:[#allocation62_spill] sm:$0xff] %v7601_v10 }
 0x7e3   : > { %v3402_v32 = vmul.f32 %v9222_v40, %v3022_v23  ;;  %v3404_v11 = vmul.f32 %v9223_v14, %v3022_v23  ;;  %v3406_v50 = vmul.f32 %v9224_v18, %v3022_v23  ;;  %v3408_v53 = vmul.f32 %v9225_v42, %v3022_v23  ;;  %9240 = vst [vmem:[#allocation31_spill] sm:$0xff] %v7607_v61 }
 0x7e4   : > { %v3410_v63 = vmul.f32 %v9226_v59, %v3022_v23  ;;  %v3412_v39 = vmul.f32 %v9227_v56, %v3022_v23  ;;  %v3414_v26 = vmul.f32 %v9228_v13, %v3022_v23  ;;  %v3416_v3 = vmul.f32 %v9229_v8, %v3022_v23 }
 0x7e5   : > { %v3418_v40 = vmul.f32 %v9230_v49, %v3022_v23  ;;  %v3420_v14 = vmul.f32 %v9231_v34, %v3022_v23  ;;  %v3422_v18 = vmul.f32 %v9232_v21, %v3022_v23  ;;  %v3424_v42 = vmul.f32 %v9233_v5, %v3022_v23 }
 0x7e6   : > { %v3426_v47 = vmul.f32 %v9234_v46, %v3022_v23  ;;  %v3428_v59 = vmul.f32 %v9235_v17, %v3022_v23  ;;  %v3430_v56 = vmul.f32 %v9236_v41, %v3022_v23  ;;  %v3432_v13 = vmul.f32 %v9237_v35, %v3022_v23  ;;  %v9263_v17 = vld [vmem:[#allocation39_spill] sm:$0xff] }
 0x7e7   : > { %v7618_v8 = vadd.f32 %v3402_v32, %v7496_v7  ;;  %v7621_v61 = vadd.f32 %v3404_v11, %v7499_v9  ;;  %v7624_v49 = vadd.f32 %v3406_v50, %v7502_v30  ;;  %v7627_v34 = vadd.f32 %v3408_v53, %v7505_v57 }
 0x7e8   : > { %v7630_v21 = vadd.f32 %v3410_v63, %v7508_v2  ;;  %v7633_v5 = vadd.f32 %v3412_v39, %v7511_v15  ;;  %v7636_v23 = vadd.f32 %v3414_v26, %v7514_v45  ;;  %v7639_v32 = vadd.f32 %v3416_v3, %v7517_v6  ;;  %v9260_v63 = vld [vmem:[#allocation27_spill] sm:$0xff]  ;;  %v7680_v26 = vpop.permute.xlu2 %4106  ;;  %v7685_v3 = vpop.permute.xlu1 %4038 }
 0x7e9   : > { %9241 = vst [vmem:[#allocation108_spill] sm:$0xff] %v7618_v8  ;;  %v7642_v11 = vadd.f32 %v3418_v40, %v7520_v31  ;;  %v7645_v50 = vadd.f32 %v3420_v14, %v7523_v55  ;;  %v7648_v35 = vadd.f32 %v3422_v18, %v7526_v37  ;;  %v7651_v7 = vadd.f32 %v3424_v42, %v7529_v43  ;;  %v9257_v37 = vld [vmem:[#allocation114_spill] sm:$0xff]  ;;  %v9273_v40 = vld [vmem:[#allocation143_spill] sm:$0xff]  ;;  %v9276_v42 = vld [vmem:[#allocation20_spill] sm:$0xff] }
 0x7ea   : > { %9242 = vst [vmem:[#allocation37_spill] sm:$0xff] %v7621_v61  ;;  %v3045_v9 = vpop.f32.mrf.mxu1  ;;  %v7654_v30 = vadd.f32 %v3426_v47, %v7534_v33  ;;  %v7657_v57 = vadd.f32 %v3428_v59, %v7537_v24  ;;  %v7660_v2 = vadd.f32 %v3430_v56, %v7540_v62  ;;  %v7663_v15 = vadd.f32 %v3432_v13, %v7543_v27  ;;  %v9258_v33 = vld [vmem:[#allocation71_spill] sm:$0xff]  ;;  %v9259_v24 = vld [vmem:[#allocation110_spill] sm:$0xff]  ;;  %v9262_v27 = vld [vmem:[#allocation57_spill] sm:$0xff] }
 0x7eb   : > { %9243 = vst [vmem:[#allocation112_spill] sm:$0xff] %v7624_v49  ;;  %v3435_v45 = vadd.f32 %v3403_v38, %v7551_v54  ;;  %v3437_v6 = vadd.f32 %v3405_v60, %v7554_v58  ;;  %v3439_v31 = vadd.f32 %v3407_v48, %v7557_v36  ;;  %v3441_v55 = vadd.f32 %v3409_v4, %v7560_v1  ;;  %v9261_v47 = vld [vmem:[#allocation30_spill] sm:$0xff]  ;;  %v9264_v38 = vld [vmem:[#allocation68_spill] sm:$0xff]  ;;  %v9265_v60 = vld [vmem:[#allocation61_spill] sm:$0xff] }
 0x7ec   : > { %9244 = vst [vmem:[#allocation25_spill] sm:$0xff] %v7627_v34  ;;  %v3443_v43 = vadd.f32 %v3411_v16, %v9257_v37  ;;  %v3445_v41 = vadd.f32 %v3413_v28, %v9258_v33  ;;  %v3447_v39 = vadd.f32 %v3415_v25, %v9259_v24  ;;  %v3449_v62 = vadd.f32 %v3417_v20, %v9260_v63  ;;  %v9266_v48 = vld [vmem:[#allocation54_spill] sm:$0xff]  ;;  %v9267_v4 = vld [vmem:[#allocation55_spill] sm:$0xff]  ;;  %v7682_v28 = vpop.permute.xlu0 %4034  ;;  %v9270_v25 = vld [vmem:[#allocation28_spill] sm:$0xff] }
 0x7ed   : > { %9245 = vst [vmem:[#allocation33_spill] sm:$0xff] %v7630_v21  ;;  %v3451_v53 = vadd.f32 %v3419_v29, %v9261_v47  ;;  %v3453_v46 = vadd.f32 %v3421_v0, %v9262_v27  ;;  %v3455_v54 = vadd.f32 %v3423_v52, %v9263_v17  ;;  %v3457_v58 = vadd.f32 %v3425_v44, %v9264_v38  ;;  %v9272_v29 = vld [vmem:[#allocation100_spill] sm:$0xff]  ;;  %v9274_v14 = vld [vmem:[#allocation46_spill] sm:$0xff]  ;;  %v9279_v37 = vld [vmem:[#allocation53_spill] sm:$0xff] }
 0x7ee   : > { %9246 = vst [vmem:[#allocation26_spill] sm:$0xff] %v7633_v5  ;;  %v3459_v36 = vadd.f32 %v3427_v51, %v9265_v60  ;;  %v3461_v1 = vadd.f32 %v3429_v12, %v9266_v48  ;;  %v3463_v16 = vadd.f32 %v3431_v22, %v9267_v4  ;;  %v3529_v20 = vmul.f32 %v9270_v25, %v3045_v9  ;;  %v9275_v18 = vld [vmem:[#allocation102_spill] sm:$0xff]  ;;  %v9277_v59 = vld [vmem:[#allocation104_spill] sm:$0xff]  ;;  %v9280_v24 = vld [vmem:[#allocation119_spill] sm:$0xff] }
 0x7ef   : > { %9247 = vst [vmem:[#allocation35_spill] sm:$0xff] %v7636_v23  ;;  %v3531_v0 = vmul.f32 %v9272_v29, %v3045_v9  ;;  %v3533_v52 = vmul.f32 %v9273_v40, %v3045_v9  ;;  %v3535_v44 = vmul.f32 %v9274_v14, %v3045_v9  ;;  %v3537_v51 = vmul.f32 %v9275_v18, %v3045_v9  ;;  %v9278_v56 = vld [vmem:[#allocation32_spill] sm:$0xff]  ;;  %v9281_v47 = vld [vmem:[#allocation51_spill] sm:$0xff]  ;;  %v9283_v60 = vld [vmem:[#allocation21_spill] sm:$0xff] }
 0x7f0   : > { %9248 = vst [vmem:[#allocation38_spill] sm:$0xff] %v7639_v32  ;;  %v3539_v12 = vmul.f32 %v9276_v42, %v3045_v9  ;;  %v3541_v22 = vmul.f32 %v9277_v59, %v3045_v9  ;;  %v3543_v13 = vmul.f32 %v9278_v56, %v3045_v9  ;;  %v3545_v33 = vmul.f32 %v9279_v37, %v3045_v9  ;;  %v9282_v17 = vld [vmem:[#allocation111_spill] sm:$0xff]  ;;  %v3095_v21 = vpop.f32.mrf.mxu2 }
 0x7f1   : > { %9249 = vst [vmem:[#allocation40_spill] sm:$0xff] %v7642_v11  ;;  %v3547_v63 = vmul.f32 %v9280_v24, %v3045_v9  ;;  %v3549_v27 = vmul.f32 %v9281_v47, %v3045_v9  ;;  %v3551_v38 = vmul.f32 %v9282_v17, %v3045_v9  ;;  %v3553_v48 = vmul.f32 %v9283_v60, %v3045_v9  ;;  %v9284_v4 = vld [vmem:[#allocation59_spill] sm:$0xff] }
 0x7f2   : > { %9250 = vst [vmem:[#allocation43_spill] sm:$0xff] %v7645_v50  ;;  %v3047_v50 = vpop.f32.mrf.mxu1  ;;  %v7705_v11 = vadd.f32 %v3531_v0, %v3435_v45  ;;  %v7707_v32 = vadd.f32 %v3533_v52, %v3437_v6  ;;  %v7709_v23 = vadd.f32 %v3535_v44, %v3439_v31  ;;  %v7711_v5 = vadd.f32 %v3537_v51, %v3441_v55  ;;  %v9296_v44 = vld [vmem:[#allocation138_spill] sm:$0xff] }
 0x7f3   : > { %9251 = vst [vmem:[#allocation24_spill] sm:$0xff] %v7648_v35  ;;  %v7703_v35 = vadd.f32 %v3529_v20, %v7593_v19  ;;  %v7713_v34 = vadd.f32 %v3539_v12, %v3443_v43  ;;  %v7715_v49 = vadd.f32 %v3541_v22, %v3445_v41  ;;  %v7717_v61 = vadd.f32 %v3543_v13, %v3447_v39  ;;  %v9287_v41 = vld [vmem:[#allocation67_spill] sm:$0xff]  ;;  %v7738_v39 = vpop.permute.xlu1 %4114  ;;  %v9297_v12 = vld [vmem:[#allocation136_spill] sm:$0xff]  ;;  %v9298_v13 = vld [vmem:[#allocation133_spill] sm:$0xff] }
 0x7f4   : > { %9252 = vst [vmem:[#allocation79_spill] sm:$0xff] %v7651_v7  ;;  %v7721_v19 = vadd.f32 %v3547_v63, %v3451_v53  ;;  %v7723_v20 = vadd.f32 %v3549_v27, %v3453_v46  ;;  %v7725_v45 = vadd.f32 %v3551_v38, %v3455_v54  ;;  %v7727_v6 = vadd.f32 %v3553_v48, %v3457_v58  ;;  %v9290_v46 = vld [vmem:[#allocation129_spill] sm:$0xff]  ;;  %v9291_v54 = vld [vmem:[#allocation19_spill] sm:$0xff] }
 0x7f5   : > { %9253 = vst [vmem:[#allocation81_spill] sm:$0xff] %v7654_v30  ;;  %v9286_v30 = vld [vmem:[#allocation107_spill] sm:$0xff]  ;;  %v7736_v0 = vmul.f32 %v9287_v41, %v3095_v21  ;;  %v7744_v52 = vmul.f32 %v9290_v46, %v3095_v21  ;;  %v7747_v58 = vmul.f32 %v9291_v54, %v3095_v21  ;;  %v7760_v51 = vmul.f32 %v9296_v44, %v3095_v21  ;;  %v9299_v63 = vld [vmem:[#allocation141_spill] sm:$0xff]  ;;  %v9303_v44 = vld [vmem:[#allocation142_spill] sm:$0xff] }
 0x7f6   : > { %9254 = vst [vmem:[#allocation70_spill] sm:$0xff] %v7657_v57  ;;  %v3559_v7 = vmul.f32 %v9286_v30, %v3045_v9  ;;  %v7763_v22 = vmul.f32 %v9297_v12, %v3095_v21  ;;  %v7769_v27 = vmul.f32 %v9299_v63, %v3095_v21  ;;  %v9300_v38 = vld [vmem:[#allocation139_spill] sm:$0xff]  ;;  %v9304_v12 = vld [vmem:[#allocation134_spill] sm:$0xff]  ;;  %v7790_v63 = vmul.f32 %v9270_v25, %v3047_v50 }
 0x7f7   : > { %9255 = vst [vmem:[#allocation72_spill] sm:$0xff] %v7660_v2  ;;  %v9285_v2 = vld [vmem:[#allocation123_spill] sm:$0xff]  ;;  %v7772_v48 = vmul.f32 %v9300_v38, %v3095_v21  ;;  %v7784_v41 = vmul.f32 %v9304_v12, %v3095_v21  ;;  %v7805_v12 = vmul.f32 %v9276_v42, %v3047_v50  ;;  %v7811_v25 = vmul.f32 %v9278_v56, %v3047_v50 }
 0x7f8   : > { %9256 = vst [vmem:[#allocation75_spill] sm:$0xff] %v7663_v15  ;;  %v3555_v15 = vmul.f32 %v9284_v4, %v3045_v9  ;;  %v3557_v57 = vmul.f32 %v9285_v2, %v3045_v9  ;;  %v7719_v9 = vadd.f32 %v3545_v33, %v3449_v62  ;;  %v7733_v43 = vadd.f32 %v3559_v7, %v3463_v16  ;;  %v9289_v62 = vld [vmem:[#allocation135_spill] sm:$0xff]  ;;  %v7754_v7 = vpop.permute.xlu0 %4110 }
 0x7f9   : > { %9268 = vst [vmem:[#allocation65_spill] sm:$0xff] %v7680_v26  ;;  %v7741_v53 = vmul.f32 %v9289_v62, %v3095_v21  ;;  %v7766_v33 = vmul.f32 %v9298_v13, %v3095_v21  ;;  %v7781_v62 = vmul.f32 %v9303_v44, %v3095_v21  ;;  %v9305_v13 = vld [vmem:[#allocation50_spill] sm:$0xff]  ;;  %v7802_v44 = vmul.f32 %v9275_v18, %v3047_v50 }
 0x7fa   : > { %9269 = vst [vmem:[#allocation117_spill] sm:$0xff] %v7682_v28  ;;  %v7729_v31 = vadd.f32 %v3555_v15, %v3459_v36  ;;  %v7731_v55 = vadd.f32 %v3557_v57, %v3461_v1  ;;  %v9292_v15 = vld [vmem:[#allocation128_spill] sm:$0xff]  ;;  %v7752_v57 = vpop.permute.xlu2 %4118  ;;  %v9295_v1 = vld [vmem:[#allocation41_spill] sm:$0xff]  ;;  %v7787_v8 = vmul.f32 %v9305_v13, %v3095_v21  ;;  %v3070_v38 = vpop.f32.mrf.mxu1  ;;  %v7823_v18 = vmul.f32 %v9282_v17, %v3047_v50  ;;  %v9325_v17 = vld [vmem:[#allocation126_spill] sm:$0xff] }
 0x7fb   : > { %9271 = vst [vmem:[#allocation116_spill] sm:$0xff] %v7685_v3  ;;  %v7750_v36 = vmul.f32 %v9292_v15, %v3095_v21  ;;  %v7757_v16 = vmul.f32 %v9295_v1, %v3095_v21  ;;  %v9301_v15 = vld [vmem:[#allocation131_spill] sm:$0xff]  ;;  %v7826_v42 = vmul.f32 %v9283_v60, %v3047_v50  ;;  %v7832_v56 = vmul.f32 %v9285_v2, %v3047_v50 }
 0x7fc   : > { %9288 = vst [vmem:[#allocation69_spill] sm:$0xff] %v7738_v39  ;;  %v7775_v54 = vmul.f32 %v9301_v15, %v3095_v21  ;;  %v9302_v1 = vld [vmem:[#allocation23_spill] sm:$0xff]  ;;  %v7796_v15 = vmul.f32 %v9273_v40, %v3047_v50  ;;  %v7817_v40 = vmul.f32 %v9280_v24, %v3047_v50  ;;  %v9322_v24 = vld [vmem:[#allocation42_spill] sm:$0xff] }
 0x7fd   : > { %9293 = vst [vmem:[#allocation16_spill] sm:$0xff] %v7752_v57  ;;  %v7778_v46 = vmul.f32 %v9302_v1, %v3095_v21  ;;  %v7793_v57 = vmul.f32 %v9272_v29, %v3047_v50  ;;  %v7799_v1 = vmul.f32 %v9274_v14, %v3047_v50  ;;  %v7808_v21 = vmul.f32 %v9277_v59, %v3047_v50 }
 0x7fe   : > { %9294 = vst [vmem:[#allocation15_spill] sm:$0xff] %v7754_v7  ;;  %v7814_v29 = vmul.f32 %v9279_v37, %v3047_v50  ;;  %v7820_v14 = vmul.f32 %v9281_v47, %v3047_v50  ;;  %v7829_v59 = vmul.f32 %v9284_v4, %v3047_v50  ;;  %v7835_v37 = vmul.f32 %v9286_v30, %v3047_v50  ;;  %v9328_v4 = vld [vmem:[#allocation130_spill] sm:$0xff]  ;;  %v7846_v30 = vpop.permute.xlu1 %4122 }
 0x7ff   : > { %9306 = vst [vmem:[#allocation83_spill] sm:$0xff] %v7790_v63  ;;  %v3657_v13 = vmul.f32 %v9322_v24, %v3070_v38  ;;  %v9332_v24 = vld [vmem:[#allocation66_spill] sm:$0xff] }
 0x800   : > { %9307 = vst [vmem:[#allocation85_spill] sm:$0xff] %v7793_v57  ;;  %v3145_v50 = vpop.f32.mrf.mxu3 }
 0x801   : > { %9308 = vst [vmem:[#allocation84_spill] sm:$0xff] %v7796_v15 }
 0x802   : > { %9309 = vst [vmem:[#allocation45_spill] sm:$0xff] %v7799_v1  ;;  %v7864_v26 = vpop.f32.mrf.mxu1 }
 0x803   : > { %9310 = vst [vmem:[#allocation95_spill] sm:$0xff] %v7802_v44 }
 0x804   : > { %9311 = vst [vmem:[#allocation87_spill] sm:$0xff] %v7805_v12  ;;  %v9329_v12 = vld [vmem:[#allocation115_spill] sm:$0xff] }
 0x805   : > { %9312 = vst [vmem:[#allocation97_spill] sm:$0xff] %v7808_v21  ;;  %v3671_v2 = vmul.f32 %v9329_v12, %v3070_v38  ;;  %v9339_v12 = vld [vmem:[#allocation132_spill] sm:$0xff] }
 0x806   : > { %9313 = vst [vmem:[#allocation89_spill] sm:$0xff] %v7811_v25  ;;  %v9326_v25 = vld [vmem:[#allocation124_spill] sm:$0xff]  ;;  %v3685_v39 = vmul.f32 %v9339_v12, %v3070_v38 }
 0x807   : > { %9314 = vst [vmem:[#allocation120_spill] sm:$0xff] %v7814_v29  ;;  %v3665_v60 = vmul.f32 %v9326_v25, %v3070_v38  ;;  %v7852_v25 = vpop.permute.xlu2 %4126  ;;  %v3703_v12 = vadd.f32 %v3671_v2, %v7717_v61  ;;  %v9343_v61 = vld [vmem:[#allocation58_spill] sm:$0xff] }
 0x808   : > { %9315 = vst [vmem:[#allocation99_spill] sm:$0xff] %v7817_v40  ;;  %v9323_v40 = vld [vmem:[#allocation127_spill] sm:$0xff] }
 0x809   : > { %9316 = vst [vmem:[#allocation94_spill] sm:$0xff] %v7820_v14  ;;  %v3659_v47 = vmul.f32 %v9323_v40, %v3070_v38  ;;  %v9324_v14 = vld [vmem:[#allocation52_spill] sm:$0xff]  ;;  %v9333_v40 = vld [vmem:[#allocation118_spill] sm:$0xff] }
 0x80a   : > { %9317 = vst [vmem:[#allocation121_spill] sm:$0xff] %v7823_v18  ;;  %v3661_v29 = vmul.f32 %v9324_v14, %v3070_v38  ;;  %v3663_v18 = vmul.f32 %v9325_v17, %v3070_v38  ;;  %v3677_v1 = vmul.f32 %v9333_v40, %v3070_v38  ;;  %v9334_v14 = vld [vmem:[#allocation44_spill] sm:$0xff]  ;;  %v9335_v17 = vld [vmem:[#allocation18_spill] sm:$0xff] }
 0x80b   : > { %9318 = vst [vmem:[#allocation101_spill] sm:$0xff] %v7826_v42  ;;  %v9327_v42 = vld [vmem:[#allocation17_spill] sm:$0xff]  ;;  %v3679_v15 = vmul.f32 %v9334_v14, %v3070_v38  ;;  %v3681_v57 = vmul.f32 %v9335_v17, %v3070_v38  ;;  %v3697_v17 = vadd.f32 %v3665_v60, %v7711_v5  ;;  %v9354_v60 = vld [vmem:[#allocation31_spill] sm:$0xff] }
 0x80c   : > { %9319 = vst [vmem:[#allocation96_spill] sm:$0xff] %v7829_v59  ;;  %v3667_v21 = vmul.f32 %v9327_v42, %v3070_v38  ;;  %v3669_v59 = vmul.f32 %v9328_v4, %v3070_v38  ;;  %v7854_v42 = vpop.permute.xlu0 %4130  ;;  %v9338_v4 = vld [vmem:[#allocation64_spill] sm:$0xff]  ;;  %v3693_v40 = vadd.f32 %v3661_v29, %v7707_v32  ;;  %v3695_v14 = vadd.f32 %v3663_v18, %v7709_v23 }
 0x80d   : > { %9320 = vst [vmem:[#allocation122_spill] sm:$0xff] %v7832_v56  ;;  %v9330_v56 = vld [vmem:[#allocation22_spill] sm:$0xff]  ;;  %v3683_v63 = vmul.f32 %v9338_v4, %v3070_v38  ;;  %v3711_v32 = vadd.f32 %v3679_v15, %v7725_v45  ;;  %v3713_v23 = vadd.f32 %v3681_v57, %v7727_v6  ;;  %v7881_v29 = vmul.f32 %v9343_v61, %v3145_v50  ;;  %v9346_v45 = vld [vmem:[#allocation105_spill] sm:$0xff] }
 0x80e   : > { %9321 = vst [vmem:[#allocation103_spill] sm:$0xff] %v7835_v37  ;;  %v3673_v44 = vmul.f32 %v9330_v56, %v3070_v38  ;;  %v3675_v37 = vmul.f32 %v9332_v24, %v3070_v38  ;;  %v9340_v56 = vld [vmem:[#allocation34_spill] sm:$0xff]  ;;  %v3691_v24 = vadd.f32 %v3659_v47, %v7705_v11  ;;  %v3701_v4 = vadd.f32 %v3669_v59, %v7715_v49 }
 0x80f   : > { %9331 = vst [vmem:[#allocation98_spill] sm:$0xff] %v7846_v30  ;;  %v3687_v7 = vmul.f32 %v9340_v56, %v3070_v38  ;;  %v3689_v30 = vadd.f32 %v3657_v13, %v7703_v35  ;;  %v3709_v11 = vadd.f32 %v3677_v1, %v7723_v20  ;;  %v3715_v5 = vadd.f32 %v3683_v63, %v7729_v31  ;;  %v9345_v20 = vld [vmem:[#allocation77_spill] sm:$0xff]  ;;  %v9347_v31 = vld [vmem:[#allocation63_spill] sm:$0xff]  ;;  %v9352_v59 = vld [vmem:[#allocation82_spill] sm:$0xff]  ;;  %v7916_v56 = vpop.f32.mrf.mxu3 }
 0x810   : > { %9336 = vst [vmem:[#allocation125_spill] sm:$0xff] %v7852_v25  ;;  %v3705_v38 = vadd.f32 %v3673_v44, %v7719_v9  ;;  %v3707_v35 = vadd.f32 %v3675_v37, %v7721_v19  ;;  %v3717_v13 = vadd.f32 %v3685_v39, %v7731_v55  ;;  %v9344_v9 = vld [vmem:[#allocation93_spill] sm:$0xff]  ;;  %v7887_v1 = vmul.f32 %v9345_v20, %v3145_v50  ;;  %v9348_v55 = vld [vmem:[#allocation60_spill] sm:$0xff]  ;;  %v7928_v25 = vpop.permute.xlu1 %4134 }
 0x811   : > { %9337 = vst [vmem:[#allocation114_spill] sm:$0xff] %v7854_v42  ;;  %v3699_v42 = vadd.f32 %v3667_v21, %v7713_v34  ;;  %v3719_v34 = vadd.f32 %v3687_v7, %v7733_v43  ;;  %v9342_v21 = vld [vmem:[#allocation106_spill] sm:$0xff]  ;;  %v7884_v19 = vmul.f32 %v9344_v9, %v3145_v50  ;;  %v7890_v6 = vmul.f32 %v9346_v45, %v3145_v50  ;;  %v9349_v39 = vld [vmem:[#allocation36_spill] sm:$0xff]  ;;  %v9351_v63 = vld [vmem:[#allocation113_spill] sm:$0xff] }
 0x812   : > { %9341 = vst [vmem:[#allocation71_spill] sm:$0xff] %v7864_v26  ;;  %v7878_v49 = vmul.f32 %v9342_v21, %v3145_v50  ;;  %v7893_v15 = vmul.f32 %v9347_v31, %v3145_v50  ;;  %v7896_v43 = vmul.f32 %v9348_v55, %v3145_v50  ;;  %v7899_v57 = vmul.f32 %v9349_v39, %v3145_v50  ;;  %v9350_v7 = vld [vmem:[#allocation80_spill] sm:$0xff]  ;;  %v9357_v26 = vld [vmem:[#allocation109_spill] sm:$0xff] }
 0x813   : > { %v7902_v44 = vmul.f32 %v9350_v7, %v3145_v50  ;;  %v7905_v18 = vmul.f32 %v9351_v63, %v3145_v50  ;;  %v7908_v37 = vmul.f32 %v9352_v59, %v3145_v50  ;;  %v7911_v47 = vmul.f32 %v7601_v10, %v3145_v50  ;;  %9356 = vst [vmem:[#allocation30_spill] sm:$0xff] %v7916_v56 }
 0x814   : > { %v7914_v2 = vmul.f32 %v9354_v60, %v3145_v50  ;;  %v7919_v39 = vmul.f32 %v9357_v26, %v3145_v50  ;;  %v7922_v7 = vmul.f32 %v7682_v28, %v3145_v50  ;;  %v7925_v63 = vmul.f32 %v7685_v3, %v3145_v50  ;;  %9359 = vst [vmem:[#allocation39_spill] sm:$0xff] %v7928_v25  ;;  %v7934_v26 = vpop.permute.xlu2 %4138 }
 0x815   : > { %9353 = vst [vmem:[#allocation110_spill] sm:$0xff] %v7911_v47  ;;  %v3817_v59 = vadd.f32 %v7736_v0, %v3689_v30  ;;  %v3819_v10 = vadd.f32 %v7741_v53, %v3691_v24  ;;  %v3821_v60 = vadd.f32 %v7744_v52, %v3693_v40  ;;  %v3825_v47 = vadd.f32 %v7750_v36, %v3697_v17 }
 0x816   : > { %9355 = vst [vmem:[#allocation27_spill] sm:$0xff] %v7914_v2  ;;  %v3823_v2 = vadd.f32 %v7747_v58, %v3695_v14  ;;  %v7940_v50 = vmul.f32 %v9342_v21, %v7916_v56  ;;  %v3827_v0 = vadd.f32 %v7757_v16, %v3699_v42  ;;  %v3829_v30 = vadd.f32 %v7760_v51, %v3701_v4  ;;  %v3120_v16 = vpop.f32.mrf.mxu1 }
 0x817   : > { %9358 = vst [vmem:[#allocation57_spill] sm:$0xff] %v7919_v39  ;;  %v7936_v39 = vpop.permute.xlu0 %4142  ;;  %v3831_v53 = vadd.f32 %v7763_v22, %v3703_v12  ;;  %v7947_v52 = vmul.f32 %v9343_v61, %v7916_v56  ;;  %v7951_v58 = vmul.f32 %v9344_v9, %v7916_v56  ;;  %v7955_v36 = vmul.f32 %v9345_v20, %v7916_v56  ;;  %v9369_v9 = vld [vmem:[#allocation29_spill] sm:$0xff] }
 0x818   : > { %9360 = vst [vmem:[#allocation68_spill] sm:$0xff] %v7934_v26  ;;  %v7959_v40 = vmul.f32 %v9346_v45, %v7916_v56  ;;  %v7963_v51 = vmul.f32 %v9347_v31, %v7916_v56  ;;  %v7967_v12 = vmul.f32 %v9348_v55, %v7916_v56  ;;  %v3833_v22 = vadd.f32 %v7766_v33, %v3705_v38  ;;  %v9370_v45 = vld [vmem:[#allocation137_spill] sm:$0xff]  ;;  %v7979_v55 = vpop.f32.mrf.mxu2  ;;  %v9373_v38 = vld [vmem:[#allocation47_spill] sm:$0xff] }
 0x819   : > { %9361 = vst [vmem:[#allocation61_spill] sm:$0xff] %v7936_v39  ;;  %v3835_v14 = vadd.f32 %v7769_v27, %v3707_v35  ;;  %v3837_v42 = vadd.f32 %v7772_v48, %v3709_v11  ;;  %v3839_v24 = vadd.f32 %v7775_v54, %v3711_v32  ;;  %v3841_v17 = vadd.f32 %v7778_v46, %v3713_v23  ;;  %v9372_v33 = vld [vmem:[#allocation73_spill] sm:$0xff]  ;;  %v9374_v35 = vld [vmem:[#allocation140_spill] sm:$0xff]  ;;  %v9376_v32 = vld [vmem:[#allocation86_spill] sm:$0xff] }
 0x81a   : > { %9362 = vst [vmem:[#allocation54_spill] sm:$0xff] %v7940_v50  ;;  %v3843_v4 = vadd.f32 %v7781_v62, %v3715_v5  ;;  %v3845_v21 = vadd.f32 %v7784_v41, %v3717_v13  ;;  %v3847_v61 = vadd.f32 %v7787_v8, %v3719_v34  ;;  %v3913_v20 = vmul.f32 %v9369_v9, %v3120_v16  ;;  %v9375_v11 = vld [vmem:[#allocation56_spill] sm:$0xff]  ;;  %v9379_v13 = vld [vmem:[#allocation74_spill] sm:$0xff] }
 0x81b   : > { %9363 = vst [vmem:[#allocation55_spill] sm:$0xff] %v7947_v52  ;;  %v3915_v31 = vmul.f32 %v9370_v45, %v3120_v16  ;;  %v3917_v27 = vmul.f32 %v9372_v33, %v3120_v16  ;;  %v3919_v48 = vmul.f32 %v9373_v38, %v3120_v16  ;;  %v3921_v54 = vmul.f32 %v9374_v35, %v3120_v16  ;;  %v9377_v23 = vld [vmem:[#allocation76_spill] sm:$0xff]  ;;  %v9382_v52 = vld [vmem:[#allocation78_spill] sm:$0xff] }
 0x81c   : > { %9364 = vst [vmem:[#allocation28_spill] sm:$0xff] %v7951_v58  ;;  %v3923_v46 = vmul.f32 %v9375_v11, %v3120_v16  ;;  %v3925_v62 = vmul.f32 %v9376_v32, %v3120_v16  ;;  %v3927_v41 = vmul.f32 %v9377_v23, %v3120_v16  ;;  %v9378_v5 = vld [vmem:[#allocation48_spill] sm:$0xff]  ;;  %v3931_v34 = vmul.f32 %v9379_v13, %v3120_v16  ;;  %v9384_v33 = vld [vmem:[#allocation90_spill] sm:$0xff]  ;;  %v7997_v28 = vpop.permute.xlu2 %4150 }
 0x81d   : > { %9365 = vst [vmem:[#allocation100_spill] sm:$0xff] %v7955_v36  ;;  %v3929_v8 = vmul.f32 %v9378_v5, %v3120_v16  ;;  %v9381_v36 = vld [vmem:[#allocation49_spill] sm:$0xff]  ;;  %v3937_v50 = vmul.f32 %v9382_v52, %v3120_v16  ;;  %v3941_v35 = vmul.f32 %v9384_v33, %v3120_v16  ;;  %v9385_v45 = vld [vmem:[#allocation92_spill] sm:$0xff]  ;;  %v3945_v9 = vadd.f32 %v3913_v20, %v3817_v59 }
 0x81e   : > { %9366 = vst [vmem:[#allocation143_spill] sm:$0xff] %v7959_v40  ;;  %v3935_v58 = vmul.f32 %v9381_v36, %v3120_v16  ;;  %v3943_v11 = vmul.f32 %v9385_v45, %v3120_v16  ;;  %v3947_v32 = vadd.f32 %v3915_v31, %v3819_v10  ;;  %v3949_v23 = vadd.f32 %v3917_v27, %v3821_v60 }
 0x81f   : > { %9367 = vst [vmem:[#allocation46_spill] sm:$0xff] %v7963_v51  ;;  %v9380_v51 = vld [vmem:[#allocation88_spill] sm:$0xff]  ;;  %v3951_v5 = vadd.f32 %v3919_v48, %v3823_v2  ;;  %v3953_v3 = vadd.f32 %v3921_v54, %v3825_v47  ;;  %v3955_v13 = vadd.f32 %v3923_v46, %v3827_v0  ;;  %v3957_v36 = vadd.f32 %v3925_v62, %v3829_v30 }
 0x820   : > { %9368 = vst [vmem:[#allocation102_spill] sm:$0xff] %v7967_v12  ;;  %v3933_v40 = vmul.f32 %v9380_v51, %v3120_v16  ;;  %v9383_v12 = vld [vmem:[#allocation91_spill] sm:$0xff]  ;;  %v7999_v51 = vpop.permute.xlu0 %4154  ;;  %v3959_v52 = vadd.f32 %v3927_v41, %v3831_v53  ;;  %v3961_v56 = vadd.f32 %v3929_v8, %v3833_v22  ;;  %v3967_v33 = vadd.f32 %v3935_v58, %v3839_v24  ;;  %v3170_v47 = vpop.f32.mrf.mxu2  ;;  %v9391_v24 = vld [vmem:[#allocation57_spill] sm:$0xff] }
 0x821   : > { %9371 = vst [vmem:[#allocation20_spill] sm:$0xff] %v7979_v55  ;;  %v3939_v38 = vmul.f32 %v9383_v12, %v3120_v16  ;;  %v7995_v55 = vpop.permute.xlu1 %4146  ;;  %v3963_v12 = vadd.f32 %v3931_v34, %v3835_v14  ;;  %v3969_v26 = vadd.f32 %v3937_v50, %v3841_v17  ;;  %v3973_v59 = vadd.f32 %v3941_v35, %v3845_v21  ;;  %v8033_v35 = vld [vmem:[%s9402_s22] ss:$0 sm:$0xff]  ;;  %s4946_s22 = sshra.s32 %s4349_s1, 4  ;;  %s4947_s22 = int_to_ptr.hbm [resolvable:$true] %s4946_s22 }
 0x822   : > { %9386 = vst [vmem:[#allocation104_spill] sm:$0xff] %v7995_v55  ;;  %v3965_v39 = vadd.f32 %v3933_v40, %v3837_v42  ;;  %v3975_v10 = vadd.f32 %v3943_v11, %v3847_v61  ;;  %v4073_v20 = vadd.f32 %v7878_v49, %v3945_v9  ;;  %v4075_v60 = vadd.f32 %v7881_v29, %v3947_v32  ;;  %v9389_v29 = vld [vmem:[#allocation110_spill] sm:$0xff]  ;;  %v9390_v42 = vld [vmem:[#allocation27_spill] sm:$0xff]  ;;  %v9399_v61 = vld [vmem:[#allocation68_spill] sm:$0xff]  ;;  %s4948_s21 = scalar_lea.hbm %s4947_s22, 256  ;;  %p4953_p0 = scmp.lt.s32.totalorder %s4947_s22, %s9526_s28 }
 0x823   : > { %9387 = vst [vmem:[#allocation32_spill] sm:$0xff] %v7997_v28  ;;  %v3971_v16 = vadd.f32 %v3939_v38, %v3843_v4  ;;  %v4077_v2 = vadd.f32 %v7884_v19, %v3949_v23  ;;  %v4079_v0 = vadd.f32 %v7887_v1, %v3951_v5  ;;  %v4081_v30 = vadd.f32 %v7890_v6, %v3953_v3  ;;  %v9398_v4 = vld [vmem:[#allocation114_spill] sm:$0xff]  ;;  %v9400_v9 = vld [vmem:[#allocation61_spill] sm:$0xff]  ;;  %p4949_p6 = scmp.ne.s32.totalorder %s4947_s22, %s4948_s21  ;;  %p4954_p1 = scmp.lt.s32.totalorder %s4952_s24, %s4948_s21 }
 0x824   : > { %9388 = vst [vmem:[#allocation53_spill] sm:$0xff] %v7999_v51  ;;  %v4083_v53 = vadd.f32 %v7893_v15, %v3955_v13  ;;  %v4085_v40 = vadd.f32 %v7896_v43, %v3957_v36  ;;  %v4087_v50 = vadd.f32 %v7899_v57, %v3959_v52  ;;  %v4089_v58 = vadd.f32 %v7902_v44, %v3961_v56  ;;  %v9392_v15 = vld [vmem:[#allocation65_spill] sm:$0xff]  ;;  %v9393_v36 = vld [vmem:[#allocation15_spill] sm:$0xff]  ;;  %v9395_v44 = vld [vmem:[#allocation16_spill] sm:$0xff]  ;;  %v8035_v54 = vpop.permute.xlu2 %4162 }
 0x825   : > { %v4091_v22 = vadd.f32 %v7905_v18, %v3963_v12  ;;  %v4093_v49 = vadd.f32 %v7908_v37, %v3965_v39  ;;  %v4095_v14 = vadd.f32 %v9389_v29, %v3967_v33  ;;  %v4097_v19 = vadd.f32 %v9390_v42, %v3969_v26  ;;  %v9394_v52 = vld [vmem:[#allocation69_spill] sm:$0xff]  ;;  %v9396_v12 = vld [vmem:[#allocation98_spill] sm:$0xff]  ;;  %9403 = vst [vmem:[#allocation51_spill] sm:$0xff] %v8033_v35  ;;  %p4950_p9 = pnand %p4949_p6, %p5152_p11  ;;  %p4955_p3 = por %p4954_p1, %p4953_p0 }
 0x826   : > { %v4099_v1 = vadd.f32 %v9391_v24, %v3971_v16  ;;  %v4101_v3 = vadd.f32 %v7922_v7, %v3973_v59  ;;  %v4103_v6 = vadd.f32 %v7925_v63, %v3975_v10  ;;  %v4169_v43 = vmul.f32 %v9392_v15, %v3170_v47  ;;  %v9397_v37 = vld [vmem:[#allocation125_spill] sm:$0xff]  ;;  %9404 = vst [vmem:[#allocation111_spill] sm:$0xff] %v8035_v54 }
 0x827   : > { %v4171_v57 = vmul.f32 %v9393_v36, %v3170_v47  ;;  %v4173_v56 = vmul.f32 %v9394_v52, %v3170_v47  ;;  %v4175_v18 = vmul.f32 %v9395_v44, %v3170_v47  ;;  %v4177_v39 = vmul.f32 %v9396_v12, %v3170_v47  ;;  %v9487_v12 = vld [vmem:[#allocation78_spill] sm:$0xff]  ;;  %p4951_p13 = pneg %p4950_p9 }
 0x828   : > { %v4179_v17 = vmul.f32 %v9397_v37, %v3170_v47  ;;  %v4181_v26 = vmul.f32 %v9398_v4, %v3170_v47  ;;  %v4183_v21 = vmul.f32 %v7928_v25, %v3170_v47  ;;  %v4185_v7 = vmul.f32 %v9399_v61, %v3170_v47  ;;  %v8037_v11 = vpop.permute.xlu0 %4166 }
 0x829   : > { %v4187_v63 = vmul.f32 %v9400_v9, %v3170_v47  ;;  %v8027_v31 = vpop.permute.xlu1 %4158  ;;  %v4189_v33 = vmul.f32 %v7995_v55, %v3170_v47  ;;  %v4201_v27 = vadd.f32 %v4169_v43, %v4073_v20  ;;  %v4203_v38 = vadd.f32 %v4171_v57, %v4075_v60  ;;  %9405 = vst [vmem:[#allocation21_spill] sm:$0xff] %v8037_v11  ;;  %p4956_p4 = pnand %p4955_p3, %p4951_p13 }
 0x82a   : > { %9401 = vst [vmem:[#allocation119_spill] sm:$0xff] %v8027_v31  ;;  %v4205_v48 = vadd.f32 %v4173_v56, %v4077_v2  ;;  %v4191_v46 = vmul.f32 %v7997_v28, %v3170_v47  ;;  %v4193_v32 = vmul.f32 %v7999_v51, %v3170_v47  ;;  %v4195_v62 = vmul.f32 %v8027_v31, %v3170_v47  ;;  %v9465_v28 = vld [vmem:[#allocation44_spill] sm:$0xff] }
 0x82b   : > { %v4207_v23 = vadd.f32 %v4175_v18, %v4079_v0  ;;  %v4197_v41 = vmul.f32 %v8035_v54, %v3170_v47  ;;  %v4199_v5 = vmul.f32 %v8037_v11, %v3170_v47  ;;  %v4209_v8 = vadd.f32 %v4177_v39, %v4081_v30  ;;  %v9461_v54 = vld [vmem:[#allocation115_spill] sm:$0xff] }
 0x82c   : > { %v4211_v13 = vadd.f32 %v4179_v17, %v4083_v53  ;;  %v4213_v34 = vadd.f32 %v4181_v26, %v4085_v40  ;;  %v4215_v16 = vadd.f32 %v4183_v21, %v4087_v50  ;;  %v4217_v59 = vadd.f32 %v4185_v7, %v4089_v58 }
 0x82d   : > { %v4219_v10 = vadd.f32 %v4187_v63, %v4091_v22  ;;  %v4221_v20 = vadd.f32 %v4189_v33, %v4093_v49  ;;  %v4237_v60 = vadd.f32 %v8033_v35, %v4201_v27  ;;  %v4239_v2 = vadd.f32 %v8033_v35, %v4203_v38  ;;  %v9406_v38 = vld [vmem:[#allocation108_spill] sm:$0xff] }
 0x82e   : > { %v4241_v29 = vadd.f32 %v8033_v35, %v4205_v48  ;;  %v4223_v42 = vadd.f32 %v4191_v46, %v4095_v14  ;;  %v4225_v24 = vadd.f32 %v4193_v32, %v4097_v19  ;;  %v4227_v0 = vadd.f32 %v4195_v62, %v4099_v1  ;;  %v9407_v48 = vld [vmem:[#allocation83_spill] sm:$0xff]  ;;  %v9408_v32 = vld [vmem:[#allocation37_spill] sm:$0xff] }
 0x82f   : > { %v4243_v43 = vadd.f32 %v8033_v35, %v4207_v23  ;;  %v4229_v57 = vadd.f32 %v4197_v41, %v4101_v3  ;;  %v4231_v47 = vadd.f32 %v4199_v5, %v4103_v6  ;;  %v4245_v30 = vadd.f32 %v8033_v35, %v4209_v8  ;;  %v9409_v62 = vld [vmem:[#allocation85_spill] sm:$0xff]  ;;  %v9410_v41 = vld [vmem:[#allocation112_spill] sm:$0xff] }
 0x830   : > { %v4247_v53 = vadd.f32 %v8033_v35, %v4211_v13  ;;  %v4249_v40 = vadd.f32 %v8033_v35, %v4213_v34  ;;  %v4251_v50 = vadd.f32 %v8033_v35, %v4215_v16  ;;  %v4253_v58 = vadd.f32 %v8033_v35, %v4217_v59  ;;  %v9411_v5 = vld [vmem:[#allocation84_spill] sm:$0xff]  ;;  %v9412_v13 = vld [vmem:[#allocation25_spill] sm:$0xff] }
 0x831   : > { %v4255_v22 = vadd.f32 %v8033_v35, %v4219_v10  ;;  %v4257_v49 = vadd.f32 %v8033_v35, %v4221_v20  ;;  %v4269_v14 = vmax.f32 %v4237_v60, 0.0  ;;  %v4271_v19 = vmax.f32 %v4239_v2, 0.0  ;;  %v9413_v34 = vld [vmem:[#allocation45_spill] sm:$0xff]  ;;  %v9415_v10 = vld [vmem:[#allocation95_spill] sm:$0xff]  ;;  %v9416_v60 = vld [vmem:[#allocation26_spill] sm:$0xff] }
 0x832   : > { %v4273_v1 = vmax.f32 %v4241_v29, 0.0  ;;  %v4259_v3 = vadd.f32 %v8033_v35, %v4223_v42  ;;  %v8057_v6 = vadd.f32 %v8033_v35, %v4225_v24  ;;  %v8060_v56 = vadd.f32 %v8033_v35, %v4227_v0  ;;  %v9414_v59 = vld [vmem:[#allocation33_spill] sm:$0xff]  ;;  %v9417_v2 = vld [vmem:[#allocation87_spill] sm:$0xff] }
 0x833   : > { %v4275_v18 = vmax.f32 %v4243_v43, 0.0  ;;  %v8063_v39 = vadd.f32 %v8033_v35, %v4229_v57  ;;  %v8066_v17 = vadd.f32 %v8033_v35, %v4231_v47  ;;  %v4277_v26 = vmax.f32 %v4245_v30, 0.0  ;;  %4301 = vst [vmem:[%s8070_s4] sm:$0xff] %v4269_v14  ;;  %v9418_v42 = vld [vmem:[#allocation35_spill] sm:$0xff]  ;;  %v9419_v24 = vld [vmem:[#allocation97_spill] sm:$0xff]  ;;  %v9420_v43 = vld [vmem:[#allocation38_spill] sm:$0xff] }
 0x834   : > { %v4279_v21 = vmax.f32 %v4247_v53, 0.0  ;;  %v4281_v7 = vmax.f32 %v4249_v40, 0.0  ;;  %v4283_v63 = vmax.f32 %v4251_v50, 0.0  ;;  %v4285_v33 = vmax.f32 %v4253_v58, 0.0  ;;  %4303 = vst [vmem:[%s8070_s4 + $0x10] sm:$0xff] %v4271_v19  ;;  %v9421_v57 = vld [vmem:[#allocation89_spill] sm:$0xff] }
 0x835   : > { %v4287_v27 = vmax.f32 %v4255_v22, 0.0  ;;  %4305 = vst [vmem:[%s8070_s4 + $0x20] sm:$0xff] %v4273_v1  ;;  %v3562_v46 = vadd.f32 %v9407_v48, %v9406_v38  ;;  %v3564_v23 = vadd.f32 %v9409_v62, %v9408_v32  ;;  %v8081_v8 = vadd.f32 %v9411_v5, %v9410_v41  ;;  %v9422_v30 = vld [vmem:[#allocation40_spill] sm:$0xff]  ;;  %v9424_v50 = vld [vmem:[#allocation43_spill] sm:$0xff]  ;;  %v9427_v19 = vld [vmem:[#allocation94_spill] sm:$0xff] }
 0x836   : > { %v8085_v16 = vadd.f32 %v9413_v34, %v9412_v13  ;;  %4307 = vst [vmem:[%s8070_s4 + $0x30] sm:$0xff] %v4275_v18  ;;  %v3570_v20 = vadd.f32 %v9415_v10, %v9414_v59  ;;  %v3572_v29 = vadd.f32 %v9417_v2, %v9416_v60  ;;  %v3574_v0 = vadd.f32 %v9419_v24, %v9418_v42  ;;  %v9423_v53 = vld [vmem:[#allocation120_spill] sm:$0xff]  ;;  %v9425_v58 = vld [vmem:[#allocation99_spill] sm:$0xff]  ;;  %v9429_v38 = vld [vmem:[#allocation121_spill] sm:$0xff] }
 0x837   : > { %v3576_v47 = vadd.f32 %v9421_v57, %v9420_v43  ;;  %4309 = vst [vmem:[%s8070_s4 + $0x40] sm:$0xff] %v4277_v26  ;;  %v3578_v40 = vadd.f32 %v9423_v53, %v9422_v30  ;;  %v3580_v22 = vadd.f32 %v9425_v58, %v9424_v50  ;;  %v9426_v14 = vld [vmem:[#allocation24_spill] sm:$0xff]  ;;  %v9428_v18 = vld [vmem:[#allocation79_spill] sm:$0xff]  ;;  %v9430_v32 = vld [vmem:[#allocation81_spill] sm:$0xff]  ;;  %v4289_v58 = vmax.f32 %v4257_v49, 0.0 }
 0x838   : > { %v3582_v1 = vadd.f32 %v9427_v19, %v9426_v14  ;;  %v3584_v48 = vadd.f32 %v9429_v38, %v9428_v18  ;;  %4311 = vst [vmem:[%s8070_s4 + $0x50] sm:$0xff] %v4279_v21  ;;  %v9431_v62 = vld [vmem:[#allocation101_spill] sm:$0xff]  ;;  %v9432_v5 = vld [vmem:[#allocation70_spill] sm:$0xff]  ;;  %v9433_v13 = vld [vmem:[#allocation96_spill] sm:$0xff]  ;;  %v4295_v49 = vmax.f32 %v8060_v56, 0.0 }
 0x839   : > { %v3586_v41 = vadd.f32 %v9431_v62, %v9430_v32  ;;  %v3588_v26 = vadd.f32 %v9433_v13, %v9432_v5  ;;  %v9434_v34 = vld [vmem:[#allocation72_spill] sm:$0xff]  ;;  %v9435_v59 = vld [vmem:[#allocation122_spill] sm:$0xff]  ;;  %v9436_v60 = vld [vmem:[#allocation75_spill] sm:$0xff]  ;;  %4313 = vst [vmem:[%s8070_s4 + $0x60] sm:$0xff] %v4281_v7  ;;  %v4291_v5 = vmax.f32 %v4259_v3, 0.0  ;;  %v4293_v13 = vmax.f32 %v8057_v6, 0.0 }
 0x83a   : > { %v3590_v10 = vadd.f32 %v9435_v59, %v9434_v34  ;;  %v9437_v2 = vld [vmem:[#allocation103_spill] sm:$0xff]  ;;  %v9438_v24 = vld [vmem:[#allocation30_spill] sm:$0xff]  ;;  %v9439_v43 = vld [vmem:[#allocation36_spill] sm:$0xff]  ;;  %4315 = vst [vmem:[%s8070_s4 + $0x70] sm:$0xff] %v4283_v63  ;;  %v4297_v7 = vmax.f32 %v8063_v39, 0.0  ;;  %v4299_v34 = vmax.f32 %v8066_v17, 0.0 }
 0x83b   : > { %v3592_v42 = vadd.f32 %v9437_v2, %v9436_v60  ;;  %v8116_v57 = vmul.f32 %v9439_v43, %v9438_v24  ;;  %v9441_v21 = vld [vmem:[#allocation80_spill] sm:$0xff]  ;;  %v9443_v53 = vld [vmem:[#allocation113_spill] sm:$0xff]  ;;  %v9444_v14 = vld [vmem:[#allocation82_spill] sm:$0xff]  ;;  %4317 = vst [vmem:[%s8070_s4 + $0x80] sm:$0xff] %v4285_v33 }
 0x83c   : > { %v8120_v30 = vmul.f32 %v9441_v21, %v9438_v24  ;;  %v8124_v50 = vmul.f32 %v9443_v53, %v9438_v24  ;;  %v8129_v19 = vmul.f32 %v9444_v14, %v9438_v24  ;;  %v9446_v18 = vld [vmem:[#allocation62_spill] sm:$0xff]  ;;  %v9448_v32 = vld [vmem:[#allocation31_spill] sm:$0xff]  ;;  %4319 = vst [vmem:[%s8070_s4 + $0x90] sm:$0xff] %v4287_v27  ;;  %v9451_v43 = vld [vmem:[#allocation64_spill] sm:$0xff] }
 0x83d   : > { %9440 = vst [vmem:[#allocation59_spill] sm:$0xff] %v8116_v57  ;;  %v8133_v38 = vmul.f32 %v9446_v18, %v9438_v24  ;;  %v8137_v62 = vmul.f32 %v9448_v32, %v9438_v24  ;;  %v9449_v59 = vld [vmem:[#allocation71_spill] sm:$0xff]  ;;  %v9450_v60 = vld [vmem:[#allocation18_spill] sm:$0xff]  ;;  %v9452_v3 = vld [vmem:[#allocation132_spill] sm:$0xff] }
 0x83e   : > { %9442 = vst [vmem:[#allocation123_spill] sm:$0xff] %v8120_v30  ;;  %v3682_v2 = vmul.f32 %v9450_v60, %v9449_v59  ;;  %v3684_v21 = vmul.f32 %v9451_v43, %v9449_v59  ;;  %v3686_v63 = vmul.f32 %v9452_v3, %v9449_v59  ;;  %v9453_v6 = vld [vmem:[#allocation34_spill] sm:$0xff]  ;;  %v9455_v17 = vld [vmem:[#allocation127_spill] sm:$0xff]  ;;  %v9456_v27 = vld [vmem:[#allocation52_spill] sm:$0xff] }
 0x83f   : > { %9445 = vst [vmem:[#allocation107_spill] sm:$0xff] %v8129_v19  ;;  %v3688_v53 = vmul.f32 %v9453_v6, %v9449_v59  ;;  %v9454_v56 = vld [vmem:[#allocation42_spill] sm:$0xff]  ;;  %v3660_v33 = vmul.f32 %v9455_v17, %v9449_v59  ;;  %v3662_v14 = vmul.f32 %v9456_v27, %v9449_v59  ;;  %v9458_v60 = vld [vmem:[#allocation124_spill] sm:$0xff]  ;;  %v9459_v3 = vld [vmem:[#allocation17_spill] sm:$0xff]  ;;  %v3672_v17 = vmul.f32 %v9461_v54, %v9449_v59 }
 0x840   : > { %9447 = vst [vmem:[#allocation106_spill] sm:$0xff] %v8133_v38  ;;  %v3658_v39 = vmul.f32 %v9454_v56, %v9449_v59  ;;  %v9457_v18 = vld [vmem:[#allocation126_spill] sm:$0xff]  ;;  %v3666_v43 = vmul.f32 %v9458_v60, %v9449_v59  ;;  %v3714_v55 = vadd.f32 %v3682_v2, %v3586_v41  ;;  %v3718_v9 = vadd.f32 %v3686_v63, %v3590_v10 }
 0x841   : > { %4321 = vst [vmem:[%s8070_s4 + $0xa0] sm:$0xff] %v4289_v58  ;;  %v3664_v32 = vmul.f32 %v9457_v18, %v9449_v59  ;;  %v3668_v58 = vmul.f32 %v9459_v3, %v9449_v59  ;;  %v9460_v6 = vld [vmem:[#allocation130_spill] sm:$0xff]  ;;  %v3680_v3 = vmul.f32 %v9465_v28, %v9449_v59  ;;  %v3720_v54 = vadd.f32 %v3688_v53, %v3592_v42  ;;  %v9468_v53 = vld [vmem:[#allocation20_spill] sm:$0xff] }
 0x842   : > { %4323 = vst [vmem:[%s8070_s4 + $0xb0] sm:$0xff] %v4291_v5  ;;  %v3670_v56 = vmul.f32 %v9460_v6, %v9449_v59  ;;  %v9462_v27 = vld [vmem:[#allocation22_spill] sm:$0xff]  ;;  %v8182_v6 = vadd.f32 %v3684_v21, %v3588_v26  ;;  %v3694_v28 = vadd.f32 %v3662_v14, %v8081_v8  ;;  %v3698_v26 = vadd.f32 %v3666_v43, %v3570_v20  ;;  %v9472_v8 = vld [vmem:[#allocation19_spill] sm:$0xff]  ;;  %v9473_v20 = vld [vmem:[#allocation128_spill] sm:$0xff]  ;;  %v3122_v14 = vpop.f32.mrf.mxu1 }
 0x843   : > { %4325 = vst [vmem:[%s8070_s4 + $0xc0] sm:$0xff] %v4293_v13  ;;  %v3674_v31 = vmul.f32 %v9462_v27, %v9449_v59  ;;  %v9463_v5 = vld [vmem:[#allocation66_spill] sm:$0xff]  ;;  %v9466_v13 = vld [vmem:[#allocation117_spill] sm:$0xff]  ;;  %v9467_v27 = vld [vmem:[#allocation116_spill] sm:$0xff]  ;;  %v3696_v41 = vadd.f32 %v3664_v32, %v8085_v16  ;;  %v3704_v42 = vadd.f32 %v3672_v17, %v3576_v47  ;;  %v3712_v63 = vadd.f32 %v3680_v3, %v3584_v48 }
 0x844   : > { %v3676_v18 = vmul.f32 %v9463_v5, %v9449_v59  ;;  %v9464_v60 = vld [vmem:[#allocation118_spill] sm:$0xff]  ;;  %4327 = vst [vmem:[%s8070_s4 + $0xd0] sm:$0xff] %v4295_v49  ;;  %v8186_v35 = vmul.f32 %v9466_v13, %v9438_v24  ;;  %v8190_v61 = vmul.f32 %v9467_v27, %v9438_v24  ;;  %v3690_v5 = vadd.f32 %v3658_v39, %v3562_v46  ;;  %v9469_v13 = vld [vmem:[#allocation67_spill] sm:$0xff]  ;;  %v9479_v32 = vld [vmem:[#allocation133_spill] sm:$0xff] }
 0x845   : > { %v3678_v51 = vmul.f32 %v9464_v60, %v9449_v59  ;;  %4329 = vst [vmem:[%s8070_s4 + $0xe0] sm:$0xff] %v4297_v7  ;;  %v3692_v60 = vadd.f32 %v3660_v33, %v3564_v23  ;;  %v3700_v49 = vadd.f32 %v3668_v58, %v3572_v29  ;;  %v3702_v10 = vadd.f32 %v3670_v56, %v3574_v0  ;;  %v9470_v7 = vld [vmem:[#allocation135_spill] sm:$0xff]  ;;  %v9471_v23 = vld [vmem:[#allocation129_spill] sm:$0xff]  ;;  %v9478_v39 = vld [vmem:[#allocation50_spill] sm:$0xff] }
 0x846   : > { %4331 = vst [vmem:[%s8070_s4 + $0xf0] sm:$0xff] %v4299_v34  ;;  %v3706_v59 = vadd.f32 %v3674_v31, %v3578_v40  ;;  %v3708_v2 = vadd.f32 %v3676_v18, %v3580_v22  ;;  %v3786_v27 = vmul.f32 %v9469_v13, %v9468_v53  ;;  %v3788_v46 = vmul.f32 %v9470_v7, %v9468_v53  ;;  %v9474_v31 = vld [vmem:[#allocation41_spill] sm:$0xff]  ;;  %v9476_v40 = vld [vmem:[#allocation136_spill] sm:$0xff]  ;;  %v9481_v17 = vld [vmem:[#allocation139_spill] sm:$0xff] }
 0x847   : > { %v3710_v21 = vadd.f32 %v3678_v51, %v3582_v1  ;;  %v3790_v34 = vmul.f32 %v9471_v23, %v9468_v53  ;;  %v3792_v16 = vmul.f32 %v9472_v8, %v9468_v53  ;;  %v3794_v29 = vmul.f32 %v9473_v20, %v9468_v53  ;;  %v9475_v51 = vld [vmem:[#allocation138_spill] sm:$0xff]  ;;  %v9480_v58 = vld [vmem:[#allocation141_spill] sm:$0xff]  ;;  %v9482_v3 = vld [vmem:[#allocation131_spill] sm:$0xff] }
 0x848   : > { %v3796_v0 = vmul.f32 %v9474_v31, %v9468_v53  ;;  %v3798_v47 = vmul.f32 %v9475_v51, %v9468_v53  ;;  %v3800_v22 = vmul.f32 %v9476_v40, %v9468_v53  ;;  %v9477_v1 = vld [vmem:[#allocation134_spill] sm:$0xff]  ;;  %v3816_v33 = vmul.f32 %v9478_v39, %v9468_v53  ;;  %v9483_v7 = vld [vmem:[#allocation23_spill] sm:$0xff] }
 0x849   : > { %v3814_v48 = vmul.f32 %v9477_v1, %v9468_v53  ;;  %v3802_v43 = vmul.f32 %v9479_v32, %v9468_v53  ;;  %v3804_v56 = vmul.f32 %v9480_v58, %v9468_v53  ;;  %v3806_v18 = vmul.f32 %v9481_v17, %v9468_v53  ;;  %v9484_v8 = vld [vmem:[#allocation142_spill] sm:$0xff] }
 0x84a   : > { %v3808_v13 = vmul.f32 %v9482_v3, %v9468_v53  ;;  %v3810_v23 = vmul.f32 %v9483_v7, %v9468_v53  ;;  %v3812_v20 = vmul.f32 %v9484_v8, %v9468_v53  ;;  %v3848_v51 = vadd.f32 %v3816_v33, %v3720_v54  ;;  %v9485_v38 = vld [vmem:[#allocation86_spill] sm:$0xff] }
 0x84b   : > { %v3846_v31 = vadd.f32 %v3814_v48, %v3718_v9  ;;  %v3818_v40 = vadd.f32 %v3786_v27, %v3690_v5  ;;  %v3820_v1 = vadd.f32 %v3788_v46, %v3692_v60  ;;  %v3822_v39 = vadd.f32 %v3790_v34, %v3694_v28  ;;  %v9486_v19 = vld [vmem:[#allocation74_spill] sm:$0xff]  ;;  %v9489_v5 = vld [vmem:[#allocation29_spill] sm:$0xff] }
 0x84c   : > { %v3824_v32 = vadd.f32 %v3792_v16, %v3696_v41  ;;  %v3826_v25 = vadd.f32 %v3794_v29, %v3698_v26  ;;  %v3828_v58 = vadd.f32 %v3796_v0, %v3700_v49  ;;  %v3830_v4 = vadd.f32 %v3798_v47, %v3702_v10  ;;  %v9488_v53 = vld [vmem:[#allocation90_spill] sm:$0xff]  ;;  %v9490_v28 = vld [vmem:[#allocation137_spill] sm:$0xff]  ;;  %v9492_v10 = vld [vmem:[#allocation47_spill] sm:$0xff] }
 0x84d   : > { %v3926_v17 = vmul.f32 %v9485_v38, %v3122_v14  ;;  %v3832_v11 = vadd.f32 %v3800_v22, %v3704_v42  ;;  %v3834_v37 = vadd.f32 %v3802_v43, %v3706_v59  ;;  %v3836_v3 = vadd.f32 %v3804_v56, %v3708_v2  ;;  %v9491_v26 = vld [vmem:[#allocation73_spill] sm:$0xff]  ;;  %v9493_v2 = vld [vmem:[#allocation140_spill] sm:$0xff] }
 0x84e   : > { %v3932_v30 = vmul.f32 %v9486_v19, %v3122_v14  ;;  %v3838_v7 = vadd.f32 %v3806_v18, %v3710_v21  ;;  %v3938_v57 = vmul.f32 %v9487_v12, %v3122_v14  ;;  %v3942_v9 = vmul.f32 %v9488_v53, %v3122_v14  ;;  %v9494_v21 = vld [vmem:[#allocation56_spill] sm:$0xff] }
 0x84f   : > { %v3944_v54 = vmul.f32 %v9385_v45, %v3122_v14  ;;  %v3914_v60 = vmul.f32 %v9489_v5, %v3122_v14  ;;  %v3916_v41 = vmul.f32 %v9490_v28, %v3122_v14  ;;  %v3918_v49 = vmul.f32 %v9491_v26, %v3122_v14  ;;  %v9495_v12 = vld [vmem:[#allocation76_spill] sm:$0xff]  ;;  %v9506_v26 = vld [vmem:[#allocation109_spill] sm:$0xff] }
 0x850   : > { %v3920_v38 = vmul.f32 %v9492_v10, %v3122_v14  ;;  %v3840_v42 = vadd.f32 %v3808_v13, %v3712_v63  ;;  %v3842_v59 = vadd.f32 %v3810_v23, %v3714_v55  ;;  %v3922_v27 = vmul.f32 %v9493_v2, %v3122_v14  ;;  %v9496_v16 = vld [vmem:[#allocation48_spill] sm:$0xff]  ;;  %v9498_v55 = vld [vmem:[#allocation49_spill] sm:$0xff]  ;;  %v9499_v23 = vld [vmem:[#allocation91_spill] sm:$0xff] }
 0x851   : > { %v3958_v19 = vadd.f32 %v3926_v17, %v3830_v4  ;;  %v3924_v46 = vmul.f32 %v9494_v21, %v3122_v14  ;;  %v3928_v34 = vmul.f32 %v9495_v12, %v3122_v14  ;;  %v3930_v29 = vmul.f32 %v9496_v16, %v3122_v14  ;;  %v9497_v0 = vld [vmem:[#allocation88_spill] sm:$0xff]  ;;  %v9500_v17 = vld [vmem:[#allocation102_spill] sm:$0xff] }
 0x852   : > { %v3964_v45 = vadd.f32 %v3932_v30, %v3836_v3  ;;  %v3934_v47 = vmul.f32 %v9497_v0, %v3122_v14  ;;  %v3970_v22 = vadd.f32 %v3938_v57, %v3842_v59  ;;  %v3974_v48 = vadd.f32 %v3942_v9, %v3846_v31  ;;  %v3172_v31 = vpop.f32.mrf.mxu2  ;;  %v9503_v9 = vld [vmem:[#allocation28_spill] sm:$0xff]  ;;  %v9507_v10 = vld [vmem:[#allocation46_spill] sm:$0xff]  ;;  %v9508_v59 = vld [vmem:[#allocation59_spill] sm:$0xff] }
 0x853   : > { %v3976_v33 = vadd.f32 %v3944_v54, %v3848_v51  ;;  %v3946_v43 = vadd.f32 %v3914_v60, %v3818_v40  ;;  %v3948_v56 = vadd.f32 %v3916_v41, %v3820_v1  ;;  %v3950_v18 = vadd.f32 %v3918_v49, %v3822_v39  ;;  %v9501_v39 = vld [vmem:[#allocation54_spill] sm:$0xff] }
 0x854   : > { %v3952_v63 = vadd.f32 %v3920_v38, %v3824_v32  ;;  %v3936_v13 = vmul.f32 %v9498_v55, %v3122_v14  ;;  %v3940_v4 = vmul.f32 %v9499_v23, %v3122_v14  ;;  %v3954_v8 = vadd.f32 %v3922_v27, %v3826_v25  ;;  %v9502_v25 = vld [vmem:[#allocation55_spill] sm:$0xff] }
 0x855   : > { %v4086_v53 = vadd.f32 %v9500_v17, %v3958_v19  ;;  %v3844_v5 = vadd.f32 %v3812_v20, %v8182_v6  ;;  %v3956_v28 = vadd.f32 %v3924_v46, %v3828_v58  ;;  %v3960_v30 = vadd.f32 %v3928_v34, %v3832_v11  ;;  %v9504_v6 = vld [vmem:[#allocation100_spill] sm:$0xff]  ;;  %v9518_v23 = vld [vmem:[#allocation51_spill] sm:$0xff] }
 0x856   : > { %v4092_v3 = vadd.f32 %v8124_v50, %v3964_v45  ;;  %v3962_v57 = vadd.f32 %v3930_v29, %v3834_v37  ;;  %v4098_v51 = vadd.f32 %v8137_v62, %v3970_v22  ;;  %v8249_v40 = vadd.f32 %v8186_v35, %v3974_v48  ;;  %v9505_v37 = vld [vmem:[#allocation143_spill] sm:$0xff]  ;;  %v9514_v45 = vld [vmem:[#allocation106_spill] sm:$0xff] }
 0x857   : > { %v4104_v1 = vadd.f32 %v8190_v61, %v3976_v33  ;;  %v4074_v14 = vadd.f32 %v9501_v39, %v3946_v43  ;;  %v4076_v32 = vadd.f32 %v9502_v25, %v3948_v56  ;;  %v4078_v54 = vadd.f32 %v9503_v9, %v3950_v18  ;;  %v9516_v33 = vld [vmem:[#allocation39_spill] sm:$0xff]  ;;  %v9517_v56 = vld [vmem:[#allocation68_spill] sm:$0xff]  ;;  %v9522_v9 = vld [vmem:[#allocation53_spill] sm:$0xff] }
 0x858   : > { %v4080_v20 = vadd.f32 %v9504_v6, %v3952_v63  ;;  %v3966_v11 = vadd.f32 %v3934_v47, %v3838_v7  ;;  %v3968_v58 = vadd.f32 %v3936_v13, %v3840_v42  ;;  %v3972_v50 = vadd.f32 %v3940_v4, %v3844_v5  ;;  %v9509_v7 = vld [vmem:[#allocation98_spill] sm:$0xff]  ;;  %v9519_v5 = vld [vmem:[#allocation61_spill] sm:$0xff]  ;;  %v9521_v25 = vld [vmem:[#allocation32_spill] sm:$0xff] }
 0x859   : > { %v4082_v60 = vadd.f32 %v9505_v37, %v3954_v8  ;;  %v4170_v62 = vmul.f32 %v9392_v15, %v3172_v31  ;;  %v4172_v35 = vmul.f32 %v9393_v36, %v3172_v31  ;;  %v4174_v41 = vmul.f32 %v9394_v52, %v3172_v31  ;;  %v9510_v15 = vld [vmem:[#allocation123_spill] sm:$0xff]  ;;  %v9512_v52 = vld [vmem:[#allocation125_spill] sm:$0xff]  ;;  %v9515_v47 = vld [vmem:[#allocation114_spill] sm:$0xff] }
 0x85a   : > { %v4176_v61 = vmul.f32 %v9395_v44, %v3172_v31  ;;  %v4068_v49 = vmul.f32 %v9506_v26, %v9438_v24  ;;  %v4084_v38 = vadd.f32 %v9507_v10, %v3956_v28  ;;  %v4088_v2 = vadd.f32 %v9508_v59, %v3960_v30  ;;  %v9511_v36 = vld [vmem:[#allocation107_spill] sm:$0xff]  ;;  %v9513_v44 = vld [vmem:[#allocation21_spill] sm:$0xff]  ;;  %v9520_v30 = vld [vmem:[#allocation104_spill] sm:$0xff] }
 0x85b   : > { %v4178_v42 = vmul.f32 %v9509_v7, %v3172_v31  ;;  %v4202_v27 = vadd.f32 %v4170_v62, %v4074_v14  ;;  %v4204_v19 = vadd.f32 %v4172_v35, %v4076_v32  ;;  %v4206_v21 = vadd.f32 %v4174_v41, %v4078_v54  ;;  %v9523_v35 = vld [vmem:[#allocation119_spill] sm:$0xff] }
 0x85c   : > { %v4208_v46 = vadd.f32 %v4176_v61, %v4080_v20  ;;  %v4090_v12 = vadd.f32 %v9510_v15, %v3962_v57  ;;  %v4094_v34 = vadd.f32 %v9511_v36, %v3966_v11  ;;  %v4180_v16 = vmul.f32 %v9512_v52, %v3172_v31 }
 0x85d   : > { %v4200_v29 = vmul.f32 %v9513_v44, %v3172_v31  ;;  %v4096_v24 = vadd.f32 %v9514_v45, %v3968_v58  ;;  %v4100_v0 = vadd.f32 %v4068_v49, %v3972_v50  ;;  %v4182_v22 = vmul.f32 %v9515_v47, %v3172_v31 }
 0x85e   : > { %v4210_v48 = vadd.f32 %v4178_v42, %v4082_v60  ;;  %v4184_v43 = vmul.f32 %v9516_v33, %v3172_v31  ;;  %v4186_v18 = vmul.f32 %v9517_v56, %v3172_v31  ;;  %v4212_v63 = vadd.f32 %v4180_v16, %v4084_v38 }
 0x85f   : > { %v4232_v55 = vadd.f32 %v4200_v29, %v4104_v1  ;;  %v4214_v13 = vadd.f32 %v4182_v22, %v4086_v53  ;;  %v4238_v4 = vadd.f32 %v9518_v23, %v4202_v27  ;;  %v4240_v8 = vadd.f32 %v9518_v23, %v4204_v19 }
 0x860   : > { %v4242_v17 = vadd.f32 %v9518_v23, %v4206_v21  ;;  %v4188_v28 = vmul.f32 %v9519_v5, %v3172_v31  ;;  %v4190_v57 = vmul.f32 %v9520_v30, %v3172_v31  ;;  %v4216_v39 = vadd.f32 %v4184_v43, %v4088_v2 }
 0x861   : > { %v4244_v14 = vadd.f32 %v9518_v23, %v4208_v46  ;;  %v4192_v32 = vmul.f32 %v9521_v25, %v3172_v31  ;;  %v4194_v54 = vmul.f32 %v9522_v9, %v3172_v31  ;;  %v4218_v6 = vadd.f32 %v4186_v18, %v4090_v12 }
 0x862   : > { %v4246_v53 = vadd.f32 %v9518_v23, %v4210_v48  ;;  %v4220_v1 = vadd.f32 %v4188_v28, %v4092_v3  ;;  %v4222_v20 = vadd.f32 %v4190_v57, %v4094_v34  ;;  %v4248_v11 = vadd.f32 %v9518_v23, %v4212_v63  ;;  %v9524_v3 = vld [vmem:[#allocation111_spill] sm:$0xff] }
 0x863   : > { %v4268_v58 = vadd.f32 %v9518_v23, %v4232_v55  ;;  %v4250_v50 = vadd.f32 %v9518_v23, %v4214_v13  ;;  %v4270_v37 = vmax.f32 %v4238_v4, 0.0  ;;  %v4272_v60 = vmax.f32 %v4240_v8, 0.0 }
 0x864   : > { %v4274_v62 = vmax.f32 %v4242_v17, 0.0  ;;  %v4196_v41 = vmul.f32 %v9523_v35, %v3172_v31  ;;  %v4224_v61 = vadd.f32 %v4192_v32, %v4096_v24  ;;  %v4252_v26 = vadd.f32 %v9518_v23, %v4216_v39 }
 0x865   : > { %v4276_v49 = vmax.f32 %v4244_v14, 0.0  ;;  %v4198_v10 = vmul.f32 %v9524_v3, %v3172_v31  ;;  %v4226_v38 = vadd.f32 %v4194_v54, %v4098_v51  ;;  %v4254_v59 = vadd.f32 %v9518_v23, %v4218_v6  ;;  %4302 = vst [vmem:[%s8070_s4 + $0x8] sm:$0xff] %v4270_v37 }
 0x866   : > { %v4278_v2 = vmax.f32 %v4246_v53, 0.0  ;;  %v4228_v7 = vadd.f32 %v4196_v41, %v4100_v0  ;;  %v4256_v42 = vadd.f32 %v9518_v23, %v4220_v1  ;;  %v4280_v27 = vmax.f32 %v4248_v11, 0.0  ;;  %4304 = vst [vmem:[%s8070_s4 + $0x18] sm:$0xff] %v4272_v60 }
 0x867   : > { %v4230_v19 = vadd.f32 %v4198_v10, %v8249_v40  ;;  %v4258_v21 = vadd.f32 %v9518_v23, %v4222_v20  ;;  %v4282_v46 = vmax.f32 %v4250_v50, 0.0  ;;  %4306 = vst [vmem:[%s8070_s4 + $0x28] sm:$0xff] %v4274_v62  ;;  %v4260_v31 = vadd.f32 %v9518_v23, %v4224_v61 }
 0x868   : > { %v4284_v51 = vmax.f32 %v4252_v26, 0.0  ;;  %4308 = vst [vmem:[%s8070_s4 + $0x38] sm:$0xff] %v4276_v49  ;;  %v4262_v15 = vadd.f32 %v9518_v23, %v4226_v38  ;;  %v4286_v12 = vmax.f32 %v4254_v59, 0.0  ;;  %v4264_v40 = vadd.f32 %v9518_v23, %v4228_v7 }
 0x869   : > { %4310 = vst [vmem:[%s8070_s4 + $0x48] sm:$0xff] %v4278_v2  ;;  %v4288_v36 = vmax.f32 %v4256_v42, 0.0  ;;  %v4266_v34 = vadd.f32 %v9518_v23, %v4230_v19  ;;  %v4290_v52 = vmax.f32 %v4258_v21, 0.0  ;;  %v4292_v16 = vmax.f32 %v4260_v31, 0.0 }
 0x86a   : > { %4312 = vst [vmem:[%s8070_s4 + $0x58] sm:$0xff] %v4280_v27  ;;  %v4294_v44 = vmax.f32 %v4262_v15, 0.0  ;;  %v4296_v29 = vmax.f32 %v4264_v40, 0.0  ;;  %v4300_v24 = vmax.f32 %v4268_v58, 0.0 }
 0x86b   : > { %4314 = vst [vmem:[%s8070_s4 + $0x68] sm:$0xff] %v4282_v46  ;;  %v4298_v45 = vmax.f32 %v4266_v34, 0.0 }
 0x86c   : > { %4316 = vst [vmem:[%s8070_s4 + $0x78] sm:$0xff] %v4284_v51 }
 0x86d   : > { %4318 = vst [vmem:[%s8070_s4 + $0x88] sm:$0xff] %v4286_v12 }
 0x86e   : > { %4320 = vst [vmem:[%s8070_s4 + $0x98] sm:$0xff] %v4288_v36 }
 0x86f   : > { %4322 = vst [vmem:[%s8070_s4 + $0xa8] sm:$0xff] %v4290_v52 }
 0x870   : > { %4324 = vst [vmem:[%s8070_s4 + $0xb8] sm:$0xff] %v4292_v16 }
 0x871   : > { %4326 = vst [vmem:[%s8070_s4 + $0xc8] sm:$0xff] %v4294_v44 }
 0x872   : > { %4328 = vst [vmem:[%s8070_s4 + $0xd8] sm:$0xff] %v4296_v29 }
 0x873   : > { %4330 = vst [vmem:[%s8070_s4 + $0xe8] sm:$0xff] %v4298_v45 }
 0x874   : > { %4332 = vst [vmem:[%s8070_s4 + $0xf8] sm:$0xff] %v4300_v24 }
 0x875   : > { %4959 = shalt.err (!%p4956_p4)
}
 0x876   : > { %s5010_s18 = smov 128   ;;  %s5011_s4 = smov 8  }
 0x877   : > { %4792 = dma.vmem_to_hbm [thread:$0]  (%p5152_p11), %s4347_s19, 4096, %s4349_s1, %s4334_s30, %s5010_s18, %s5010_s18, %s5011_s4  }
 0x878 PF: > { %s9528_s3 = sld [smem:[#allocation8_spill]]  ;;  %p9530_p7 = scmp.ge.s32.totalorder %s4998_s27, 2 }
 0x87a   : > { %p4799_p5 = pnand %p9530_p7, %p5156_p12 }
 0x87c   : > { %p4800_p8 = pneg %p4799_p5 }
 0x87e   : > { %s4363_s6 = sand.u32 1, %s9528_s3  }
 0x87f   : > { %s4364_s2 = scalar_lea.sflag [#allocation4], %s4363_s6 }
 0x880   : > { %4981 = dma.done.wait (%p4800_p8), %s4364_s2, 4096  }
 0x881   : > { %4983 = vsyncadd (%p4800_p8), %s4364_s2, 4294963200  ;;  %s9531_s27 = sld [smem:[#allocation11_spill]]  ;;  %s9534_s24 = smov %s4990_s25 }
 0x882   : > { %s9532_s22 = sld [smem:[#allocation9_spill]] }
 0x883   : > { %s9533_s26 = sld [smem:[#allocation12_spill]] }
 0x887   : > { %p30_p10 = scmp.ge.s32.totalorder %s9531_s27, 4  }
 0x888   : > { %s9535_s25 = smov %s9532_s22 }
 0x889   :  { %32 = sbr.rel (!%p30_p10) target bundleno = 16 (0x10), region = 137 }
 0x88e   :  { %4370 = vsyncpa [#allocation3], 1 }
 0x88f   :  { %4372 = vsyncpa [#allocation3 + $0x1], 1 }
 0x890   :  { %4373 = vsyncpa [#allocation4], 1 }
 0x891   :  { %4375 = vsyncpa [#allocation4 + $0x1], 1 }

</bundles_post_ra>
